<compile_context>
chip_gen: v5e
topology: v5e:2x2
jax: 0.10.0
libtpu: 0.0.40
codegen_flags: <defaults>
</compile_context>

<pallas_src>
import jax
import jax.numpy as jnp
from jax.experimental import pallas as pl
from jax.experimental.pallas import tpu as pltpu

# ----- constants implied by the module -----
NUM_REWARD_FEATS = 6                    # synthetic small value
NUM_OPTIONS = 3                         # synthetic small value
FEAT_EMBED = 256                        # feat_embed_size
BERT_BASE_HS = 768                      # hidden size of BERT pooler output
NUM_FEATS = NUM_REWARD_FEATS * 3        # feature_extremes=True -> feats + 2*feats

LANE = 128                              # lane tile width


def _round_up(x, m):
    return (x + m - 1) // m * m


# ---------------- Pallas kernel ----------------
def listener_kernel(opts_ref, utt_ref, wopt_ref, bopt_ref,
                    w1_ref, b1_ref, w2t_ref, b2_ref, out_ref):
    # opts_ref: (TILE_M, F_PAD) bf16 -- TILE_M = TILE_G * O_PAD flattened (batch, option) rows
    # utt_ref : (TILE_G, H)     bf16 -- one encoded utterance per batch element (group)
    # wopt/w1/w2t: bf16 weights ; bopt/b1/b2: f32 biases shaped (1, .)
    # out_ref : (TILE_G, O_PAD) f32

    # OptionEncoder: Linear(F, E) + ReLU (dropout_p = 0.0). Bias add / ReLU in f32.
    enc = jnp.dot(opts_ref[...], wopt_ref[...], preferred_element_type=jnp.float32)
    enc = jnp.maximum(enc + bopt_ref[...], 0.0).astype(jnp.bfloat16)          # (TILE_M, E)

    # fc1 -> dropout(eval = identity) -> relu
    h = jnp.dot(enc, w1_ref[...], preferred_element_type=jnp.float32)
    h = jnp.maximum(h + b1_ref[...], 0.0)                                     # (TILE_M, H) f32

    # fc2 + einsum('bij,bj->bi') refactored:
    #   logits[b, o] = h[b, o, :] . (W2^T @ utt[b]) + b2 . utt[b]
    # -> the 768x768 matmul is done once per batch element, not once per option row.
    utt = utt_ref[...]                                                        # (TILE_G, H) bf16
    w2u = jnp.dot(utt, w2t_ref[...], preferred_element_type=jnp.float32)      # (TILE_G, H) f32
    b2u = jnp.sum(utt.astype(jnp.float32) * b2_ref[...], axis=-1,
                  keepdims=True)                                              # (TILE_G, 1)

    tile_g, o_pad = out_ref.shape
    # Splitting the 128-row sublane dim into (TILE_G, O_PAD) keeps the minor (lane) dim
    # intact, so this reshape is layout-preserving (no VMEM copy).
    h3 = h.reshape(tile_g, o_pad, h.shape[-1])                                # (TILE_G, O_PAD, H)
    logits = jnp.sum(h3 * w2u[:, None, :], axis=-1)                           # (TILE_G, O_PAD)
    out_ref[...] = logits + b2u


# ---------------- wrapper ----------------
def bert_encoder_option_listener(options, encoded_utt, params):
    """options: [B, O, F] f32; encoded_utt: [B, H] f32 -> logits [B, O] f32."""
    B, O, F = options.shape
    H = encoded_utt.shape[-1]
    E = params["w_opt"].shape[-1]

    o_pad = _round_up(O, 8)
    tile_g = max(8, LANE // o_pad)       # batch elements (groups) per row tile (multiple of 8)
    tile_m = tile_g * o_pad              # flattened option rows per tile (>= 128 for o_pad=8)
    num_tiles = pl.cdiv(B, tile_g)
    g_pad = num_tiles * tile_g
    m_pad = g_pad * o_pad
    f_pad = _round_up(F, LANE)           # lane-dense feature dim for the first matmul

    # Flatten (batch, option) -> rows; zero-padded rows/columns contribute nothing that
    # survives the final [:B, :O] slice.
    opts_p = jnp.zeros((g_pad, o_pad, f_pad), jnp.float32)
    opts_p = opts_p.at[:B, :O, :F].set(options)
    opts_p = opts_p.reshape(m_pad, f_pad).astype(jnp.bfloat16)

    utt_p = jnp.zeros((g_pad, H), jnp.float32).at[:B].set(encoded_utt).astype(jnp.bfloat16)

    wopt_p = jnp.zeros((f_pad, E), jnp.float32).at[:F].set(params["w_opt"]).astype(jnp.bfloat16)
    w1 = params["w1"].astype(jnp.bfloat16)
    w2t = params["w2"].T.astype(jnp.bfloat16)          # (H, H): utt @ w2t == W2^T applied to utt
    bopt = params["b_opt"].reshape(1, E).astype(jnp.float32)
    b1 = params["b1"].reshape(1, H).astype(jnp.float32)
    b2 = params["b2"].reshape(1, H).astype(jnp.float32)

    # NOTE: grid-invariant weight blocks are fetched once (index_map constant across the
    # grid), so default double-buffering costs ~1.6 MB of idle VMEM only -- far under the
    # 32 MiB scoped budget at these shapes; single-buffering is not worth the risk here.
    out = pl.pallas_call(
        listener_kernel,
        out_shape=jax.ShapeDtypeStruct((g_pad, o_pad), jnp.float32),
        grid_spec=pltpu.PrefetchScalarGridSpec(
            num_scalar_prefetch=0,
            grid=(num_tiles,),
            in_specs=[
                pl.BlockSpec((tile_m, f_pad), lambda t: (t, 0)),    # flattened option rows
                pl.BlockSpec((tile_g, H), lambda t: (t, 0)),        # encoded utterances
                pl.BlockSpec((f_pad, E), lambda t: (0, 0)),         # option-encoder W
                pl.BlockSpec((1, E), lambda t: (0, 0)),             # option-encoder b
                pl.BlockSpec((E, H), lambda t: (0, 0)),             # fc1 W
                pl.BlockSpec((1, H), lambda t: (0, 0)),             # fc1 b
                pl.BlockSpec((H, H), lambda t: (0, 0)),             # fc2 W (pre-transposed)
                pl.BlockSpec((1, H), lambda t: (0, 0)),             # fc2 b
            ],
            out_specs=pl.BlockSpec((tile_g, o_pad), lambda t: (t, 0)),
        ),
        compiler_params=pltpu.CompilerParams(
            dimension_semantics=("parallel",),           # independent row tiles (v7x: 2 TCs)
            vmem_limit_bytes=32 * 1024 * 1024),
    )(opts_p, utt_p, wopt_p, bopt, w1, b1, w2t, b2)

    return out[:B, :O]


# ---------------- pure-JAX reference ----------------
def reference(options, encoded_utt, params):
    enc = jax.nn.relu(options @ params["w_opt"] + params["b_opt"])
    x = jax.nn.relu(enc @ params["w1"] + params["b1"])
    x = x @ params["w2"] + params["b2"]
    return jnp.einsum("bij,bj->bi", x, encoded_utt)


def init_params(key):
    ks = jax.random.split(key, 6)
    s = 0.05
    return {
        "w_opt": s * jax.random.normal(ks[0], (NUM_FEATS, FEAT_EMBED), jnp.float32),
        "b_opt": s * jax.random.normal(ks[1], (FEAT_EMBED,), jnp.float32),
        "w1":    s * jax.random.normal(ks[2], (FEAT_EMBED, BERT_BASE_HS), jnp.float32),
        "b1":    s * jax.random.normal(ks[3], (BERT_BASE_HS,), jnp.float32),
        "w2":    s * jax.random.normal(ks[4], (BERT_BASE_HS, BERT_BASE_HS), jnp.float32),
        "b2":    s * jax.random.normal(ks[5], (BERT_BASE_HS,), jnp.float32),
    }


if __name__ == "__main__":
    key = jax.random.PRNGKey(0)
    k_opts, k_utt, k_params = jax.random.split(key, 3)

    B = 2
    options = jax.random.normal(k_opts, (B, NUM_OPTIONS, NUM_FEATS), jnp.float32)
    encoded_utt = jax.random.normal(k_utt, (B, BERT_BASE_HS), jnp.float32)
    params = init_params(k_params)

    logits = bert_encoder_option_listener(options, encoded_utt, params)
    logits = jax.block_until_ready(logits)

    ref = reference(options, encoded_utt, params)
    assert logits.shape == (B, NUM_OPTIONS), logits.shape

    # bf16 matmul operands with f32 accumulation: compare against the f32 reference with a
    # max-magnitude-relative tolerance (avoids false failures on near-zero logits).
    err = float(jnp.max(jnp.abs(logits - ref)))
    scale = float(jnp.max(jnp.abs(ref))) + 1e-6
    assert err <= 5e-2 * scale + 1e-3, (err, scale, logits, ref)
    print("KERNEL_OK")
</pallas_src>

<mosaic_0001>
module attributes {stable_mosaic.version = 11 : i64} {
  func.func @listener_kernel(%arg0: i32, %arg1: memref<128x128xbf16, #tpu.memory_space<vmem>>, %arg2: memref<16x768xbf16, #tpu.memory_space<vmem>>, %arg3: memref<128x256xbf16, #tpu.memory_space<vmem>>, %arg4: memref<1x256xf32, #tpu.memory_space<vmem>>, %arg5: memref<256x768xbf16, #tpu.memory_space<vmem>>, %arg6: memref<1x768xf32, #tpu.memory_space<vmem>>, %arg7: memref<768x768xbf16, #tpu.memory_space<vmem>>, %arg8: memref<1x768xf32, #tpu.memory_space<vmem>>, %arg9: memref<16x8xf32, #tpu.memory_space<vmem>>) attributes {dimension_semantics = [#tpu.dimension_semantics<parallel>], iteration_bounds = array<i64: 1>, scalar_prefetch = 0 : i64, scratch_operands = 0 : i64, tpu.core_type = #tpu.core_type<tc>, window_params = [{transform_indices = @transform_0, window_bounds = array<i64: 128, 128>}, {transform_indices = @transform_1, window_bounds = array<i64: 16, 768>}, {pipeline_mode = #tpu.pipeline_mode<synchronous>, transform_indices = @transform_2, window_bounds = array<i64: 128, 256>}, {pipeline_mode = #tpu.pipeline_mode<synchronous>, transform_indices = @transform_3, window_bounds = array<i64: 1, 256>}, {pipeline_mode = #tpu.pipeline_mode<synchronous>, transform_indices = @transform_4, window_bounds = array<i64: 256, 768>}, {pipeline_mode = #tpu.pipeline_mode<synchronous>, transform_indices = @transform_5, window_bounds = array<i64: 1, 768>}, {pipeline_mode = #tpu.pipeline_mode<synchronous>, transform_indices = @transform_6, window_bounds = array<i64: 768, 768>}, {pipeline_mode = #tpu.pipeline_mode<synchronous>, transform_indices = @transform_7, window_bounds = array<i64: 1, 768>}, {transform_indices = @transform_8, window_bounds = array<i64: 16, 8>}]} {
    %c0 = arith.constant 0 : index
    %c0_0 = arith.constant 0 : index
    %0 = vector.load %arg1[%c0, %c0_0] : memref<128x128xbf16, #tpu.memory_space<vmem>>, vector<128x128xbf16>
    %c0_1 = arith.constant 0 : index
    %c0_2 = arith.constant 0 : index
    %1 = vector.load %arg3[%c0_1, %c0_2] : memref<128x256xbf16, #tpu.memory_space<vmem>>, vector<128x256xbf16>
    %cst = arith.constant dense<0.000000e+00> : vector<128x256xf32>
    %2 = tpu.matmul %0, %1, %cst {dimension_numbers = #tpu.dot_dimension_numbers<[1], [0], [0], [1], [0, 0, 1, 1], [], []>} : vector<128x128xbf16>, vector<128x256xbf16>, vector<128x256xf32> -> vector<128x256xf32>
    %c0_3 = arith.constant 0 : index
    %c0_4 = arith.constant 0 : index
    %3 = vector.load %arg4[%c0_3, %c0_4] : memref<1x256xf32, #tpu.memory_space<vmem>>, vector<1x256xf32>
    %4 = vector.broadcast %3 : vector<1x256xf32> to vector<128x256xf32>
    %5 = arith.addf %2, %4 : vector<128x256xf32>
    %cst_5 = arith.constant 0.000000e+00 : f32
    %6 = vector.broadcast %cst_5 : f32 to vector<128x256xf32>
    %7 = arith.maximumf %5, %6 : vector<128x256xf32>
    %8 = arith.truncf %7 : vector<128x256xf32> to vector<128x256xbf16>
    %c0_6 = arith.constant 0 : index
    %c0_7 = arith.constant 0 : index
    %9 = vector.load %arg5[%c0_6, %c0_7] : memref<256x768xbf16, #tpu.memory_space<vmem>>, vector<256x768xbf16>
    %cst_8 = arith.constant dense<0.000000e+00> : vector<128x768xf32>
    %10 = tpu.matmul %8, %9, %cst_8 {dimension_numbers = #tpu.dot_dimension_numbers<[1], [0], [0], [1], [0, 0, 1, 1], [], []>} : vector<128x256xbf16>, vector<256x768xbf16>, vector<128x768xf32> -> vector<128x768xf32>
    %c0_9 = arith.constant 0 : index
    %c0_10 = arith.constant 0 : index
    %11 = vector.load %arg6[%c0_9, %c0_10] : memref<1x768xf32, #tpu.memory_space<vmem>>, vector<1x768xf32>
    %12 = vector.broadcast %11 : vector<1x768xf32> to vector<128x768xf32>
    %13 = arith.addf %10, %12 : vector<128x768xf32>
    %cst_11 = arith.constant 0.000000e+00 : f32
    %14 = vector.broadcast %cst_11 : f32 to vector<128x768xf32>
    %15 = arith.maximumf %13, %14 : vector<128x768xf32>
    %c0_12 = arith.constant 0 : index
    %c0_13 = arith.constant 0 : index
    %16 = vector.load %arg2[%c0_12, %c0_13] : memref<16x768xbf16, #tpu.memory_space<vmem>>, vector<16x768xbf16>
    %c0_14 = arith.constant 0 : index
    %c0_15 = arith.constant 0 : index
    %17 = vector.load %arg7[%c0_14, %c0_15] : memref<768x768xbf16, #tpu.memory_space<vmem>>, vector<768x768xbf16>
    %cst_16 = arith.constant dense<0.000000e+00> : vector<16x768xf32>
    %18 = tpu.matmul %16, %17, %cst_16 {dimension_numbers = #tpu.dot_dimension_numbers<[1], [0], [0], [1], [0, 0, 1, 1], [], []>} : vector<16x768xbf16>, vector<768x768xbf16>, vector<16x768xf32> -> vector<16x768xf32>
    %19 = arith.extf %16 : vector<16x768xbf16> to vector<16x768xf32>
    %c0_17 = arith.constant 0 : index
    %c0_18 = arith.constant 0 : index
    %20 = vector.load %arg8[%c0_17, %c0_18] : memref<1x768xf32, #tpu.memory_space<vmem>>, vector<1x768xf32>
    %21 = vector.broadcast %20 : vector<1x768xf32> to vector<16x768xf32>
    %22 = arith.mulf %19, %21 : vector<16x768xf32>
    %cst_19 = arith.constant dense<0.000000e+00> : vector<16xf32>
    %23 = vector.multi_reduction <add>, %22, %cst_19 [1] : vector<16x768xf32> to vector<16xf32>
    %24 = vector.shape_cast %23 : vector<16xf32> to vector<16x1xf32>
    %25 = vector.shape_cast %15 : vector<128x768xf32> to vector<16x8x768xf32>
    %26 = vector.shape_cast %18 : vector<16x768xf32> to vector<16x1x768xf32>
    %27 = vector.broadcast %26 : vector<16x1x768xf32> to vector<16x8x768xf32>
    %28 = arith.mulf %25, %27 : vector<16x8x768xf32>
    %cst_20 = arith.constant dense<0.000000e+00> : vector<16x8xf32>
    %29 = vector.multi_reduction <add>, %28, %cst_20 [2] : vector<16x8x768xf32> to vector<16x8xf32>
    %30 = vector.broadcast %24 : vector<16x1xf32> to vector<16x8xf32>
    %31 = arith.addf %29, %30 : vector<16x8xf32>
    %c0_21 = arith.constant 0 : index
    %c0_22 = arith.constant 0 : index
    %32 = vector.load %arg9[%c0_21, %c0_22] : memref<16x8xf32, #tpu.memory_space<vmem>>, vector<16x8xf32>
    tpu.vector_store %arg9[%c0_21, %c0_22], %31 {strides = array<i32>} : memref<16x8xf32, #tpu.memory_space<vmem>>, vector<16x8xf32>,
    return
  }
  func.func @transform_0(%arg0: i32) -> (i32, i32) {
    %c0_i32 = arith.constant 0 : i32
    %c0_i32_0 = arith.constant 0 : i32
    return %arg0, %c0_i32 : i32, i32
  }
  func.func @transform_1(%arg0: i32) -> (i32, i32) {
    %c0_i32 = arith.constant 0 : i32
    %c0_i32_0 = arith.constant 0 : i32
    return %arg0, %c0_i32 : i32, i32
  }
  func.func @transform_2(%arg0: i32) -> (i32, i32) {
    %c0_i32 = arith.constant 0 : i32
    %c0_i32_0 = arith.constant 0 : i32
    %c0_i32_1 = arith.constant 0 : i32
    return %c0_i32, %c0_i32_0 : i32, i32
  }
  func.func @transform_3(%arg0: i32) -> (i32, i32) {
    %c0_i32 = arith.constant 0 : i32
    %c0_i32_0 = arith.constant 0 : i32
    %c0_i32_1 = arith.constant 0 : i32
    return %c0_i32, %c0_i32_0 : i32, i32
  }
  func.func @transform_4(%arg0: i32) -> (i32, i32) {
    %c0_i32 = arith.constant 0 : i32
    %c0_i32_0 = arith.constant 0 : i32
    %c0_i32_1 = arith.constant 0 : i32
    return %c0_i32, %c0_i32_0 : i32, i32
  }
  func.func @transform_5(%arg0: i32) -> (i32, i32) {
    %c0_i32 = arith.constant 0 : i32
    %c0_i32_0 = arith.constant 0 : i32
    %c0_i32_1 = arith.constant 0 : i32
    return %c0_i32, %c0_i32_0 : i32, i32
  }
  func.func @transform_6(%arg0: i32) -> (i32, i32) {
    %c0_i32 = arith.constant 0 : i32
    %c0_i32_0 = arith.constant 0 : i32
    %c0_i32_1 = arith.constant 0 : i32
    return %c0_i32, %c0_i32_0 : i32, i32
  }
  func.func @transform_7(%arg0: i32) -> (i32, i32) {
    %c0_i32 = arith.constant 0 : i32
    %c0_i32_0 = arith.constant 0 : i32
    %c0_i32_1 = arith.constant 0 : i32
    return %c0_i32, %c0_i32_0 : i32, i32
  }
  func.func @transform_8(%arg0: i32) -> (i32, i32) {
    %c0_i32 = arith.constant 0 : i32
    %c0_i32_0 = arith.constant 0 : i32
    return %arg0, %c0_i32 : i32, i32
  }
}

</mosaic_0001>

<bundles_post_ra>
// kernel: tpu_custom_call.1
= control target key start
LH: loop header
LB: loop body
LE: loop exit
PB: predicated region body
PF: predicated region fallthrough
CT: control target
= control target key end

     0   :  { %13 = vsyncpa [#allocation3], 0  ;;  %s8387_s0 = inlined_call_operand.hbm [shape: bf16[128,128], index: 0, kind: input, shape index: {}]   ;;  %s8388_s1 = inlined_call_operand.hbm [shape: bf16[16,768], index: 1, kind: input, shape index: {}]   ;;  %s8389_s2 = inlined_call_operand.hbm [shape: bf16[128,256], index: 2, kind: input, shape index: {}]   ;;  %s8390_s3 = inlined_call_operand.hbm [shape: f32[1,256], index: 3, kind: input, shape index: {}]   ;;  %s8391_s4 = inlined_call_operand.hbm [shape: bf16[256,768], index: 4, kind: input, shape index: {}]   ;;  %s8392_s5 = inlined_call_operand.hbm [shape: f32[1,768], index: 5, kind: input, shape index: {}]   ;;  %s8393_s6 = inlined_call_operand.hbm [shape: bf16[768,768], index: 6, kind: input, shape index: {}]   ;;  %s8394_s7 = inlined_call_operand.hbm [shape: f32[1,768], index: 7, kind: input, shape index: {}]   ;;  %s8395_s8 = inlined_call_operand.vmem [shape: f32[16,8], index: 8, kind: output, shape index: {}]  }
   0x1   :  { %14 = vsyncpa [#allocation5], 0 }
   0x2   :  { %15 = vsyncpa [#allocation8], 0 }
   0x3   :  { %16 = vsyncpa [#allocation11], 0  ;;  %s35_s29 = sshll.u32 %s8388_s1, 4  ;;  %s36_s29 = int_to_ptr.hbm [resolvable:$true] %s35_s29 }
   0x4   :  { %17 = vsyncpa [#allocation14], 0  ;;  %s7046_s30 = smov [#allocation4]   ;;  %s62_s12 = sshll.u32 %s8390_s3, 4  ;;  %s63_s12 = int_to_ptr.hbm [resolvable:$true] %s62_s12 }
   0x5   :  { %s37_s9 = sshll.u32 %s7046_s30, 4  ;;  %s7047_s13 = smov 384   ;;  %s38_s9 = int_to_ptr.vmem [resolvable:$true] %s37_s9 }
   0x6   :  { %s7048_s14 = smov 24   ;;  %s7049_s15 = smov [#allocation7]  }
   0x7   :  { %43 = dma.hbm_to_vmem [thread:$0]  %s36_s29, 768, %s38_s9, [#allocation5], %s7047_s13, %s7047_s13, %s7048_s14  }
   0x8   :  { %s64_s16 = sshll.u32 %s7049_s15, 4  ;;  %s86_s18 = sshll.u32 %s8392_s5, 4  ;;  %s65_s16 = int_to_ptr.vmem [resolvable:$true] %s64_s16  ;;  %s87_s18 = int_to_ptr.hbm [resolvable:$true] %s86_s18 }
   0x9   :  { %67 = dma.hbm_to_vmem [thread:$0]  %s63_s12, 32, %s65_s16, [#allocation8]  }
   0xa   :  { %s22_s3 = sshll.u32 %s8387_s0, 4  ;;  %s7050_s21 = smov [#allocation10]   ;;  %s23_s3 = int_to_ptr.hbm [resolvable:$true] %s22_s3 }
   0xb   :  { %s88_s22 = sshll.u32 %s7050_s21, 4  ;;  %s7051_s23 = smov [#allocation2]   ;;  %s89_s22 = int_to_ptr.vmem [resolvable:$true] %s88_s22 }
   0xc   :  { %91 = dma.hbm_to_vmem [thread:$0]  %s87_s18, 96, %s89_s22, [#allocation11]  }
   0xd   :  { %s24_s24 = sshll.u32 %s7051_s23, 4  ;;  %s7052_s25 = smov 64   ;;  %s25_s24 = int_to_ptr.vmem [resolvable:$true] %s24_s24 }
   0xe   :  { %s7053_s26 = smov 4   ;;  %s48_s28 = sshll.u32 %s8389_s2, 4  ;;  %s49_s28 = int_to_ptr.hbm [resolvable:$true] %s48_s28 }
   0xf   :  { %30 = dma.hbm_to_vmem [thread:$0]  %s23_s3, 1024, %s25_s24, [#allocation3], %s7052_s25, %s7052_s25, %s7053_s26  }
  0x10   :  { %s7054_s29 = smov [#allocation6]   ;;  %s72_s10 = sshll.u32 %s8391_s4, 4  ;;  %s73_s10 = int_to_ptr.hbm [resolvable:$true] %s72_s10 }
  0x11   :  { %s50_s30 = sshll.u32 %s7054_s29, 4  ;;  %s7055_s11 = smov 128   ;;  %s51_s30 = int_to_ptr.vmem [resolvable:$true] %s50_s30 }
  0x12   :  { %s7056_s12 = smov 8   ;;  %s7057_s15 = smov [#allocation9]  }
  0x13   :  { %56 = dma.hbm_to_vmem [thread:$0]  %s49_s28, 2048, %s51_s30, [#allocation5], %s7055_s11, %s7055_s11, %s7056_s12  }
  0x14   :  { %s74_s16 = sshll.u32 %s7057_s15, 4  ;;  %s96_s18 = sshll.u32 %s8393_s6, 4  ;;  %s75_s16 = int_to_ptr.vmem [resolvable:$true] %s74_s16  ;;  %s97_s18 = int_to_ptr.hbm [resolvable:$true] %s96_s18 }
  0x15   :  { %80 = dma.hbm_to_vmem [thread:$0]  %s73_s10, 12288, %s75_s16, [#allocation8], %s7047_s13, %s7047_s13, %s7048_s14  }
  0x16   :  { %s110_s4 = sshll.u32 %s8394_s7, 4  ;;  %s7058_s20 = smov [#allocation12]   ;;  %s111_s4 = int_to_ptr.hbm [resolvable:$true] %s110_s4 }
  0x17   :  { %s98_s3 = sshll.u32 %s7058_s20, 4  ;;  %s7059_s21 = smov [#allocation13]   ;;  %s99_s3 = int_to_ptr.vmem [resolvable:$true] %s98_s3 }
  0x18   :  { %104 = dma.hbm_to_vmem [thread:$0]  %s97_s18, 36864, %s99_s3, [#allocation11], %s7047_s13, %s7047_s13, %s7048_s14  }
  0x19   :  { %s112_s6 = sshll.u32 %s7059_s21, 4  ;;  %s113_s6 = int_to_ptr.vmem [resolvable:$true] %s112_s6 }
  0x1a   :  { %115 = dma.hbm_to_vmem [thread:$0]  %s111_s4, 96, %s113_s6, [#allocation14]  }
  0x1b   :  { %7036 = dma.done.wait [#allocation3], 1024  }
  0x1c   :  { %7037 = vsyncadd [#allocation3], 4294966272 }
  0x1d   :  { %7038 = dma.done.wait [#allocation5], 2816  }
  0x1e   :  { %7039 = vsyncadd [#allocation5], 4294964480 }
  0x1f   :  { %7040 = dma.done.wait [#allocation8], 12320  }
  0x20   :  { %7041 = vsyncadd [#allocation8], 4294954976 }
  0x21   :  { %7042 = dma.done.wait [#allocation11], 36960  }
  0x22   :  { %7043 = vsyncadd [#allocation11], 4294930336 }
  0x23   :  { %7044 = dma.done.wait [#allocation14], 96  }
  0x24   :  { %7045 = vsyncadd [#allocation14], 4294967200  ;;  %v4845_v0 = vld [vmem:[#allocation6 + $0x70] sm:$0xf]  ;;  %v6434_v1 = vld [vmem:[#allocation6 + $0x74] sm:$0xf0] }
  0x25   :  { %v6433_v2 = vld [vmem:[#allocation6 + $0x74] sm:$0xf]  ;;  %v4846_v3 = vor.u32 %v6434_v1, %v4845_v0  ;;  %v4847_v4 = vld [vmem:[#allocation6 + $0x78] sm:$0xf0]  ;;  %v4837_v5 = vld [vmem:[#allocation6 + $0x60] sm:$0xf] }
  0x26   :  { %v6432_v6 = vld [vmem:[#allocation6 + $0x64] sm:$0xf0]  ;;  %v4850_v7 = vor.u32 %v6433_v2, %v4847_v4  ;;  %v6431_v8 = vld [vmem:[#allocation6 + $0x64] sm:$0xf]  ;;  %v4839_v9 = vld [vmem:[#allocation6 + $0x68] sm:$0xf0] }
  0x27   :  { %314 = vmatpush.bf16.msra.mxu0 %v4846_v3  ;;  %v4838_v10 = vor.u32 %v6432_v6, %v4837_v5  ;;  %v4842_v11 = vor.u32 %v6431_v8, %v4839_v9  ;;  %v4829_v12 = vld [vmem:[#allocation6 + $0x50] sm:$0xf]  ;;  %v6430_v13 = vld [vmem:[#allocation6 + $0x54] sm:$0xf0]  ;;  %v6429_v14 = vld [vmem:[#allocation6 + $0x54] sm:$0xf] }
  0x28   :  { %363 = vmatpush.bf16.msra.mxu1 %v4850_v7  ;;  %v4831_v15 = vld [vmem:[#allocation6 + $0x58] sm:$0xf0]  ;;  %v4830_v16 = vor.u32 %v6430_v13, %v4829_v12  ;;  %v4821_v18 = vld [vmem:[#allocation6 + $0x40] sm:$0xf]  ;;  %v6428_v19 = vld [vmem:[#allocation6 + $0x44] sm:$0xf0] }
  0x29   :  { %v4834_v17 = vor.u32 %v6429_v14, %v4831_v15  ;;  %v6427_v20 = vld [vmem:[#allocation6 + $0x44] sm:$0xf]  ;;  %v4823_v21 = vld [vmem:[#allocation6 + $0x48] sm:$0xf0]  ;;  %v4822_v22 = vor.u32 %v6428_v19, %v4821_v18  ;;  %v4813_v24 = vld [vmem:[#allocation6 + $0x30] sm:$0xf] }
  0x2a   :  { %v4826_v23 = vor.u32 %v6427_v20, %v4823_v21  ;;  %v6426_v25 = vld [vmem:[#allocation6 + $0x34] sm:$0xf0]  ;;  %v6425_v26 = vld [vmem:[#allocation6 + $0x34] sm:$0xf]  ;;  %v4815_v27 = vld [vmem:[#allocation6 + $0x38] sm:$0xf0] }
  0x2b   :  { %315 = vmatpush.bf16.msra.mxu0 %v4838_v10  ;;  %v4814_v28 = vor.u32 %v6426_v25, %v4813_v24  ;;  %v4818_v29 = vor.u32 %v6425_v26, %v4815_v27  ;;  %v4805_v30 = vld [vmem:[#allocation6 + $0x20] sm:$0xf]  ;;  %v6424_v31 = vld [vmem:[#allocation6 + $0x24] sm:$0xf0]  ;;  %v6423_v32 = vld [vmem:[#allocation6 + $0x24] sm:$0xf] }
  0x2c   :  { %364 = vmatpush.bf16.msra.mxu1 %v4842_v11  ;;  %v4807_v33 = vld [vmem:[#allocation6 + $0x28] sm:$0xf0]  ;;  %v4806_v34 = vor.u32 %v6424_v31, %v4805_v30  ;;  %v4797_v36 = vld [vmem:[#allocation6 + $0x10] sm:$0xf]  ;;  %v6422_v37 = vld [vmem:[#allocation6 + $0x14] sm:$0xf0] }
  0x2d   :  { %v4810_v35 = vor.u32 %v6423_v32, %v4807_v33  ;;  %v6421_v38 = vld [vmem:[#allocation6 + $0x14] sm:$0xf]  ;;  %v4799_v39 = vld [vmem:[#allocation6 + $0x18] sm:$0xf0]  ;;  %v4798_v40 = vor.u32 %v6422_v37, %v4797_v36  ;;  %v4789_v42 = vld [vmem:[#allocation6] sm:$0xf] }
  0x2e   :  { %v4802_v41 = vor.u32 %v6421_v38, %v4799_v39  ;;  %v6420_v43 = vld [vmem:[#allocation6 + $0x4] sm:$0xf0]  ;;  %v6419_v44 = vld [vmem:[#allocation6 + $0x4] sm:$0xf]  ;;  %v4791_v45 = vld [vmem:[#allocation6 + $0x8] sm:$0xf0] }
  0x2f   :  { %316 = vmatpush.bf16.msra.mxu0 %v4830_v16  ;;  %v4790_v46 = vor.u32 %v6420_v43, %v4789_v42  ;;  %v4794_v47 = vor.u32 %v6419_v44, %v4791_v45  ;;  %v6411_v48 = vld [vmem:[#allocation2] sm:$0xff]  ;;  %v6412_v49 = vld [vmem:[#allocation2 + $0x8] sm:$0xff]  ;;  %v6413_v50 = vld [vmem:[#allocation2 + $0x10] sm:$0xff]  ;;  %vm4076_vm0 = vcmask 1040384   ;;  %vm4080_vm1 = vcmask 1043459  }
  0x30   :  { %365 = vmatpush.bf16.msra.mxu1 %v4834_v17  ;;  %v6414_v51 = vld [vmem:[#allocation2 + $0x18] sm:$0xff]  ;;  %v6415_v52 = vld [vmem:[#allocation2 + $0x20] sm:$0xff]  ;;  %v6416_v1 = vld [vmem:[#allocation2 + $0x28] sm:$0xff]  ;;  %vm8485_vm2 = vcmask 1044484   ;;  %vm4119_vm3 = vcmask 1046528   ;;  %vm4097_vm4 = vcmask 1042434  }
  0x31   :  { %v5021_v53 = vld [vmem:[#allocation9 + $0x150] sm:$0xf]  ;;  %v6480_v54 = vld [vmem:[#allocation9 + $0x164] sm:$0xf0]  ;;  %v6477_v58 = vld [vmem:[#allocation9 + $0x154] sm:$0xf] }
  0x32   :  { %v5213_v55 = vld [vmem:[#allocation9 + $0x2d0] sm:$0xf]  ;;  %v5022_v56 = vor.u32 %v6480_v54, %v5021_v53  ;;  %v6528_v57 = vld [vmem:[#allocation9 + $0x2e4] sm:$0xf0]  ;;  %v5023_v59 = vld [vmem:[#allocation9 + $0x168] sm:$0xf0] }
  0x33   :  { %317 = vmatpush.bf16.msra.mxu0 %v4822_v22  ;;  %v5214_v60 = vor.u32 %v6528_v57, %v5213_v55  ;;  %v5026_v61 = vor.u32 %v6477_v58, %v5023_v59  ;;  %v6525_v62 = vld [vmem:[#allocation9 + $0x2d4] sm:$0xf]  ;;  %v5215_v63 = vld [vmem:[#allocation9 + $0x2e8] sm:$0xf0]  ;;  %v4997_v2 = vld [vmem:[#allocation9 + $0x120] sm:$0xf] }
  0x34   :  { %366 = vmatpush.bf16.msra.mxu1 %v4826_v23  ;;  %1050 = vmatpush.bf16.msra.mxu2 %v5022_v56  ;;  %v5218_v0 = vor.u32 %v6525_v62, %v5215_v63  ;;  %v6474_v3 = vld [vmem:[#allocation9 + $0x134] sm:$0xf0]  ;;  %v5189_v4 = vld [vmem:[#allocation9 + $0x2a0] sm:$0xf]  ;;  %v6471_v7 = vld [vmem:[#allocation9 + $0x124] sm:$0xf] }
  0x35   :  { %1099 = vmatpush.bf16.msra.mxu3 %v5214_v60  ;;  %v4998_v5 = vor.u32 %v6474_v3, %v4997_v2  ;;  %v6522_v6 = vld [vmem:[#allocation9 + $0x2b4] sm:$0xf0]  ;;  %v4999_v8 = vld [vmem:[#allocation9 + $0x138] sm:$0xf0]  ;;  %v6519_v11 = vld [vmem:[#allocation9 + $0x2a4] sm:$0xf] }
  0x36   :  { %v5190_v9 = vor.u32 %v6522_v6, %v5189_v4  ;;  %v5002_v10 = vor.u32 %v6471_v7, %v4999_v8  ;;  %v5191_v12 = vld [vmem:[#allocation9 + $0x2b8] sm:$0xf0]  ;;  %v4973_v13 = vld [vmem:[#allocation9 + $0xf0] sm:$0xf]  ;;  %v6468_v15 = vld [vmem:[#allocation9 + $0x104] sm:$0xf0] }
  0x37   :  { %318 = vmatpush.bf16.msra.mxu0 %v4814_v28  ;;  %v5194_v14 = vor.u32 %v6519_v11, %v5191_v12  ;;  %v5165_v16 = vld [vmem:[#allocation9 + $0x270] sm:$0xf]  ;;  %v6516_v17 = vld [vmem:[#allocation9 + $0x284] sm:$0xf0]  ;;  %v4974_v18 = vor.u32 %v6468_v15, %v4973_v13  ;;  %v6465_v20 = vld [vmem:[#allocation9 + $0xf4] sm:$0xf] }
  0x38   :  { %367 = vmatpush.bf16.msra.mxu1 %v4818_v29  ;;  %1051 = vmatpush.bf16.msra.mxu2 %v4998_v5  ;;  %v5166_v19 = vor.u32 %v6516_v17, %v5165_v16  ;;  %v4975_v21 = vld [vmem:[#allocation9 + $0x108] sm:$0xf0]  ;;  %v6513_v22 = vld [vmem:[#allocation9 + $0x274] sm:$0xf]  ;;  %v4949_v25 = vld [vmem:[#allocation9 + $0xc0] sm:$0xf] }
  0x39   :  { %1100 = vmatpush.bf16.msra.mxu3 %v5190_v9  ;;  %v4978_v23 = vor.u32 %v6465_v20, %v4975_v21  ;;  %v5167_v24 = vld [vmem:[#allocation9 + $0x288] sm:$0xf0]  ;;  %v6462_v26 = vld [vmem:[#allocation9 + $0xd4] sm:$0xf0]  ;;  %v5141_v28 = vld [vmem:[#allocation9 + $0x240] sm:$0xf] }
  0x3a   :  { %v5170_v27 = vor.u32 %v6513_v22, %v5167_v24  ;;  %v6510_v29 = vld [vmem:[#allocation9 + $0x254] sm:$0xf0]  ;;  %v6459_v30 = vld [vmem:[#allocation9 + $0xc4] sm:$0xf]  ;;  %v4950_v31 = vor.u32 %v6462_v26, %v4949_v25  ;;  %v4951_v32 = vld [vmem:[#allocation9 + $0xd8] sm:$0xf0] }
  0x3b   :  { %319 = vmatpush.bf16.msra.mxu0 %v4806_v34  ;;  %v6507_v33 = vld [vmem:[#allocation9 + $0x244] sm:$0xf]  ;;  %v5143_v34 = vld [vmem:[#allocation9 + $0x258] sm:$0xf0]  ;;  %v4954_v36 = vor.u32 %v6459_v30, %v4951_v32  ;;  %v4925_v39 = vld [vmem:[#allocation9 + $0x90] sm:$0xf] }
  0x3c   :  { %368 = vmatpush.bf16.msra.mxu1 %v4810_v35  ;;  %1052 = vmatpush.bf16.msra.mxu2 %v4974_v18  ;;  %v5142_v35 = vor.u32 %v6510_v29, %v5141_v28  ;;  %v5146_v37 = vor.u32 %v6507_v33, %v5143_v34  ;;  %v6417_v38 = vld [vmem:[#allocation2 + $0x30] sm:$0xff]  ;;  %v6504_v43 = vld [vmem:[#allocation9 + $0x224] sm:$0xf0]  ;;  %v6453_v44 = vld [vmem:[#allocation9 + $0x94] sm:$0xf]  ;;  %vm4086_vm5 = vcmask 1041409  }
  0x3d   :  { %1101 = vmatpush.bf16.msra.mxu3 %v5166_v19  ;;  %v4927_v45 = vld [vmem:[#allocation9 + $0xa8] sm:$0xf0]  ;;  %v5093_v54 = vld [vmem:[#allocation9 + $0x1e0] sm:$0xf]  ;;  %v6498_v55 = vld [vmem:[#allocation9 + $0x1f4] sm:$0xf0] }
  0x3e   :  { %v6447_v56 = vld [vmem:[#allocation9 + $0x64] sm:$0xf]  ;;  %v5094_v57 = vor.u32 %v6498_v55, %v5093_v54  ;;  %v4903_v58 = vld [vmem:[#allocation9 + $0x78] sm:$0xf0]  ;;  %v4877_v63 = vld [vmem:[#allocation9 + $0x30] sm:$0xf] }
  0x3f   :  { %320 = vmatpush.bf16.msra.mxu0 %v4798_v40  ;;  %v6456_v40 = vld [vmem:[#allocation9 + $0xa4] sm:$0xf0]  ;;  %v6495_v59 = vld [vmem:[#allocation9 + $0x1e4] sm:$0xf]  ;;  %v5095_v60 = vld [vmem:[#allocation9 + $0x1f8] sm:$0xf0] }
  0x40   :  { %369 = vmatpush.bf16.msra.mxu1 %v4802_v41  ;;  %1053 = vmatpush.bf16.msra.mxu2 %v4950_v31  ;;  %v5117_v41 = vld [vmem:[#allocation9 + $0x210] sm:$0xf]  ;;  %v4926_v42 = vor.u32 %v6456_v40, %v4925_v39  ;;  %v5098_v62 = vor.u32 %v6495_v59, %v5095_v60  ;;  %v6492_v3 = vld [vmem:[#allocation9 + $0x1c4] sm:$0xf0]  ;;  %v6441_v4 = vld [vmem:[#allocation9 + $0x34] sm:$0xf] }
  0x41   :  { %1102 = vmatpush.bf16.msra.mxu3 %v5142_v35  ;;  %v4879_v5 = vld [vmem:[#allocation9 + $0x48] sm:$0xf0]  ;;  %v6489_v8 = vld [vmem:[#allocation9 + $0x1b4] sm:$0xf]  ;;  %v4853_v11 = vld [vmem:[#allocation9] sm:$0xf] }
  0x42   :  { %v4882_v7 = vor.u32 %v6441_v4, %v4879_v5  ;;  %v5071_v9 = vld [vmem:[#allocation9 + $0x1c8] sm:$0xf0]  ;;  %v6438_v12 = vld [vmem:[#allocation9 + $0x14] sm:$0xf0]  ;;  %v5045_v13 = vld [vmem:[#allocation9 + $0x180] sm:$0xf] }
  0x43   :  { %321 = vmatpush.bf16.msra.mxu0 %v4790_v46  ;;  %v5118_v46 = vor.u32 %v6504_v43, %v5117_v41  ;;  %v6486_v15 = vld [vmem:[#allocation9 + $0x194] sm:$0xf0]  ;;  %v6435_v16 = vld [vmem:[#allocation9 + $0x4] sm:$0xf]  ;;  %v4855_v17 = vld [vmem:[#allocation9 + $0x18] sm:$0xf0] }
  0x44   :  { %370 = vmatpush.bf16.msra.mxu1 %v4794_v47  ;;  %v4930_v47 = vor.u32 %v6453_v44, %v4927_v45  ;;  %1054 = vmatpush.bf16.msra.mxu2 %v4926_v42  ;;  %v5046_v18 = vor.u32 %v6486_v15, %v5045_v13  ;;  %v4858_v19 = vor.u32 %v6435_v16, %v4855_v17  ;;  %v6483_v20 = vld [vmem:[#allocation9 + $0x184] sm:$0xf]  ;;  %v5047_v21 = vld [vmem:[#allocation9 + $0x198] sm:$0xf0]  ;;  %vm8481_vm6 = vcmask 1045509  }
  0x45   :  { %1103 = vmatpush.bf16.msra.mxu3 %v5118_v46  ;;  %v5050_v22 = vor.u32 %v6483_v20, %v5047_v21  ;;  %v180_v24 = vld [vmem:[#allocation7] sm:$0x3]  ;;  %vm8484_vm7 = vcmask 1046534   ;;  %vm4078_vm8 = vcmask 1041408   ;;  %vm4082_vm9 = vcmask 1044483  }
  0x46   :  { %322 = vmatmul.bf16.vlgmr.msra.gmra.mxu0 %v6411_v48  ;;  %v7141_v28 = vperm.slane %v180_v24, 1  ;;  %vm4092_vm10 = vcmask 1045508   ;;  %vm4121_vm11 = vcmask 1046529   ;;  %vm4099_vm12 = vcmask 1043458  }
  0x47   :  { %371 = vmatmul.bf16.vlgmr.msra.gmra.mxu1 %v6411_v48  ;;  %1148 = vmatpush.bf16.msrb.mxu0 %v5026_v61  ;;  %v6501_v48 = vld [vmem:[#allocation9 + $0x214] sm:$0xf]  ;;  %v4906_v61 = vor.u32 %v6447_v56, %v4903_v58  ;;  %vm4103_vm13 = vcmask 1046533   ;;  %vm8479_vm14 = vcmask 1042433   ;;  %vm8480_vm15 = vcmask 1045504  }
  0x48   :  { %1197 = vmatpush.bf16.msrb.mxu1 %v5218_v0  ;;  %v6444_v0 = vld [vmem:[#allocation9 + $0x44] sm:$0xf0] }
  0x49   :  { %1104 = vmatpush.bf16.msra.mxu3 %v5094_v57  ;;  %v4878_v2 = vor.u32 %v6444_v0, %v4877_v63 }
  0x4b   :  { %1149 = vmatpush.bf16.msrb.mxu0 %v5002_v10  ;;  %v5074_v10 = vor.u32 %v6489_v8, %v5071_v9 }
  0x4c   :  { %1198 = vmatpush.bf16.msrb.mxu1 %v5194_v14  ;;  %v4854_v14 = vor.u32 %v6438_v12, %v4853_v11 }
  0x4f   :  { %1150 = vmatpush.bf16.msrb.mxu0 %v4978_v23  ;;  %v6418_v23 = vld [vmem:[#allocation2 + $0x38] sm:$0xff] }
  0x50   :  { %1199 = vmatpush.bf16.msrb.mxu1 %v5170_v27  ;;  %v7139_v27 = vperm.slane %v180_v24, 0 }
  0x53   :  { %1151 = vmatpush.bf16.msrb.mxu0 %v4954_v36 }
  0x54   :  { %1200 = vmatpush.bf16.msrb.mxu1 %v5146_v37 }
  0x56   :  { %327 = vmatmul.bf16.gmra.mxu0 %v6412_v49 }
  0x57   :  { %376 = vmatmul.bf16.gmra.mxu1 %v6412_v49  ;;  %v5119_v49 = vld [vmem:[#allocation9 + $0x228] sm:$0xf0]  ;;  %1152 = vmatpush.bf16.msrb.mxu0 %v4930_v47 }
  0x5b   :  { %1153 = vmatpush.bf16.msrb.mxu0 %v4906_v61 }
  0x5f   :  { %1154 = vmatpush.bf16.msrb.mxu0 %v4882_v7 }
  0x63   :  { %1155 = vmatpush.bf16.msrb.mxu0 %v4858_v19 }
  0x66   :  { %332 = vmatmul.bf16.gmra.mxu0 %v6413_v50 }
  0x67   :  { %381 = vmatmul.bf16.gmra.mxu1 %v6413_v50  ;;  %v5122_v50 = vor.u32 %v6501_v48, %v5119_v49 }
  0x69   :  { %1201 = vmatpush.bf16.msrb.mxu1 %v5122_v50 }
  0x6d   :  { %1202 = vmatpush.bf16.msrb.mxu1 %v5098_v62 }
  0x71   :  { %1203 = vmatpush.bf16.msrb.mxu1 %v5074_v10 }
  0x75   :  { %1204 = vmatpush.bf16.msrb.mxu1 %v5050_v22 }
  0x76   :  { %337 = vmatmul.bf16.gmra.mxu0 %v6414_v51 }
  0x77   :  { %386 = vmatmul.bf16.gmra.mxu1 %v6414_v51  ;;  %v4901_v51 = vld [vmem:[#allocation9 + $0x60] sm:$0xf] }
  0x86   :  { %342 = vmatmul.bf16.gmra.mxu0 %v6415_v52 }
  0x87   :  { %391 = vmatmul.bf16.gmra.mxu1 %v6415_v52  ;;  %v6450_v52 = vld [vmem:[#allocation9 + $0x74] sm:$0xf0] }
  0x88   :  { %v4902_v53 = vor.u32 %v6450_v52, %v4901_v51 }
  0x8a   :  { %1055 = vmatpush.bf16.msra.mxu2 %v4902_v53 }
  0x8e   :  { %1056 = vmatpush.bf16.msra.mxu2 %v4878_v2 }
  0x92   :  { %1057 = vmatpush.bf16.msra.mxu2 %v4854_v14 }
  0x96   :  { %347 = vmatmul.bf16.gmra.mxu0 %v6416_v1 }
  0x97   :  { %396 = vmatmul.bf16.gmra.mxu1 %v6416_v1  ;;  %v5069_v1 = vld [vmem:[#allocation9 + $0x1b0] sm:$0xf] }
  0x98   :  { %v5070_v6 = vor.u32 %v6492_v3, %v5069_v1 }
  0x9a   :  { %1105 = vmatpush.bf16.msra.mxu3 %v5070_v6 }
  0x9e   :  { %1106 = vmatpush.bf16.msra.mxu3 %v5046_v18 }
  0xa6   :  { %352 = vmatmul.bf16.gmra.mxu0 %v6417_v38 }
  0xa7   :  { %401 = vmatmul.bf16.gmra.mxu1 %v6417_v38 }
  0xb6   :  { %357 = vmatmul.bf16.gmra.mxu0 %v6418_v23 }
  0xb7   :  { %406 = vmatmul.bf16.gmra.mxu1 %v6418_v23 }
  0xc3   :  { %v323_v25 = vpop.f32.mrf.mxu0 }
  0xc4   :  { %v372_v26 = vpop.f32.mrf.mxu1  ;;  %v324_v29 = vadd.f32 %v323_v25, %v7139_v27 }
  0xc5   :  { %v373_v30 = vadd.f32 %v372_v26, %v7141_v28 }
  0xc6   :  { %v412_v35 = vmax.f32 %v324_v29, 0.0 }
  0xc7   :  { %v413_v37 = vmax.f32 %v373_v30, 0.0 }
  0xcb   :  { %v325_v31 = vpop.f32.mrf.mxu0 }
  0xcc   :  { %v326_v32 = vadd.f32 %v325_v31, %v7139_v27  ;;  %v374_v33 = vpop.f32.mrf.mxu1 }
  0xcd   :  { %v375_v34 = vadd.f32 %v374_v33, %v7141_v28 }
  0xce   :  { %v414_v36 = vmax.f32 %v326_v32, 0.0 }
  0xcf   :  { %v415_v38 = vmax.f32 %v375_v34, 0.0 }
  0xd0   :  { %v7147_v39 = vpack.c.bf16 %v414_v36, %v412_v35  ;;  %v5029_v35 = vld [vmem:[#allocation9 + $0x158] sm:$0xf]  ;;  %v6481_v36 = vld [vmem:[#allocation9 + $0x16c] sm:$0xf0] }
  0xd1   :  { %v7149_v40 = vpack.c.bf16 %v415_v38, %v413_v37  ;;  %v5221_v37 = vld [vmem:[#allocation9 + $0x2d8] sm:$0xf]  ;;  %v5030_v38 = vor.u32 %v6481_v36, %v5029_v35 }
  0xd2   :  { %1058 = vmatmul.bf16.vlgmr.msra.gmra.mxu2 %v7147_v39  ;;  %1156 = vmatmul.bf16.vlgmr.msrb.gmra.mxu0 %v7147_v39 }
  0xd3   :  { %1107 = vmatmul.bf16.vlgmr.msra.gmra.mxu3 %v7149_v40  ;;  %1205 = vmatmul.bf16.vlgmr.msrb.gmra.mxu1 %v7149_v40  ;;  %v328_v41 = vpop.f32.mrf.mxu0 }
  0xd4   :  { %v377_v42 = vpop.f32.mrf.mxu1  ;;  %v329_v43 = vadd.f32 %v328_v41, %v7139_v27  ;;  %v6529_v41 = vld [vmem:[#allocation9 + $0x2ec] sm:$0xf0]  ;;  %1246 = vmatpush.bf16.msrb.mxu2 %v5030_v38  ;;  %v4959_v38 = vld [vmem:[#allocation9 + $0xe0] sm:$0xf0] }
  0xd5   :  { %v378_v44 = vadd.f32 %v377_v42, %v7141_v28  ;;  %v6478_v42 = vld [vmem:[#allocation9 + $0x15c] sm:$0xf] }
  0xd6   :  { %v416_v49 = vmax.f32 %v329_v43, 0.0  ;;  %v5031_v43 = vld [vmem:[#allocation9 + $0x170] sm:$0xf0] }
  0xd7   :  { %v417_v51 = vmax.f32 %v378_v44, 0.0 }
  0xdb   :  { %v330_v45 = vpop.f32.mrf.mxu0 }
  0xdc   :  { %v331_v46 = vadd.f32 %v330_v45, %v7139_v27  ;;  %v379_v47 = vpop.f32.mrf.mxu1  ;;  %v5222_v45 = vor.u32 %v6529_v41, %v5221_v37  ;;  %v6508_v41 = vld [vmem:[#allocation9 + $0x24c] sm:$0xf] }
  0xdd   :  { %v380_v48 = vadd.f32 %v379_v47, %v7141_v28  ;;  %v6526_v47 = vld [vmem:[#allocation9 + $0x2dc] sm:$0xf] }
  0xde   :  { %v418_v50 = vmax.f32 %v331_v46, 0.0  ;;  %v5034_v46 = vor.u32 %v6478_v42, %v5031_v43  ;;  %1295 = vmatpush.bf16.msrb.mxu3 %v5222_v45 }
  0xdf   :  { %v419_v52 = vmax.f32 %v380_v48, 0.0  ;;  %v5223_v48 = vld [vmem:[#allocation9 + $0x2f0] sm:$0xf0] }
  0xe0   :  { %v7159_v53 = vpack.c.bf16 %v418_v50, %v416_v49  ;;  %v5226_v50 = vor.u32 %v6526_v47, %v5223_v48  ;;  %1344 = vmatpush.bf16.msra.mxu0 %v5034_v46  ;;  %v4933_v47 = vld [vmem:[#allocation9 + $0x98] sm:$0xf]  ;;  %v6457_v48 = vld [vmem:[#allocation9 + $0xac] sm:$0xf0] }
  0xe1   :  { %v7161_v54 = vpack.c.bf16 %v419_v52, %v417_v51  ;;  %v5005_v51 = vld [vmem:[#allocation9 + $0x128] sm:$0xf]  ;;  %v6475_v52 = vld [vmem:[#allocation9 + $0x13c] sm:$0xf0] }
  0xe2   :  { %1063 = vmatmul.bf16.gmra.mxu2 %v7159_v53  ;;  %1161 = vmatmul.bf16.gmra.mxu0 %v7159_v53 }
  0xe3   :  { %1112 = vmatmul.bf16.gmra.mxu3 %v7161_v54  ;;  %1210 = vmatmul.bf16.gmra.mxu1 %v7161_v54  ;;  %v333_v55 = vpop.f32.mrf.mxu0 }
  0xe4   :  { %v382_v56 = vpop.f32.mrf.mxu1  ;;  %v334_v57 = vadd.f32 %v333_v55, %v7139_v27  ;;  %v5197_v55 = vld [vmem:[#allocation9 + $0x2a8] sm:$0xf]  ;;  %1393 = vmatpush.bf16.msra.mxu1 %v5226_v50  ;;  %v4934_v50 = vor.u32 %v6457_v48, %v4933_v47  ;;  %v6487_v47 = vld [vmem:[#allocation9 + $0x19c] sm:$0xf0]  ;;  %v6436_v48 = vld [vmem:[#allocation9 + $0xc] sm:$0xf] }
  0xe5   :  { %v383_v58 = vadd.f32 %v382_v56, %v7141_v28  ;;  %v5006_v56 = vor.u32 %v6475_v52, %v5005_v51  ;;  %v6505_v51 = vld [vmem:[#allocation9 + $0x22c] sm:$0xf0]  ;;  %v6454_v52 = vld [vmem:[#allocation9 + $0x9c] sm:$0xf] }
  0xe6   :  { %v420_v63 = vmax.f32 %v334_v57, 0.0  ;;  %v6523_v57 = vld [vmem:[#allocation9 + $0x2bc] sm:$0xf0] }
  0xe7   :  { %v421_v1 = vmax.f32 %v383_v58, 0.0  ;;  %v6472_v58 = vld [vmem:[#allocation9 + $0x12c] sm:$0xf]  ;;  %1247 = vmatpush.bf16.msrb.mxu2 %v5006_v56 }
  0xeb   :  { %v335_v59 = vpop.f32.mrf.mxu0 }
  0xec   :  { %v336_v60 = vadd.f32 %v335_v59, %v7139_v27  ;;  %v384_v61 = vpop.f32.mrf.mxu1  ;;  %v5198_v59 = vor.u32 %v6523_v57, %v5197_v55  ;;  %v4935_v55 = vld [vmem:[#allocation9 + $0xb0] sm:$0xf0] }
  0xed   :  { %v385_v62 = vadd.f32 %v384_v61, %v7141_v28  ;;  %v6520_v61 = vld [vmem:[#allocation9 + $0x2ac] sm:$0xf] }
  0xee   :  { %v422_v0 = vmax.f32 %v336_v60, 0.0  ;;  %v5007_v60 = vld [vmem:[#allocation9 + $0x140] sm:$0xf0]  ;;  %1296 = vmatpush.bf16.msrb.mxu3 %v5198_v59  ;;  %v5127_v59 = vld [vmem:[#allocation9 + $0x230] sm:$0xf0] }
  0xef   :  { %v423_v2 = vmax.f32 %v385_v62, 0.0  ;;  %v5010_v62 = vor.u32 %v6472_v58, %v5007_v60  ;;  %v6502_v58 = vld [vmem:[#allocation9 + $0x21c] sm:$0xf]  ;;  %v4909_v60 = vld [vmem:[#allocation9 + $0x68] sm:$0xf] }
  0xf0   :  { %v7171_v3 = vpack.c.bf16 %v422_v0, %v420_v63  ;;  %v5199_v63 = vld [vmem:[#allocation9 + $0x2c0] sm:$0xf0] }
  0xf1   :  { %v7173_v4 = vpack.c.bf16 %v423_v2, %v421_v1  ;;  %v5202_v0 = vor.u32 %v6520_v61, %v5199_v63  ;;  %v4981_v1 = vld [vmem:[#allocation9 + $0xf8] sm:$0xf]  ;;  %v6469_v2 = vld [vmem:[#allocation9 + $0x10c] sm:$0xf0]  ;;  %1345 = vmatpush.bf16.msra.mxu0 %v5010_v62  ;;  %v4938_v62 = vor.u32 %v6454_v52, %v4935_v55  ;;  %v5130_v63 = vor.u32 %v6502_v58, %v5127_v59  ;;  %v4863_v52 = vld [vmem:[#allocation9 + $0x20] sm:$0xf0] }
  0xf2   :  { %1068 = vmatmul.bf16.gmra.mxu2 %v7171_v3  ;;  %1166 = vmatmul.bf16.gmra.mxu0 %v7171_v3  ;;  %v6484_v55 = vld [vmem:[#allocation9 + $0x18c] sm:$0xf]  ;;  %v5055_v58 = vld [vmem:[#allocation9 + $0x1a0] sm:$0xf0] }
  0xf3   :  { %1117 = vmatmul.bf16.gmra.mxu3 %v7173_v4  ;;  %1215 = vmatmul.bf16.gmra.mxu1 %v7173_v4  ;;  %v338_v5 = vpop.f32.mrf.mxu0 }
  0xf4   :  { %v387_v6 = vpop.f32.mrf.mxu1  ;;  %v339_v7 = vadd.f32 %v338_v5, %v7139_v27  ;;  %v5173_v5 = vld [vmem:[#allocation9 + $0x278] sm:$0xf]  ;;  %1394 = vmatpush.bf16.msra.mxu1 %v5202_v0  ;;  %v6451_v0 = vld [vmem:[#allocation9 + $0x7c] sm:$0xf0] }
  0xf5   :  { %v388_v8 = vadd.f32 %v387_v6, %v7141_v28 }
  0xf6   :  { %v424_v13 = vmax.f32 %v339_v7, 0.0  ;;  %v4982_v7 = vor.u32 %v6469_v2, %v4981_v1  ;;  %v5101_v1 = vld [vmem:[#allocation9 + $0x1e8] sm:$0xf]  ;;  %v6499_v2 = vld [vmem:[#allocation9 + $0x1fc] sm:$0xf0] }
  0xf7   :  { %v425_v15 = vmax.f32 %v388_v8, 0.0  ;;  %v6517_v8 = vld [vmem:[#allocation9 + $0x28c] sm:$0xf0] }
  0xf8   :  { %1248 = vmatpush.bf16.msrb.mxu2 %v4982_v7  ;;  %v6448_v7 = vld [vmem:[#allocation9 + $0x6c] sm:$0xf] }
  0xfb   :  { %v340_v9 = vpop.f32.mrf.mxu0 }
  0xfc   :  { %v341_v10 = vadd.f32 %v340_v9, %v7139_v27  ;;  %v389_v11 = vpop.f32.mrf.mxu1  ;;  %v6466_v9 = vld [vmem:[#allocation9 + $0xfc] sm:$0xf] }
  0xfd   :  { %v390_v12 = vadd.f32 %v389_v11, %v7141_v28 }
  0xfe   :  { %v426_v14 = vmax.f32 %v341_v10, 0.0  ;;  %v4983_v10 = vld [vmem:[#allocation9 + $0x110] sm:$0xf0] }
  0xff   :  { %v427_v16 = vmax.f32 %v390_v12, 0.0 }
 0x100   :  { %v7183_v17 = vpack.c.bf16 %v426_v14, %v424_v13  ;;  %v5174_v13 = vor.u32 %v6517_v8, %v5173_v5  ;;  %v4986_v14 = vor.u32 %v6466_v9, %v4983_v10  ;;  %v4910_v5 = vor.u32 %v6451_v0, %v4909_v60  ;;  %v4911_v8 = vld [vmem:[#allocation9 + $0x80] sm:$0xf0]  ;;  %v6496_v9 = vld [vmem:[#allocation9 + $0x1ec] sm:$0xf] }
 0x101   :  { %v7185_v18 = vpack.c.bf16 %v427_v16, %v425_v15  ;;  %v6514_v15 = vld [vmem:[#allocation9 + $0x27c] sm:$0xf]  ;;  %v5175_v16 = vld [vmem:[#allocation9 + $0x290] sm:$0xf0]  ;;  %v5103_v10 = vld [vmem:[#allocation9 + $0x200] sm:$0xf0]  ;;  %v5058_v60 = vor.u32 %v6484_v55, %v5055_v58 }
 0x102   :  { %1073 = vmatmul.bf16.gmra.mxu2 %v7183_v17  ;;  %1171 = vmatmul.bf16.gmra.mxu0 %v7183_v17 }
 0x103   :  { %1122 = vmatmul.bf16.gmra.mxu3 %v7185_v18  ;;  %1220 = vmatmul.bf16.gmra.mxu1 %v7185_v18  ;;  %v343_v19 = vpop.f32.mrf.mxu0 }
 0x104   :  { %v392_v20 = vpop.f32.mrf.mxu1  ;;  %v344_v21 = vadd.f32 %v343_v19, %v7139_v27  ;;  %1297 = vmatpush.bf16.msrb.mxu3 %v5174_v13  ;;  %1346 = vmatpush.bf16.msra.mxu0 %v4986_v14  ;;  %v5077_v13 = vld [vmem:[#allocation9 + $0x1b8] sm:$0xf]  ;;  %v4914_v14 = vor.u32 %v6448_v7, %v4911_v8 }
 0x105   :  { %v393_v22 = vadd.f32 %v392_v20, %v7141_v28 }
 0x106   :  { %v428_v29 = vmax.f32 %v344_v21, 0.0  ;;  %v5178_v21 = vor.u32 %v6514_v15, %v5175_v16  ;;  %v5106_v15 = vor.u32 %v6496_v9, %v5103_v10  ;;  %v6493_v16 = vld [vmem:[#allocation9 + $0x1cc] sm:$0xf0] }
 0x107   :  { %v429_v31 = vmax.f32 %v393_v22, 0.0 }
 0x108   :  { %1395 = vmatpush.bf16.msra.mxu1 %v5178_v21  ;;  %v5078_v21 = vor.u32 %v6493_v16, %v5077_v13 }
 0x10b   :  { %v345_v23 = vpop.f32.mrf.mxu0 }
 0x10c   :  { %v346_v24 = vadd.f32 %v345_v23, %v7139_v27  ;;  %v394_v25 = vpop.f32.mrf.mxu1  ;;  %v4957_v23 = vld [vmem:[#allocation9 + $0xc8] sm:$0xf] }
 0x10d   :  { %v395_v26 = vadd.f32 %v394_v25, %v7141_v28  ;;  %v5149_v25 = vld [vmem:[#allocation9 + $0x248] sm:$0xf] }
 0x10e   :  { %v430_v30 = vmax.f32 %v346_v24, 0.0  ;;  %v6463_v24 = vld [vmem:[#allocation9 + $0xdc] sm:$0xf0] }
 0x10f   :  { %v431_v32 = vmax.f32 %v395_v26, 0.0 }
 0x110   :  { %v7195_v33 = vpack.c.bf16 %v430_v30, %v428_v29  ;;  %v4958_v30 = vor.u32 %v6463_v24, %v4957_v23  ;;  %v6490_v23 = vld [vmem:[#allocation9 + $0x1bc] sm:$0xf]  ;;  %v5079_v24 = vld [vmem:[#allocation9 + $0x1d0] sm:$0xf0] }
 0x111   :  { %v7197_v34 = vpack.c.bf16 %v431_v32, %v429_v31  ;;  %v6511_v31 = vld [vmem:[#allocation9 + $0x25c] sm:$0xf0]  ;;  %v6460_v32 = vld [vmem:[#allocation9 + $0xcc] sm:$0xf] }
 0x112   :  { %1078 = vmatmul.bf16.gmra.mxu2 %v7195_v33  ;;  %1176 = vmatmul.bf16.gmra.mxu0 %v7195_v33  ;;  %v5150_v37 = vor.u32 %v6511_v31, %v5149_v25  ;;  %v4962_v43 = vor.u32 %v6460_v32, %v4959_v38  ;;  %v6439_v38 = vld [vmem:[#allocation9 + $0x1c] sm:$0xf0] }
 0x113   :  { %1127 = vmatmul.bf16.gmra.mxu3 %v7197_v34  ;;  %1225 = vmatmul.bf16.gmra.mxu1 %v7197_v34  ;;  %v348_v44 = vpop.f32.mrf.mxu0 }
 0x114   :  { %v397_v49 = vpop.f32.mrf.mxu1  ;;  %v349_v6 = vadd.f32 %v348_v44, %v7139_v27  ;;  %1249 = vmatpush.bf16.msrb.mxu2 %v4958_v30  ;;  %v5151_v44 = vld [vmem:[#allocation9 + $0x260] sm:$0xf0]  ;;  %1298 = vmatpush.bf16.msrb.mxu3 %v5150_v37  ;;  %v4861_v37 = vld [vmem:[#allocation9 + $0x8] sm:$0xf] }
 0x115   :  { %v398_v11 = vadd.f32 %v397_v49, %v7141_v28  ;;  %v5154_v46 = vor.u32 %v6508_v41, %v5151_v44  ;;  %v5125_v49 = vld [vmem:[#allocation9 + $0x218] sm:$0xf]  ;;  %1347 = vmatpush.bf16.msra.mxu0 %v4962_v43  ;;  %v5053_v41 = vld [vmem:[#allocation9 + $0x188] sm:$0xf] }
 0x116   :  { %v432_v26 = vmax.f32 %v349_v6, 0.0  ;;  %v5126_v57 = vor.u32 %v6505_v51, %v5125_v49  ;;  %v5102_v6 = vor.u32 %v6499_v2, %v5101_v1  ;;  %v5054_v51 = vor.u32 %v6487_v47, %v5053_v41 }
 0x117   :  { %v433_v35 = vmax.f32 %v398_v11, 0.0  ;;  %1396 = vmatpush.bf16.msra.mxu1 %v5154_v46  ;;  %v4885_v11 = vld [vmem:[#allocation9 + $0x38] sm:$0xf]  ;;  %v4862_v46 = vor.u32 %v6439_v38, %v4861_v37 }
 0x118   :  { %1250 = vmatpush.bf16.msrb.mxu2 %v4934_v50  ;;  %1299 = vmatpush.bf16.msrb.mxu3 %v5126_v57  ;;  %v4866_v57 = vor.u32 %v6436_v48, %v4863_v52 }
 0x119   :  { %1348 = vmatpush.bf16.msra.mxu0 %v4938_v62 }
 0x11b   :  { %v350_v12 = vpop.f32.mrf.mxu0  ;;  %1397 = vmatpush.bf16.msra.mxu1 %v5130_v63 }
 0x11c   :  { %v351_v19 = vadd.f32 %v350_v12, %v7139_v27  ;;  %v399_v20 = vpop.f32.mrf.mxu1  ;;  %v6445_v12 = vld [vmem:[#allocation9 + $0x4c] sm:$0xf0]  ;;  %1251 = vmatpush.bf16.msrb.mxu2 %v4910_v5  ;;  %1300 = vmatpush.bf16.msrb.mxu3 %v5102_v6 }
 0x11d   :  { %v400_v22 = vadd.f32 %v399_v20, %v7141_v28  ;;  %v4886_v20 = vor.u32 %v6445_v12, %v4885_v11  ;;  %1349 = vmatpush.bf16.msra.mxu0 %v4914_v14 }
 0x11e   :  { %v434_v29 = vmax.f32 %v351_v19, 0.0  ;;  %v6442_v19 = vld [vmem:[#allocation9 + $0x3c] sm:$0xf] }
 0x11f   :  { %v435_v36 = vmax.f32 %v400_v22, 0.0  ;;  %v4887_v22 = vld [vmem:[#allocation9 + $0x50] sm:$0xf0]  ;;  %1398 = vmatpush.bf16.msra.mxu1 %v5106_v15 }
 0x120   :  { %v7207_v42 = vpack.c.bf16 %v434_v29, %v432_v26  ;;  %v4890_v32 = vor.u32 %v6442_v19, %v4887_v22  ;;  %1252 = vmatpush.bf16.msrb.mxu2 %v4886_v20  ;;  %1301 = vmatpush.bf16.msrb.mxu3 %v5078_v21 }
 0x121   :  { %v7209_v45 = vpack.c.bf16 %v435_v36, %v433_v35  ;;  %v5082_v35 = vor.u32 %v6490_v23, %v5079_v24 }
 0x122   :  { %1083 = vmatmul.bf16.gmra.mxu2 %v7207_v42  ;;  %1181 = vmatmul.bf16.gmra.mxu0 %v7207_v42 }
 0x123   :  { %1132 = vmatmul.bf16.gmra.mxu3 %v7209_v45  ;;  %1230 = vmatmul.bf16.gmra.mxu1 %v7209_v45  ;;  %v353_v56 = vpop.f32.mrf.mxu0 }
 0x124   :  { %v402_v61 = vpop.f32.mrf.mxu1  ;;  %v354_v25 = vadd.f32 %v353_v56, %v7139_v27  ;;  %1350 = vmatpush.bf16.msra.mxu0 %v4890_v32  ;;  %1399 = vmatpush.bf16.msra.mxu1 %v5082_v35 }
 0x125   :  { %v403_v26 = vadd.f32 %v402_v61, %v7141_v28  ;;  %1253 = vmatpush.bf16.msrb.mxu2 %v4862_v46  ;;  %1302 = vmatpush.bf16.msrb.mxu3 %v5054_v51 }
 0x126   :  { %v436_v43 = vmax.f32 %v354_v25, 0.0 }
 0x127   :  { %v437_v49 = vmax.f32 %v403_v26, 0.0 }
 0x128   :  { %1351 = vmatpush.bf16.msra.mxu0 %v4866_v57  ;;  %1400 = vmatpush.bf16.msra.mxu1 %v5058_v60 }
 0x12b   :  { %v355_v29 = vpop.f32.mrf.mxu0 }
 0x12c   :  { %v356_v30 = vadd.f32 %v355_v29, %v7139_v27  ;;  %v404_v31 = vpop.f32.mrf.mxu1 }
 0x12d   :  { %v405_v36 = vadd.f32 %v404_v31, %v7141_v28 }
 0x12e   :  { %v438_v44 = vmax.f32 %v356_v30, 0.0 }
 0x12f   :  { %v439_v50 = vmax.f32 %v405_v36, 0.0 }
 0x130   :  { %v7219_v56 = vpack.c.bf16 %v438_v44, %v436_v43 }
 0x131   :  { %v7221_v59 = vpack.c.bf16 %v439_v50, %v437_v49 }
 0x132   :  { %1088 = vmatmul.bf16.gmra.mxu2 %v7219_v56  ;;  %1186 = vmatmul.bf16.gmra.mxu0 %v7219_v56 }
 0x133   :  { %1137 = vmatmul.bf16.gmra.mxu3 %v7221_v59  ;;  %1235 = vmatmul.bf16.gmra.mxu1 %v7221_v59  ;;  %v358_v61 = vpop.f32.mrf.mxu0 }
 0x134   :  { %v407_v62 = vpop.f32.mrf.mxu1  ;;  %v359_v63 = vadd.f32 %v358_v61, %v7139_v27 }
 0x135   :  { %v408_v0 = vadd.f32 %v407_v62, %v7141_v28 }
 0x136   :  { %v440_v7 = vmax.f32 %v359_v63, 0.0 }
 0x137   :  { %v441_v9 = vmax.f32 %v408_v0, 0.0 }
 0x13b   :  { %v360_v1 = vpop.f32.mrf.mxu0 }
 0x13c   :  { %v361_v2 = vadd.f32 %v360_v1, %v7139_v27  ;;  %v409_v5 = vpop.f32.mrf.mxu1  ;;  %v7239_v27 = vld [vmem:[#allocation10] sm:$0x3f] }
 0x13d   :  { %v410_v6 = vadd.f32 %v409_v5, %v7141_v28  ;;  %v7242_v28 = vperm.slane %v7239_v27, 1  ;;  %v7250_v19 = vperm.slane %v7239_v27, 0 }
 0x13e   :  { %v442_v8 = vmax.f32 %v361_v2, 0.0 }
 0x13f   :  { %v443_v10 = vmax.f32 %v410_v6, 0.0 }
 0x140   :  { %v7231_v11 = vpack.c.bf16 %v442_v8, %v440_v7 }
 0x141   :  { %v7233_v12 = vpack.c.bf16 %v443_v10, %v441_v9 }
 0x142   :  { %1093 = vmatmul.bf16.gmra.mxu2 %v7231_v11  ;;  %1191 = vmatmul.bf16.gmra.mxu0 %v7231_v11 }
 0x143   :  { %1142 = vmatmul.bf16.gmra.mxu3 %v7233_v12  ;;  %1240 = vmatmul.bf16.gmra.mxu1 %v7233_v12 }
 0x14f   :  { %v1157_v13 = vpop.f32.mrf.mxu0 }
 0x150   :  { %v1158_v14 = vadd.f32 %v1157_v13, %v7242_v28  ;;  %v1206_v15 = vpop.f32.mrf.mxu1 }
 0x152   :  { %v7245_v16 = vadd.f32 %v1206_v15, %v1158_v14  ;;  %1254 = vmatmul.bf16.vlgmr.msrb.gmra.mxu2 %v7147_v39  ;;  %1352 = vmatmul.bf16.vlgmr.msra.gmra.mxu0 %v7147_v39 }
 0x153   :  { %1303 = vmatmul.bf16.vlgmr.msrb.gmra.mxu3 %v7149_v40  ;;  %1401 = vmatmul.bf16.vlgmr.msra.gmra.mxu1 %v7149_v40 }
 0x155   :  { %v1059_v20 = vpop.f32.mrf.mxu2 }
 0x156   :  { %v1060_v21 = vadd.f32 %v1059_v20, %v7250_v19  ;;  %v1108_v22 = vpop.f32.mrf.mxu3 }
 0x157   :  { %v1159_v23 = vpop.f32.mrf.mxu0 }
 0x158   :  { %v7255_v24 = vadd.f32 %v1108_v22, %v1060_v21  ;;  %v1160_v25 = vadd.f32 %v1159_v23, %v7242_v28  ;;  %v1208_v26 = vpop.f32.mrf.mxu1 }
 0x15a   :  { %v7258_v29 = vadd.f32 %v1208_v26, %v1160_v25 }
 0x15c   :  { %8486 = vst [vmem:[#allocation20_spill] sm:$0xff] %v7258_v29 }
 0x15d   :  { %v1061_v30 = vpop.f32.mrf.mxu2 }
 0x15e   :  { %v1062_v31 = vadd.f32 %v1061_v30, %v7250_v19  ;;  %v1110_v32 = vpop.f32.mrf.mxu3 }
 0x15f   :  { %v1162_v35 = vpop.f32.mrf.mxu0 }
 0x160   :  { %v7261_v36 = vadd.f32 %v1110_v32, %v1062_v31  ;;  %v1163_v37 = vadd.f32 %v1162_v35, %v7242_v28  ;;  %v1211_v38 = vpop.f32.mrf.mxu1 }
 0x162   :  { %8487 = vst [vmem:[#allocation21_spill] sm:$0xff] %v7261_v36  ;;  %v7264_v41 = vadd.f32 %v1211_v38, %v1163_v37  ;;  %1259 = vmatmul.bf16.gmra.mxu2 %v7159_v53  ;;  %1357 = vmatmul.bf16.gmra.mxu0 %v7159_v53 }
 0x163   :  { %1308 = vmatmul.bf16.gmra.mxu3 %v7161_v54  ;;  %1406 = vmatmul.bf16.gmra.mxu1 %v7161_v54 }
 0x165   :  { %v1064_v43 = vpop.f32.mrf.mxu2 }
 0x166   :  { %v1065_v44 = vadd.f32 %v1064_v43, %v7250_v19  ;;  %v1113_v46 = vpop.f32.mrf.mxu3 }
 0x167   :  { %v1164_v47 = vpop.f32.mrf.mxu0 }
 0x168   :  { %v7271_v48 = vadd.f32 %v1113_v46, %v1065_v44  ;;  %v1165_v49 = vadd.f32 %v1164_v47, %v7242_v28  ;;  %v1213_v50 = vpop.f32.mrf.mxu1 }
 0x16a   :  { %v7274_v51 = vadd.f32 %v1213_v50, %v1165_v49 }
 0x16c   :  { %8488 = vst [vmem:[#allocation22_spill] sm:$0xff] %v7274_v51 }
 0x16d   :  { %v1066_v52 = vpop.f32.mrf.mxu2 }
 0x16e   :  { %v1067_v55 = vadd.f32 %v1066_v52, %v7250_v19  ;;  %v1115_v57 = vpop.f32.mrf.mxu3 }
 0x16f   :  { %v1167_v58 = vpop.f32.mrf.mxu0 }
 0x170   :  { %v7277_v60 = vadd.f32 %v1115_v57, %v1067_v55  ;;  %v1168_v61 = vadd.f32 %v1167_v58, %v7242_v28  ;;  %v1216_v62 = vpop.f32.mrf.mxu1  ;;  %v5037_v55 = vld [vmem:[#allocation9 + $0x160] sm:$0xf]  ;;  %v6482_v57 = vld [vmem:[#allocation9 + $0x174] sm:$0xf0] }
 0x171   :  { %v5229_v58 = vld [vmem:[#allocation9 + $0x2e0] sm:$0xf] }
 0x172   :  { %8489 = vst [vmem:[#allocation23_spill] sm:$0xff] %v7277_v60  ;;  %v7280_v63 = vadd.f32 %v1216_v62, %v1168_v61  ;;  %1264 = vmatmul.bf16.gmra.mxu2 %v7171_v3  ;;  %1362 = vmatmul.bf16.gmra.mxu0 %v7171_v3  ;;  %v5038_v62 = vor.u32 %v6482_v57, %v5037_v55 }
 0x173   :  { %1313 = vmatmul.bf16.gmra.mxu3 %v7173_v4  ;;  %1411 = vmatmul.bf16.gmra.mxu1 %v7173_v4 }
 0x174   :  { %1442 = vmatpush.bf16.msra.mxu2 %v5038_v62  ;;  %v4989_v62 = vld [vmem:[#allocation9 + $0x100] sm:$0xf] }
 0x175   :  { %v1069_v0 = vpop.f32.mrf.mxu2 }
 0x176   :  { %v1070_v1 = vadd.f32 %v1069_v0, %v7250_v19  ;;  %v1118_v2 = vpop.f32.mrf.mxu3  ;;  %v6530_v0 = vld [vmem:[#allocation9 + $0x2f4] sm:$0xf0] }
 0x177   :  { %v1169_v5 = vpop.f32.mrf.mxu0 }
 0x178   :  { %v7287_v6 = vadd.f32 %v1118_v2, %v1070_v1  ;;  %v1170_v7 = vadd.f32 %v1169_v5, %v7242_v28  ;;  %v1218_v8 = vpop.f32.mrf.mxu1  ;;  %v6479_v1 = vld [vmem:[#allocation9 + $0x164] sm:$0xf]  ;;  %v5230_v2 = vor.u32 %v6530_v0, %v5229_v58  ;;  %v5039_v5 = vld [vmem:[#allocation9 + $0x178] sm:$0xf0]  ;;  %v6470_v0 = vld [vmem:[#allocation9 + $0x114] sm:$0xf0] }
 0x17a   :  { %v7290_v9 = vadd.f32 %v1218_v8, %v1170_v7  ;;  %v6527_v7 = vld [vmem:[#allocation9 + $0x2e4] sm:$0xf]  ;;  %v5231_v8 = vld [vmem:[#allocation9 + $0x2f8] sm:$0xf0]  ;;  %1491 = vmatpush.bf16.msra.mxu3 %v5230_v2 }
 0x17c   :  { %8490 = vst [vmem:[#allocation24_spill] sm:$0xff] %v7290_v9 }
 0x17d   :  { %v1071_v10 = vpop.f32.mrf.mxu2 }
 0x17e   :  { %v1072_v13 = vadd.f32 %v1071_v10, %v7250_v19  ;;  %v1120_v14 = vpop.f32.mrf.mxu3  ;;  %v5042_v10 = vor.u32 %v6479_v1, %v5039_v5  ;;  %v5181_v1 = vld [vmem:[#allocation9 + $0x280] sm:$0xf]  ;;  %v4990_v5 = vor.u32 %v6470_v0, %v4989_v62 }
 0x17f   :  { %v1172_v15 = vpop.f32.mrf.mxu0 }
 0x180   :  { %v7293_v20 = vadd.f32 %v1120_v14, %v1072_v13  ;;  %v1173_v21 = vadd.f32 %v1172_v15, %v7242_v28  ;;  %v1221_v22 = vpop.f32.mrf.mxu1  ;;  %v5234_v13 = vor.u32 %v6527_v7, %v5231_v8  ;;  %v5013_v15 = vld [vmem:[#allocation9 + $0x130] sm:$0xf]  ;;  %1540 = vmatpush.bf16.msrb.mxu0 %v5042_v10  ;;  %v6518_v7 = vld [vmem:[#allocation9 + $0x294] sm:$0xf0]  ;;  %v6467_v8 = vld [vmem:[#allocation9 + $0x104] sm:$0xf] }
 0x181   :  { %v5182_v10 = vor.u32 %v6518_v7, %v5181_v1 }
 0x182   :  { %8491 = vst [vmem:[#allocation25_spill] sm:$0xff] %v7293_v20  ;;  %v7296_v23 = vadd.f32 %v1221_v22, %v1173_v21  ;;  %1269 = vmatmul.bf16.gmra.mxu2 %v7183_v17  ;;  %1367 = vmatmul.bf16.gmra.mxu0 %v7183_v17  ;;  %v6476_v21 = vld [vmem:[#allocation9 + $0x144] sm:$0xf0]  ;;  %v5205_v22 = vld [vmem:[#allocation9 + $0x2b0] sm:$0xf] }
 0x183   :  { %1318 = vmatmul.bf16.gmra.mxu3 %v7185_v18  ;;  %1416 = vmatmul.bf16.gmra.mxu1 %v7185_v18 }
 0x184   :  { %8492 = vst [vmem:[#allocation26_spill] sm:$0xff] %v7296_v23  ;;  %1589 = vmatpush.bf16.msrb.mxu1 %v5234_v13  ;;  %v4991_v13 = vld [vmem:[#allocation9 + $0x118] sm:$0xf0] }
 0x185   :  { %v1074_v25 = vpop.f32.mrf.mxu2 }
 0x186   :  { %v1075_v26 = vadd.f32 %v1074_v25, %v7250_v19  ;;  %v1123_v30 = vpop.f32.mrf.mxu3 }
 0x187   :  { %v1174_v31 = vpop.f32.mrf.mxu0 }
 0x188   :  { %v7303_v32 = vadd.f32 %v1123_v30, %v1075_v26  ;;  %v1175_v35 = vadd.f32 %v1174_v31, %v7242_v28  ;;  %v1223_v37 = vpop.f32.mrf.mxu1  ;;  %v5014_v30 = vor.u32 %v6476_v21, %v5013_v15  ;;  %v6524_v31 = vld [vmem:[#allocation9 + $0x2c4] sm:$0xf0]  ;;  %v5183_v15 = vld [vmem:[#allocation9 + $0x298] sm:$0xf0]  ;;  %v4994_v21 = vor.u32 %v6467_v8, %v4991_v13  ;;  %v4941_v8 = vld [vmem:[#allocation9 + $0xa0] sm:$0xf] }
 0x189   :  { %v5133_v13 = vld [vmem:[#allocation9 + $0x220] sm:$0xf] }
 0x18a   :  { %8493 = vst [vmem:[#allocation27_spill] sm:$0xff] %v7303_v32  ;;  %v7306_v38 = vadd.f32 %v1223_v37, %v1175_v35  ;;  %v6473_v35 = vld [vmem:[#allocation9 + $0x134] sm:$0xf]  ;;  %v5015_v37 = vld [vmem:[#allocation9 + $0x148] sm:$0xf0]  ;;  %1443 = vmatpush.bf16.msra.mxu2 %v5014_v30 }
 0x18b   :  { %v6464_v30 = vld [vmem:[#allocation9 + $0xe4] sm:$0xf0] }
 0x18c   :  { %8494 = vst [vmem:[#allocation28_spill] sm:$0xff] %v7306_v38 }
 0x18d   :  { %v1076_v43 = vpop.f32.mrf.mxu2 }
 0x18e   :  { %v1077_v44 = vadd.f32 %v1076_v43, %v7250_v19  ;;  %v1125_v46 = vpop.f32.mrf.mxu3  ;;  %1444 = vmatpush.bf16.msra.mxu2 %v4990_v5 }
 0x18f   :  { %v1177_v47 = vpop.f32.mrf.mxu0 }
 0x190   :  { %v7309_v49 = vadd.f32 %v1125_v46, %v1077_v44  ;;  %v1178_v50 = vadd.f32 %v1177_v47, %v7242_v28  ;;  %v1226_v52 = vpop.f32.mrf.mxu1  ;;  %v5206_v44 = vor.u32 %v6524_v31, %v5205_v22  ;;  %v5018_v46 = vor.u32 %v6473_v35, %v5015_v37  ;;  %v6521_v47 = vld [vmem:[#allocation9 + $0x2b4] sm:$0xf]  ;;  %v5157_v31 = vld [vmem:[#allocation9 + $0x250] sm:$0xf] }
 0x192   :  { %8495 = vst [vmem:[#allocation29_spill] sm:$0xff] %v7309_v49  ;;  %v7312_v61 = vadd.f32 %v1226_v52, %v1178_v50  ;;  %1274 = vmatmul.bf16.gmra.mxu2 %v7195_v33  ;;  %1372 = vmatmul.bf16.gmra.mxu0 %v7195_v33  ;;  %v5207_v50 = vld [vmem:[#allocation9 + $0x2c8] sm:$0xf0] }
 0x193   :  { %1323 = vmatmul.bf16.gmra.mxu3 %v7197_v34  ;;  %1421 = vmatmul.bf16.gmra.mxu1 %v7197_v34  ;;  %v5210_v58 = vor.u32 %v6521_v47, %v5207_v50  ;;  %v4967_v47 = vld [vmem:[#allocation9 + $0xe8] sm:$0xf0] }
 0x194   :  { %8496 = vst [vmem:[#allocation30_spill] sm:$0xff] %v7312_v61  ;;  %1492 = vmatpush.bf16.msra.mxu3 %v5206_v44  ;;  %1541 = vmatpush.bf16.msrb.mxu0 %v5018_v46  ;;  %v6512_v44 = vld [vmem:[#allocation9 + $0x264] sm:$0xf0]  ;;  %v6461_v46 = vld [vmem:[#allocation9 + $0xd4] sm:$0xf] }
 0x195   :  { %v1079_v14 = vpop.f32.mrf.mxu2  ;;  %1590 = vmatpush.bf16.msrb.mxu1 %v5210_v58  ;;  %v5159_v58 = vld [vmem:[#allocation9 + $0x268] sm:$0xf0]  ;;  %v4970_v5 = vor.u32 %v6461_v46, %v4967_v47  ;;  %v6452_v46 = vld [vmem:[#allocation9 + $0x84] sm:$0xf0]  ;;  %v5109_v47 = vld [vmem:[#allocation9 + $0x1f0] sm:$0xf] }
 0x196   :  { %v1080_v25 = vadd.f32 %v1079_v14, %v7250_v19  ;;  %v1128_v26 = vpop.f32.mrf.mxu3  ;;  %v6515_v14 = vld [vmem:[#allocation9 + $0x284] sm:$0xf]  ;;  %v1735_v61 = vld [vmem:[#allocation4 + $0x8] sm:$0xff] }
 0x197   :  { %v1179_v43 = vpop.f32.mrf.mxu0  ;;  %v5186_v22 = vor.u32 %v6515_v14, %v5183_v15 }
 0x198   :  { %v7319_v52 = vadd.f32 %v1128_v26, %v1080_v25  ;;  %v1180_v55 = vadd.f32 %v1179_v43, %v7242_v28  ;;  %v1228_v57 = vpop.f32.mrf.mxu1  ;;  %1493 = vmatpush.bf16.msra.mxu3 %v5182_v10  ;;  %v4965_v26 = vld [vmem:[#allocation9 + $0xd0] sm:$0xf]  ;;  %1542 = vmatpush.bf16.msrb.mxu0 %v4994_v21  ;;  %v6458_v10 = vld [vmem:[#allocation9 + $0xb4] sm:$0xf0] }
 0x199   :  { %1591 = vmatpush.bf16.msrb.mxu1 %v5186_v22  ;;  %v4966_v43 = vor.u32 %v6464_v30, %v4965_v26  ;;  %v4942_v15 = vor.u32 %v6458_v10, %v4941_v8  ;;  %v6506_v21 = vld [vmem:[#allocation9 + $0x234] sm:$0xf0]  ;;  %v6455_v22 = vld [vmem:[#allocation9 + $0xa4] sm:$0xf]  ;;  %v4943_v26 = vld [vmem:[#allocation9 + $0xb8] sm:$0xf0] }
 0x19a   :  { %8497 = vst [vmem:[#allocation31_spill] sm:$0xff] %v7319_v52  ;;  %v7322_v2 = vadd.f32 %v1228_v57, %v1180_v55  ;;  %v5158_v55 = vor.u32 %v6512_v44, %v5157_v31  ;;  %v6509_v57 = vld [vmem:[#allocation9 + $0x254] sm:$0xf]  ;;  %v6503_v30 = vld [vmem:[#allocation9 + $0x224] sm:$0xf]  ;;  %v4004_v52 = vunpack.c.l.bf16 %v1735_v61 }
 0x19b   :  { %1445 = vmatpush.bf16.msra.mxu2 %v4966_v43  ;;  %v5162_v7 = vor.u32 %v6509_v57, %v5159_v58  ;;  %v5135_v31 = vld [vmem:[#allocation9 + $0x238] sm:$0xf0]  ;;  %v4917_v44 = vld [vmem:[#allocation9 + $0x70] sm:$0xf]  ;;  %v6500_v58 = vld [vmem:[#allocation9 + $0x204] sm:$0xf0] }
 0x19c   :  { %8498 = vst [vmem:[#allocation32_spill] sm:$0xff] %v7322_v2  ;;  %1494 = vmatpush.bf16.msra.mxu3 %v5158_v55  ;;  %1543 = vmatpush.bf16.msrb.mxu0 %v4970_v5  ;;  %v4918_v57 = vor.u32 %v6452_v46, %v4917_v44  ;;  %v5110_v10 = vor.u32 %v6500_v58, %v5109_v47  ;;  %v6497_v5 = vld [vmem:[#allocation9 + $0x1f4] sm:$0xf]  ;;  %v6494_v46 = vld [vmem:[#allocation9 + $0x1d4] sm:$0xf0] }
 0x19d   :  { %v1081_v25 = vpop.f32.mrf.mxu2  ;;  %1592 = vmatpush.bf16.msrb.mxu1 %v5162_v7  ;;  %v5111_v7 = vld [vmem:[#allocation9 + $0x208] sm:$0xf0]  ;;  %v6443_v47 = vld [vmem:[#allocation9 + $0x44] sm:$0xf] }
 0x19e   :  { %v1082_v35 = vadd.f32 %v1081_v25, %v7250_v19  ;;  %v1130_v37 = vpop.f32.mrf.mxu3  ;;  %v5134_v25 = vor.u32 %v6506_v21, %v5133_v13 }
 0x19f   :  { %v1182_v50 = vpop.f32.mrf.mxu0  ;;  %1446 = vmatpush.bf16.msra.mxu2 %v4942_v15 }
 0x1a0   :  { %v7325_v62 = vadd.f32 %v1130_v37, %v1082_v35  ;;  %v1183_v0 = vadd.f32 %v1182_v50, %v7242_v28  ;;  %v1231_v1 = vpop.f32.mrf.mxu1  ;;  %v4946_v35 = vor.u32 %v6455_v22, %v4943_v26  ;;  %v5138_v37 = vor.u32 %v6503_v30, %v5135_v31  ;;  %1495 = vmatpush.bf16.msra.mxu3 %v5134_v25  ;;  %v4893_v26 = vld [vmem:[#allocation9 + $0x40] sm:$0xf]  ;;  %v6446_v30 = vld [vmem:[#allocation9 + $0x54] sm:$0xf0] }
 0x1a1   :  { %v5114_v25 = vor.u32 %v6497_v5, %v5111_v7  ;;  %v5085_v31 = vld [vmem:[#allocation9 + $0x1c0] sm:$0xf]  ;;  %v4894_v44 = vor.u32 %v6446_v30, %v4893_v26  ;;  %v6437_v26 = vld [vmem:[#allocation9 + $0x14] sm:$0xf]  ;;  %v4871_v30 = vld [vmem:[#allocation9 + $0x28] sm:$0xf0] }
 0x1a2   :  { %8499 = vst [vmem:[#allocation33_spill] sm:$0xff] %v7325_v62  ;;  %v7328_v14 = vadd.f32 %v1231_v1, %v1183_v0  ;;  %1279 = vmatmul.bf16.gmra.mxu2 %v7207_v42  ;;  %1377 = vmatmul.bf16.gmra.mxu0 %v7207_v42  ;;  %v6449_v0 = vld [vmem:[#allocation9 + $0x74] sm:$0xf]  ;;  %v4919_v1 = vld [vmem:[#allocation9 + $0x88] sm:$0xf0]  ;;  %v5086_v58 = vor.u32 %v6494_v46, %v5085_v31 }
 0x1a3   :  { %1328 = vmatmul.bf16.gmra.mxu3 %v7209_v45  ;;  %1426 = vmatmul.bf16.gmra.mxu1 %v7209_v45  ;;  %v4922_v13 = vor.u32 %v6449_v0, %v4919_v1  ;;  %v4895_v0 = vld [vmem:[#allocation9 + $0x58] sm:$0xf0]  ;;  %v1734_v62 = vld [vmem:[#allocation4] sm:$0xff] }
 0x1a4   :  { %8500 = vst [vmem:[#allocation34_spill] sm:$0xff] %v7328_v14  ;;  %1544 = vmatpush.bf16.msrb.mxu0 %v4946_v35  ;;  %1593 = vmatpush.bf16.msrb.mxu1 %v5138_v37  ;;  %v4898_v1 = vor.u32 %v6443_v47, %v4895_v0 }
 0x1a5   :  { %v1084_v43 = vpop.f32.mrf.mxu2  ;;  %1447 = vmatpush.bf16.msra.mxu2 %v4918_v57  ;;  %1496 = vmatpush.bf16.msra.mxu3 %v5110_v10  ;;  %v4869_v57 = vld [vmem:[#allocation9 + $0x10] sm:$0xf] }
 0x1a6   :  { %v1085_v50 = vadd.f32 %v1084_v43, %v7250_v19  ;;  %v1133_v55 = vpop.f32.mrf.mxu3  ;;  %v5061_v10 = vld [vmem:[#allocation9 + $0x190] sm:$0xf] }
 0x1a7   :  { %v1184_v8 = vpop.f32.mrf.mxu0 }
 0x1a8   :  { %v7335_v21 = vadd.f32 %v1133_v55, %v1085_v50  ;;  %v1185_v15 = vadd.f32 %v1184_v8, %v7242_v28  ;;  %v1233_v22 = vpop.f32.mrf.mxu1  ;;  %v6491_v50 = vld [vmem:[#allocation9 + $0x1c4] sm:$0xf]  ;;  %v5087_v55 = vld [vmem:[#allocation9 + $0x1d8] sm:$0xf0]  ;;  %1545 = vmatpush.bf16.msrb.mxu0 %v4922_v13  ;;  %1594 = vmatpush.bf16.msrb.mxu1 %v5114_v25  ;;  %v6440_v8 = vld [vmem:[#allocation9 + $0x24] sm:$0xf0] }
 0x1a9   :  { %v5090_v35 = vor.u32 %v6491_v50, %v5087_v55  ;;  %1448 = vmatpush.bf16.msra.mxu2 %v4894_v44  ;;  %1497 = vmatpush.bf16.msra.mxu3 %v5086_v58  ;;  %v6485_v13 = vld [vmem:[#allocation9 + $0x194] sm:$0xf]  ;;  %v5063_v25 = vld [vmem:[#allocation9 + $0x1a8] sm:$0xf0] }
 0x1aa   :  { %8501 = vst [vmem:[#allocation35_spill] sm:$0xff] %v7335_v21  ;;  %v7338_v43 = vadd.f32 %v1233_v22, %v1185_v15  ;;  %v4870_v15 = vor.u32 %v6440_v8, %v4869_v57  ;;  %v6488_v22 = vld [vmem:[#allocation9 + $0x1a4] sm:$0xf0]  ;;  %v5066_v0 = vor.u32 %v6485_v13, %v5063_v25 }
 0x1ab   :  { %v5062_v46 = vor.u32 %v6488_v22, %v5061_v10 }
 0x1ac   :  { %8502 = vst [vmem:[#allocation36_spill] sm:$0xff] %v7338_v43  ;;  %v4874_v43 = vor.u32 %v6437_v26, %v4871_v30  ;;  %1546 = vmatpush.bf16.msrb.mxu0 %v4898_v1  ;;  %1595 = vmatpush.bf16.msrb.mxu1 %v5090_v35 }
 0x1ad   :  { %v1086_v37 = vpop.f32.mrf.mxu2  ;;  %1449 = vmatpush.bf16.msra.mxu2 %v4870_v15  ;;  %1498 = vmatpush.bf16.msra.mxu3 %v5062_v46 }
 0x1ae   :  { %v1087_v5 = vadd.f32 %v1086_v37, %v7250_v19  ;;  %v1135_v7 = vpop.f32.mrf.mxu3 }
 0x1af   :  { %v1187_v31 = vpop.f32.mrf.mxu0 }
 0x1b0   :  { %v7341_v47 = vadd.f32 %v1135_v7, %v1087_v5  ;;  %v1188_v44 = vadd.f32 %v1187_v31, %v7242_v28  ;;  %v1236_v58 = vpop.f32.mrf.mxu1  ;;  %1547 = vmatpush.bf16.msrb.mxu0 %v4874_v43  ;;  %1596 = vmatpush.bf16.msrb.mxu1 %v5066_v0 }
 0x1b2   :  { %8503 = vst [vmem:[#allocation37_spill] sm:$0xff] %v7341_v47  ;;  %v7344_v50 = vadd.f32 %v1236_v58, %v1188_v44  ;;  %1284 = vmatmul.bf16.gmra.mxu2 %v7219_v56  ;;  %1382 = vmatmul.bf16.gmra.mxu0 %v7219_v56 }
 0x1b3   :  { %1333 = vmatmul.bf16.gmra.mxu3 %v7221_v59  ;;  %1431 = vmatmul.bf16.gmra.mxu1 %v7221_v59 }
 0x1b4   :  { %8504 = vst [vmem:[#allocation38_spill] sm:$0xff] %v7344_v50 }
 0x1b5   :  { %v1089_v55 = vpop.f32.mrf.mxu2 }
 0x1b6   :  { %v1090_v37 = vadd.f32 %v1089_v55, %v7250_v19  ;;  %v1138_v1 = vpop.f32.mrf.mxu3 }
 0x1b7   :  { %v1189_v35 = vpop.f32.mrf.mxu0 }
 0x1b8   :  { %v7351_v57 = vadd.f32 %v1138_v1, %v1090_v37  ;;  %v1190_v8 = vadd.f32 %v1189_v35, %v7242_v28  ;;  %v1238_v10 = vpop.f32.mrf.mxu1  ;;  %v7373_v35 = vperm.slane %v7239_v27, 3 }
 0x1ba   :  { %8505 = vst [vmem:[#allocation39_spill] sm:$0xff] %v7351_v57  ;;  %v7354_v5 = vadd.f32 %v1238_v10, %v1190_v8  ;;  %v5615_v57 = vld [vmem:[#allocation12 + $0x2c8] sm:$0xf0] }
 0x1bb   :  { %8511 = vst [vmem:[#allocation45_spill] sm:$0xff] %v7373_v35 }
 0x1bc   :  { %8506 = vst [vmem:[#allocation40_spill] sm:$0xff] %v7354_v5  ;;  %v6813_v5 = vld [vmem:[#allocation12 + $0x8a4] sm:$0xf] }
 0x1bd   :  { %v1091_v7 = vpop.f32.mrf.mxu2 }
 0x1be   :  { %v1092_v15 = vadd.f32 %v1091_v7, %v7250_v19  ;;  %v1140_v22 = vpop.f32.mrf.mxu3 }
 0x1bf   :  { %v1192_v26 = vpop.f32.mrf.mxu0 }
 0x1c0   :  { %v7357_v30 = vadd.f32 %v1140_v22, %v1092_v15  ;;  %v1193_v43 = vadd.f32 %v1192_v26, %v7242_v28  ;;  %v1241_v31 = vpop.f32.mrf.mxu1 }
 0x1c2   :  { %8507 = vst [vmem:[#allocation41_spill] sm:$0xff] %v7357_v30  ;;  %v7360_v46 = vadd.f32 %v1241_v31, %v1193_v43  ;;  %1289 = vmatmul.bf16.gmra.mxu2 %v7231_v11  ;;  %1387 = vmatmul.bf16.gmra.mxu0 %v7231_v11  ;;  %v6765_v30 = vld [vmem:[#allocation12 + $0x724] sm:$0xf] }
 0x1c3   :  { %1338 = vmatmul.bf16.gmra.mxu3 %v7233_v12  ;;  %1436 = vmatmul.bf16.gmra.mxu1 %v7233_v12 }
 0x1c4   :  { %8508 = vst [vmem:[#allocation42_spill] sm:$0xff] %v7360_v46  ;;  %v5527_v46 = vld [vmem:[#allocation12 + $0x228] sm:$0xf0] }
 0x1c5   :  { %v1094_v13 = vpop.f32.mrf.mxu2 }
 0x1c6   :  { %v1095_v25 = vadd.f32 %v1094_v13, %v7250_v19  ;;  %v1143_v44 = vpop.f32.mrf.mxu3 }
 0x1c7   :  { %v1194_v58 = vpop.f32.mrf.mxu0 }
 0x1c8   :  { %v7367_v0 = vadd.f32 %v1143_v44, %v1095_v25  ;;  %v1195_v55 = vadd.f32 %v1194_v58, %v7242_v28  ;;  %v1243_v37 = vpop.f32.mrf.mxu1  ;;  %v7384_v28 = vperm.slane %v7239_v27, 2 }
 0x1ca   :  { %8509 = vst [vmem:[#allocation43_spill] sm:$0xff] %v7367_v0  ;;  %v7370_v1 = vadd.f32 %v1243_v37, %v1195_v55  ;;  %v6603_v0 = vld [vmem:[#allocation12 + $0x214] sm:$0xf] }
 0x1cb   :  { %8514 = vst [vmem:[#allocation48_spill] sm:$0xff] %v7384_v28 }
 0x1cc   :  { %8510 = vst [vmem:[#allocation44_spill] sm:$0xff] %v7370_v1 }
 0x1cd   :  { %v1096_v8 = vpop.f32.mrf.mxu2 }
 0x1ce   :  { %v1097_v10 = vadd.f32 %v1096_v8, %v7250_v19  ;;  %v1145_v7 = vpop.f32.mrf.mxu3 }
 0x1cf   :  { %v1353_v15 = vpop.f32.mrf.mxu0 }
 0x1d0   :  { %v7376_v22 = vadd.f32 %v1145_v7, %v1097_v10  ;;  %v1354_v26 = vadd.f32 %v1353_v15, %v7373_v35  ;;  %v1402_v43 = vpop.f32.mrf.mxu1 }
 0x1d2   :  { %8512 = vst [vmem:[#allocation46_spill] sm:$0xff] %v7376_v22  ;;  %v7379_v31 = vadd.f32 %v1402_v43, %v1354_v26  ;;  %1450 = vmatmul.bf16.vlgmr.msra.gmra.mxu2 %v7147_v39  ;;  %1548 = vmatmul.bf16.vlgmr.msrb.gmra.mxu0 %v7147_v39 }
 0x1d3   :  { %1499 = vmatmul.bf16.vlgmr.msra.gmra.mxu3 %v7149_v40  ;;  %1597 = vmatmul.bf16.vlgmr.msrb.gmra.mxu1 %v7149_v40 }
 0x1d4   :  { %8513 = vst [vmem:[#allocation47_spill] sm:$0xff] %v7379_v31 }
 0x1d5   :  { %v1255_v19 = vpop.f32.mrf.mxu2 }
 0x1d6   :  { %v1256_v13 = vadd.f32 %v1255_v19, %v7384_v28  ;;  %v1304_v25 = vpop.f32.mrf.mxu3 }
 0x1d7   :  { %v1355_v44 = vpop.f32.mrf.mxu0 }
 0x1d8   :  { %v7389_v58 = vadd.f32 %v1304_v25, %v1256_v13  ;;  %v1356_v55 = vadd.f32 %v1355_v44, %v7373_v35  ;;  %v1404_v37 = vpop.f32.mrf.mxu1 }
 0x1da   :  { %8515 = vst [vmem:[#allocation49_spill] sm:$0xff] %v7389_v58  ;;  %v7392_v8 = vadd.f32 %v1404_v37, %v1356_v55  ;;  %v5911_v58 = vld [vmem:[#allocation12 + $0x528] sm:$0xf0] }
 0x1db   :  { %v8613_v2 = vld [vmem:[#allocation47_spill] sm:$0xff] }
 0x1dc   :  { %8516 = vst [vmem:[#allocation50_spill] sm:$0xff] %v7392_v8 }
 0x1dd   :  { %v1257_v39 = vpop.f32.mrf.mxu2 }
 0x1de   :  { %v1258_v27 = vadd.f32 %v1257_v39, %v7384_v28  ;;  %v1306_v10 = vpop.f32.mrf.mxu3 }
 0x1df   :  { %v1358_v7 = vpop.f32.mrf.mxu0 }
 0x1e0   :  { %v7395_v15 = vadd.f32 %v1306_v10, %v1258_v27  ;;  %v1359_v40 = vadd.f32 %v1358_v7, %v7373_v35  ;;  %v1407_v26 = vpop.f32.mrf.mxu1 }
 0x1e2   :  { %8517 = vst [vmem:[#allocation51_spill] sm:$0xff] %v7395_v15  ;;  %v7398_v43 = vadd.f32 %v1407_v26, %v1359_v40  ;;  %1455 = vmatmul.bf16.gmra.mxu2 %v7159_v53  ;;  %1553 = vmatmul.bf16.gmra.mxu0 %v7159_v53 }
 0x1e3   :  { %1504 = vmatmul.bf16.gmra.mxu3 %v7161_v54  ;;  %1602 = vmatmul.bf16.gmra.mxu1 %v7161_v54 }
 0x1e4   :  { %8518 = vst [vmem:[#allocation52_spill] sm:$0xff] %v7398_v43  ;;  %v6624_v43 = vld [vmem:[#allocation12 + $0x2b4] sm:$0xf0] }
 0x1e5   :  { %v1260_v19 = vpop.f32.mrf.mxu2 }
 0x1e6   :  { %v1261_v13 = vadd.f32 %v1260_v19, %v7384_v28  ;;  %v1309_v25 = vpop.f32.mrf.mxu3 }
 0x1e7   :  { %v1360_v44 = vpop.f32.mrf.mxu0 }
 0x1e8   :  { %v7405_v55 = vadd.f32 %v1309_v25, %v1261_v13  ;;  %v1361_v37 = vadd.f32 %v1360_v44, %v7373_v35  ;;  %v1409_v39 = vpop.f32.mrf.mxu1 }
 0x1ea   :  { %8519 = vst [vmem:[#allocation53_spill] sm:$0xff] %v7405_v55  ;;  %v7408_v27 = vadd.f32 %v1409_v39, %v1361_v37  ;;  %v5429_v37 = vld [vmem:[#allocation12 + $0x150] sm:$0xf]  ;;  %v6582_v39 = vld [vmem:[#allocation12 + $0x164] sm:$0xf0] }
 0x1eb   :  { %v5597_v55 = vld [vmem:[#allocation12 + $0x2a0] sm:$0xf] }
 0x1ec   :  { %8520 = vst [vmem:[#allocation54_spill] sm:$0xff] %v7408_v27  ;;  %v6576_v27 = vld [vmem:[#allocation12 + $0x134] sm:$0xf0]  ;;  %v5598_v15 = vor.u32 %v6624_v43, %v5597_v55 }
 0x1ed   :  { %v1262_v10 = vpop.f32.mrf.mxu2 }
 0x1ee   :  { %v1263_v7 = vadd.f32 %v1262_v10, %v7384_v28  ;;  %v1311_v53 = vpop.f32.mrf.mxu3  ;;  %v5621_v10 = vld [vmem:[#allocation12 + $0x2d0] sm:$0xf] }
 0x1ef   :  { %v1363_v40 = vpop.f32.mrf.mxu0 }
 0x1f0   :  { %v7411_v26 = vadd.f32 %v1311_v53, %v1263_v7  ;;  %v1364_v54 = vadd.f32 %v1363_v40, %v7373_v35  ;;  %v1412_v22 = vpop.f32.mrf.mxu1  ;;  %v5430_v53 = vor.u32 %v6582_v39, %v5429_v37  ;;  %v6630_v40 = vld [vmem:[#allocation12 + $0x2e4] sm:$0xf0] }
 0x1f1   :  { %v6570_v39 = vld [vmem:[#allocation12 + $0x104] sm:$0xf0] }
 0x1f2   :  { %8521 = vst [vmem:[#allocation55_spill] sm:$0xff] %v7411_v26  ;;  %v7414_v19 = vadd.f32 %v1412_v22, %v1364_v54  ;;  %1460 = vmatmul.bf16.gmra.mxu2 %v7171_v3  ;;  %1558 = vmatmul.bf16.gmra.mxu0 %v7171_v3  ;;  %v5622_v3 = vor.u32 %v6630_v40, %v5621_v10 }
 0x1f3   :  { %1509 = vmatmul.bf16.gmra.mxu3 %v7173_v4  ;;  %1607 = vmatmul.bf16.gmra.mxu1 %v7173_v4  ;;  %v5405_v4 = vld [vmem:[#allocation12 + $0x120] sm:$0xf] }
 0x1f4   :  { %8522 = vst [vmem:[#allocation56_spill] sm:$0xff] %v7414_v19  ;;  %3498 = vmatpush.bf16.msrb.mxu2 %v5430_v53  ;;  %3512 = vmatpush.bf16.msrb.mxu3 %v5622_v3 }
 0x1f5   :  { %v1265_v13 = vpop.f32.mrf.mxu2 }
 0x1f6   :  { %v1266_v25 = vadd.f32 %v1265_v13, %v7384_v28  ;;  %v1314_v44 = vpop.f32.mrf.mxu3  ;;  %v5406_v13 = vor.u32 %v6576_v27, %v5405_v4  ;;  %v5549_v4 = vld [vmem:[#allocation12 + $0x240] sm:$0xf] }
 0x1f7   :  { %v1365_v7 = vpop.f32.mrf.mxu0 }
 0x1f8   :  { %v7421_v22 = vadd.f32 %v1314_v44, %v1266_v25  ;;  %v1366_v54 = vadd.f32 %v1365_v7, %v7373_v35  ;;  %v1414_v19 = vpop.f32.mrf.mxu1  ;;  %3499 = vmatpush.bf16.msrb.mxu2 %v5406_v13  ;;  %3513 = vmatpush.bf16.msrb.mxu3 %v5598_v15  ;;  %v5381_v44 = vld [vmem:[#allocation12 + $0xf0] sm:$0xf]  ;;  %v6564_v15 = vld [vmem:[#allocation12 + $0xd4] sm:$0xf0] }
 0x1f9   :  { %v5573_v7 = vld [vmem:[#allocation12 + $0x270] sm:$0xf]  ;;  %v5382_v53 = vor.u32 %v6570_v39, %v5381_v44  ;;  %v6612_v13 = vld [vmem:[#allocation12 + $0x254] sm:$0xf0] }
 0x1fa   :  { %8523 = vst [vmem:[#allocation57_spill] sm:$0xff] %v7421_v22  ;;  %v7424_v26 = vadd.f32 %v1414_v19, %v1366_v54  ;;  %v6618_v19 = vld [vmem:[#allocation12 + $0x284] sm:$0xf0] }
 0x1fb   :  { %v5574_v3 = vor.u32 %v6618_v19, %v5573_v7  ;;  %v5333_v7 = vld [vmem:[#allocation12 + $0x90] sm:$0xf]  ;;  %v8623_v14 = vld [vmem:[#allocation56_spill] sm:$0xff] }
 0x1fc   :  { %8524 = vst [vmem:[#allocation58_spill] sm:$0xff] %v7424_v26  ;;  %3500 = vmatpush.bf16.msrb.mxu2 %v5382_v53  ;;  %v5525_v53 = vld [vmem:[#allocation12 + $0x210] sm:$0xf] }
 0x1fd   :  { %v1267_v8 = vpop.f32.mrf.mxu2  ;;  %3514 = vmatpush.bf16.msrb.mxu3 %v5574_v3 }
 0x1fe   :  { %v1268_v37 = vadd.f32 %v1267_v8, %v7384_v28  ;;  %v1316_v25 = vpop.f32.mrf.mxu3  ;;  %v5357_v8 = vld [vmem:[#allocation12 + $0xc0] sm:$0xf] }
 0x1ff   :  { %v1368_v10 = vpop.f32.mrf.mxu0  ;;  %v5358_v55 = vor.u32 %v6564_v15, %v5357_v8 }
 0x200   :  { %v7427_v40 = vadd.f32 %v1316_v25, %v1268_v37  ;;  %v1369_v54 = vadd.f32 %v1368_v10, %v7373_v35  ;;  %v1417_v27 = vpop.f32.mrf.mxu1  ;;  %v5550_v37 = vor.u32 %v6612_v13, %v5549_v4  ;;  %v6558_v10 = vld [vmem:[#allocation12 + $0xa4] sm:$0xf0]  ;;  %v6552_v4 = vld [vmem:[#allocation12 + $0x74] sm:$0xf0] }
 0x201   :  { %3501 = vmatpush.bf16.msrb.mxu2 %v5358_v55  ;;  %v5334_v19 = vor.u32 %v6558_v10, %v5333_v7  ;;  %v5309_v55 = vld [vmem:[#allocation12 + $0x60] sm:$0xf]  ;;  %v5285_v7 = vld [vmem:[#allocation12 + $0x30] sm:$0xf]  ;;  %v6546_v10 = vld [vmem:[#allocation12 + $0x44] sm:$0xf0] }
 0x202   :  { %8525 = vst [vmem:[#allocation59_spill] sm:$0xff] %v7427_v40  ;;  %v7430_v43 = vadd.f32 %v1417_v27, %v1369_v54  ;;  %1465 = vmatmul.bf16.gmra.mxu2 %v7183_v17  ;;  %1563 = vmatmul.bf16.gmra.mxu0 %v7183_v17  ;;  %v6606_v54 = vld [vmem:[#allocation12 + $0x224] sm:$0xf0]  ;;  %v5310_v13 = vor.u32 %v6552_v4, %v5309_v55 }
 0x203   :  { %1514 = vmatmul.bf16.gmra.mxu3 %v7185_v18  ;;  %1612 = vmatmul.bf16.gmra.mxu1 %v7185_v18  ;;  %v5526_v15 = vor.u32 %v6606_v54, %v5525_v53  ;;  %v5286_v53 = vor.u32 %v6546_v10, %v5285_v7  ;;  %v6005_v7 = vld [vmem:[#allocation12 + $0x5d0] sm:$0xf] }
 0x204   :  { %8526 = vst [vmem:[#allocation60_spill] sm:$0xff] %v7430_v43  ;;  %3515 = vmatpush.bf16.msrb.mxu3 %v5550_v37  ;;  %v6600_v43 = vld [vmem:[#allocation12 + $0x1f4] sm:$0xf0] }
 0x205   :  { %v1270_v25 = vpop.f32.mrf.mxu2  ;;  %3502 = vmatpush.bf16.msrb.mxu2 %v5334_v19  ;;  %v6594_v19 = vld [vmem:[#allocation12 + $0x1c4] sm:$0xf0] }
 0x206   :  { %v1271_v44 = vadd.f32 %v1270_v25, %v7384_v28  ;;  %v1319_v39 = vpop.f32.mrf.mxu3  ;;  %v5501_v25 = vld [vmem:[#allocation12 + $0x1e0] sm:$0xf] }
 0x207   :  { %v1370_v17 = vpop.f32.mrf.mxu0  ;;  %v5502_v40 = vor.u32 %v6600_v43, %v5501_v25  ;;  %v6588_v25 = vld [vmem:[#allocation12 + $0x194] sm:$0xf0] }
 0x208   :  { %v7437_v27 = vadd.f32 %v1319_v39, %v1271_v44  ;;  %v1371_v18 = vadd.f32 %v1370_v17, %v7373_v35  ;;  %v1419_v8 = vpop.f32.mrf.mxu1  ;;  %3516 = vmatpush.bf16.msrb.mxu3 %v5526_v15  ;;  %v5477_v17 = vld [vmem:[#allocation12 + $0x1b0] sm:$0xf]  ;;  %v6540_v15 = vld [vmem:[#allocation12 + $0x14] sm:$0xf0] }
 0x209   :  { %3503 = vmatpush.bf16.msrb.mxu2 %v5310_v13  ;;  %v5478_v55 = vor.u32 %v6594_v19, %v5477_v17  ;;  %v5453_v13 = vld [vmem:[#allocation12 + $0x180] sm:$0xf] }
 0x20a   :  { %8527 = vst [vmem:[#allocation61_spill] sm:$0xff] %v7437_v27  ;;  %v7440_v3 = vadd.f32 %v1419_v8, %v1371_v18 }
 0x20c   :  { %8528 = vst [vmem:[#allocation62_spill] sm:$0xff] %v7440_v3  ;;  %3517 = vmatpush.bf16.msrb.mxu3 %v5502_v40  ;;  %v5454_v40 = vor.u32 %v6588_v25, %v5453_v13  ;;  %v6720_v25 = vld [vmem:[#allocation12 + $0x5b4] sm:$0xf0]  ;;  %v5245_v3 = vld [vmem:[#allocation4 + $0x8] sm:$0xf] }
 0x20d   :  { %v1272_v26 = vpop.f32.mrf.mxu2  ;;  %3504 = vmatpush.bf16.msrb.mxu2 %v5286_v53 }
 0x20e   :  { %v1273_v44 = vadd.f32 %v1272_v26, %v7384_v28  ;;  %v1321_v39 = vpop.f32.mrf.mxu3  ;;  %v5261_v26 = vld [vmem:[#allocation12] sm:$0xf] }
 0x20f   :  { %v1373_v37 = vpop.f32.mrf.mxu0  ;;  %v5262_v4 = vor.u32 %v6540_v15, %v5261_v26  ;;  %v5981_v26 = vld [vmem:[#allocation12 + $0x5a0] sm:$0xf] }
 0x210   :  { %v7443_v54 = vadd.f32 %v1321_v39, %v1273_v44  ;;  %v1374_v18 = vadd.f32 %v1373_v37, %v7373_v35  ;;  %v1422_v8 = vpop.f32.mrf.mxu1  ;;  %v5813_v44 = vld [vmem:[#allocation12 + $0x450] sm:$0xf]  ;;  %3518 = vmatpush.bf16.msrb.mxu3 %v5478_v55  ;;  %v6678_v39 = vld [vmem:[#allocation12 + $0x464] sm:$0xf0] }
 0x211   :  { %3505 = vmatpush.bf16.msrb.mxu2 %v5262_v4  ;;  %v5814_v17 = vor.u32 %v6678_v39, %v5813_v44  ;;  %v6726_v37 = vld [vmem:[#allocation12 + $0x5e4] sm:$0xf0]  ;;  %v5982_v4 = vor.u32 %v6720_v25, %v5981_v26  ;;  %v5765_v44 = vld [vmem:[#allocation12 + $0x3f0] sm:$0xf]  ;;  %v6708_v25 = vld [vmem:[#allocation12 + $0x554] sm:$0xf0] }
 0x212   :  { %8529 = vst [vmem:[#allocation63_spill] sm:$0xff] %v7443_v54  ;;  %v7446_v43 = vadd.f32 %v1422_v8, %v1374_v18  ;;  %1470 = vmatmul.bf16.gmra.mxu2 %v7195_v33  ;;  %1568 = vmatmul.bf16.gmra.mxu0 %v7195_v33  ;;  %v6006_v19 = vor.u32 %v6726_v37, %v6005_v7  ;;  %v6672_v8 = vld [vmem:[#allocation12 + $0x434] sm:$0xf0]  ;;  %v6666_v39 = vld [vmem:[#allocation12 + $0x404] sm:$0xf0] }
 0x213   :  { %1519 = vmatmul.bf16.gmra.mxu3 %v7197_v34  ;;  %1617 = vmatmul.bf16.gmra.mxu1 %v7197_v34  ;;  %v5789_v34 = vld [vmem:[#allocation12 + $0x420] sm:$0xf]  ;;  %v5766_v7 = vor.u32 %v6666_v39, %v5765_v44  ;;  %v6714_v37 = vld [vmem:[#allocation12 + $0x584] sm:$0xf0] }
 0x214   :  { %8530 = vst [vmem:[#allocation64_spill] sm:$0xff] %v7446_v43  ;;  %3519 = vmatpush.bf16.msrb.mxu3 %v5454_v40  ;;  %v5790_v13 = vor.u32 %v6672_v8, %v5789_v34  ;;  %v6660_v40 = vld [vmem:[#allocation12 + $0x3d4] sm:$0xf0]  ;;  %v5933_v34 = vld [vmem:[#allocation12 + $0x540] sm:$0xf] }
 0x215   :  { %v1275_v10 = vpop.f32.mrf.mxu2  ;;  %3526 = vmatpush.bf16.msra.mxu2 %v5814_v17  ;;  %v5934_v44 = vor.u32 %v6708_v25, %v5933_v34  ;;  %v5885_v34 = vld [vmem:[#allocation12 + $0x4e0] sm:$0xf] }
 0x216   :  { %v1276_v33 = vadd.f32 %v1275_v10, %v7384_v28  ;;  %v1324_v53 = vpop.f32.mrf.mxu3  ;;  %v5957_v10 = vld [vmem:[#allocation12 + $0x570] sm:$0xf] }
 0x217   :  { %v7453_v18 = vpop.f32.mrf.mxu0  ;;  %v5958_v17 = vor.u32 %v6714_v37, %v5957_v10 }
 0x218   :  { %8531 = vst [vmem:[#allocation65_spill] sm:$0xff] %v7453_v18  ;;  %v7455_v15 = vadd.f32 %v1324_v53, %v1276_v33  ;;  %v7457_v55 = vpop.f32.mrf.mxu1  ;;  %3540 = vmatpush.bf16.msra.mxu3 %v6006_v19  ;;  %v6780_v18 = vld [vmem:[#allocation12 + $0x794] sm:$0xf0] }
 0x219   :  { %8533 = vst [vmem:[#allocation67_spill] sm:$0xff] %v7457_v55  ;;  %3527 = vmatpush.bf16.msra.mxu2 %v5790_v13 }
 0x21a   :  { %8532 = vst [vmem:[#allocation66_spill] sm:$0xff] %v7455_v15  ;;  %v5741_v15 = vld [vmem:[#allocation12 + $0x3c0] sm:$0xf] }
 0x21b   :  { %v5742_v13 = vor.u32 %v6660_v40, %v5741_v15  ;;  %v5693_v40 = vld [vmem:[#allocation12 + $0x360] sm:$0xf] }
 0x21c   :  { %3541 = vmatpush.bf16.msra.mxu3 %v5982_v4  ;;  %v5909_v4 = vld [vmem:[#allocation12 + $0x510] sm:$0xf] }
 0x21d   :  { %v1277_v43 = vpop.f32.mrf.mxu2  ;;  %3528 = vmatpush.bf16.msra.mxu2 %v5766_v7  ;;  %v6702_v7 = vld [vmem:[#allocation12 + $0x524] sm:$0xf0] }
 0x21e   :  { %v1278_v54 = vadd.f32 %v1277_v43, %v7384_v28  ;;  %v1326_v33 = vpop.f32.mrf.mxu3  ;;  %v5717_v43 = vld [vmem:[#allocation12 + $0x390] sm:$0xf]  ;;  %v5910_v37 = vor.u32 %v6702_v7, %v5909_v4  ;;  %v6690_v7 = vld [vmem:[#allocation12 + $0x4c4] sm:$0xf0] }
 0x21f   :  { %v1378_v53 = vpop.f32.mrf.mxu0 }
 0x220   :  { %v7460_v8 = vadd.f32 %v1326_v33, %v1278_v54  ;;  %v1379_v19 = vadd.f32 %v1378_v53, %v7373_v35  ;;  %v1427_v26 = vpop.f32.mrf.mxu1  ;;  %3542 = vmatpush.bf16.msra.mxu3 %v5958_v17  ;;  %v6654_v54 = vld [vmem:[#allocation12 + $0x3a4] sm:$0xf0]  ;;  %v8629_v38 = vld [vmem:[#allocation67_spill] sm:$0xff] }
 0x221   :  { %3529 = vmatpush.bf16.msra.mxu2 %v5742_v13  ;;  %v5718_v10 = vor.u32 %v6654_v54, %v5717_v43  ;;  %v6696_v13 = vld [vmem:[#allocation12 + $0x4f4] sm:$0xf0]  ;;  %v5669_v43 = vld [vmem:[#allocation12 + $0x330] sm:$0xf] }
 0x222   :  { %8534 = vst [vmem:[#allocation68_spill] sm:$0xff] %v7460_v8  ;;  %v7463_v39 = vadd.f32 %v1427_v26, %v1379_v19  ;;  %1475 = vmatmul.bf16.gmra.mxu2 %v7207_v42  ;;  %1573 = vmatmul.bf16.gmra.mxu0 %v7207_v42  ;;  %v6648_v42 = vld [vmem:[#allocation12 + $0x374] sm:$0xf0]  ;;  %v5886_v25 = vor.u32 %v6696_v13, %v5885_v34  ;;  %v5861_v54 = vld [vmem:[#allocation12 + $0x4b0] sm:$0xf] }
 0x223   :  { %1524 = vmatmul.bf16.gmra.mxu3 %v7209_v45  ;;  %1622 = vmatmul.bf16.gmra.mxu1 %v7209_v45  ;;  %v5694_v26 = vor.u32 %v6648_v42, %v5693_v40  ;;  %v5837_v34 = vld [vmem:[#allocation12 + $0x480] sm:$0xf] }
 0x224   :  { %8535 = vst [vmem:[#allocation69_spill] sm:$0xff] %v7463_v39  ;;  %3543 = vmatpush.bf16.msra.mxu3 %v5934_v44  ;;  %v6642_v44 = vld [vmem:[#allocation12 + $0x344] sm:$0xf0]  ;;  %v5862_v39 = vor.u32 %v6690_v7, %v5861_v54 }
 0x225   :  { %v1280_v15 = vpop.f32.mrf.mxu2  ;;  %3530 = vmatpush.bf16.msra.mxu2 %v5718_v10  ;;  %v5670_v4 = vor.u32 %v6642_v44, %v5669_v43 }
 0x226   :  { %v1281_v17 = vadd.f32 %v1280_v15, %v7384_v28  ;;  %v1329_v33 = vpop.f32.mrf.mxu3 }
 0x227   :  { %v7470_v53 = vpop.f32.mrf.mxu0 }
 0x228   :  { %8536 = vst [vmem:[#allocation70_spill] sm:$0xff] %v7470_v53  ;;  %v7472_v19 = vadd.f32 %v1329_v33, %v1281_v17  ;;  %v7474_v45 = vpop.f32.mrf.mxu1  ;;  %3544 = vmatpush.bf16.msra.mxu3 %v5910_v37  ;;  %v6101_v53 = vld [vmem:[#allocation12 + $0x690] sm:$0xf] }
 0x229   :  { %8538 = vst [vmem:[#allocation72_spill] sm:$0xff] %v7474_v45  ;;  %3531 = vmatpush.bf16.msra.mxu2 %v5694_v26  ;;  %v6636_v45 = vld [vmem:[#allocation12 + $0x314] sm:$0xf0] }
 0x22a   :  { %8537 = vst [vmem:[#allocation71_spill] sm:$0xff] %v7472_v19  ;;  %v5645_v19 = vld [vmem:[#allocation12 + $0x300] sm:$0xf]  ;;  %v6684_v26 = vld [vmem:[#allocation12 + $0x494] sm:$0xf0] }
 0x22b   :  { %v5646_v42 = vor.u32 %v6636_v45, %v5645_v19  ;;  %v5838_v13 = vor.u32 %v6684_v26, %v5837_v34 }
 0x22c   :  { %3545 = vmatpush.bf16.msra.mxu3 %v5886_v25 }
 0x22d   :  { %v1282_v15 = vpop.f32.mrf.mxu2  ;;  %3532 = vmatpush.bf16.msra.mxu2 %v5670_v4 }
 0x22e   :  { %v1283_v8 = vadd.f32 %v1282_v15, %v7384_v28  ;;  %v1331_v17 = vpop.f32.mrf.mxu3 }
 0x22f   :  { %v1383_v33 = vpop.f32.mrf.mxu0 }
 0x230   :  { %v7477_v10 = vadd.f32 %v1331_v17, %v1283_v8  ;;  %v1384_v37 = vadd.f32 %v1383_v33, %v7373_v35  ;;  %v1432_v40 = vpop.f32.mrf.mxu1  ;;  %3546 = vmatpush.bf16.msra.mxu3 %v5862_v39  ;;  %v8636_v29 = vld [vmem:[#allocation72_spill] sm:$0xff] }
 0x231   :  { %3533 = vmatpush.bf16.msra.mxu2 %v5646_v42 }
 0x232   :  { %8539 = vst [vmem:[#allocation73_spill] sm:$0xff] %v7477_v10  ;;  %v7480_v43 = vadd.f32 %v1432_v40, %v1384_v37  ;;  %1480 = vmatmul.bf16.gmra.mxu2 %v7219_v56  ;;  %1578 = vmatmul.bf16.gmra.mxu0 %v7219_v56  ;;  %v6816_v10 = vld [vmem:[#allocation12 + $0x8b4] sm:$0xf0] }
 0x233   :  { %1529 = vmatmul.bf16.gmra.mxu3 %v7221_v59  ;;  %1627 = vmatmul.bf16.gmra.mxu1 %v7221_v59 }
 0x234   :  { %8540 = vst [vmem:[#allocation74_spill] sm:$0xff] %v7480_v43  ;;  %3547 = vmatpush.bf16.msra.mxu3 %v5838_v13  ;;  %v6365_v43 = vld [vmem:[#allocation12 + $0x8a0] sm:$0xf] }
 0x235   :  { %v1285_v8 = vpop.f32.mrf.mxu2 }
 0x236   :  { %v1286_v25 = vadd.f32 %v1285_v8, %v7384_v28  ;;  %v1334_v19 = vpop.f32.mrf.mxu3  ;;  %v6843_v8 = vld [vmem:[#allocation10] sm:$0x3f] }
 0x237   :  { %v7487_v45 = vpop.f32.mrf.mxu0 }
 0x238   :  { %8541 = vst [vmem:[#allocation75_spill] sm:$0xff] %v7487_v45  ;;  %v7489_v39 = vadd.f32 %v1334_v19, %v1286_v25  ;;  %v7491_v44 = vpop.f32.mrf.mxu1  ;;  %v7510_v25 = vperm.slane %v6843_v8, 5  ;;  %v5237_v19 = vld [vmem:[#allocation4] sm:$0xf] }
 0x239   :  { %8543 = vst [vmem:[#allocation77_spill] sm:$0xff] %v7491_v44 }
 0x23a   :  { %8542 = vst [vmem:[#allocation76_spill] sm:$0xff] %v7489_v39  ;;  %v6768_v39 = vld [vmem:[#allocation12 + $0x734] sm:$0xf0] }
 0x23b   :  { %8549 = vst [vmem:[#allocation83_spill] sm:$0xff] %v7510_v25 }
 0x23d   :  { %v1287_v54 = vpop.f32.mrf.mxu2 }
 0x23e   :  { %v1288_v4 = vadd.f32 %v1287_v54, %v7384_v28  ;;  %v1336_v56 = vpop.f32.mrf.mxu3  ;;  %v6534_v54 = vld [vmem:[#allocation4 + $0x14] sm:$0xf0] }
 0x23f   :  { %v1388_v7 = vpop.f32.mrf.mxu0 }
 0x240   :  { %v7494_v15 = vadd.f32 %v1336_v56, %v1288_v4  ;;  %v1389_v59 = vadd.f32 %v1388_v7, %v7373_v35  ;;  %v1437_v17 = vpop.f32.mrf.mxu1  ;;  %v5239_v4 = vld [vmem:[#allocation4 + $0x18] sm:$0xf0]  ;;  %v6197_v56 = vld [vmem:[#allocation12 + $0x750] sm:$0xf]  ;;  %v6774_v7 = vld [vmem:[#allocation12 + $0x764] sm:$0xf0] }
 0x241   :  { %v6579_v35 = vld [vmem:[#allocation12 + $0x154] sm:$0xf] }
 0x242   :  { %8544 = vst [vmem:[#allocation78_spill] sm:$0xff] %v7494_v15  ;;  %v7497_v33 = vadd.f32 %v1437_v17, %v1389_v59  ;;  %1485 = vmatmul.bf16.gmra.mxu2 %v7231_v11  ;;  %1583 = vmatmul.bf16.gmra.mxu0 %v7231_v11  ;;  %v6531_v11 = vld [vmem:[#allocation4 + $0x4] sm:$0xf]  ;;  %v6389_v59 = vld [vmem:[#allocation12 + $0x8d0] sm:$0xf] }
 0x243   :  { %1534 = vmatmul.bf16.gmra.mxu3 %v7233_v12  ;;  %1632 = vmatmul.bf16.gmra.mxu1 %v7233_v12  ;;  %v6822_v17 = vld [vmem:[#allocation12 + $0x8e4] sm:$0xf0]  ;;  %v6173_v15 = vld [vmem:[#allocation12 + $0x720] sm:$0xf] }
 0x244   :  { %8545 = vst [vmem:[#allocation79_spill] sm:$0xff] %v7497_v33 }
 0x245   :  { %v1290_v37 = vpop.f32.mrf.mxu2 }
 0x246   :  { %v1291_v40 = vadd.f32 %v1290_v37, %v7384_v28  ;;  %v1339_v42 = vpop.f32.mrf.mxu3  ;;  %v6390_v28 = vor.u32 %v6822_v17, %v6389_v59  ;;  %v6810_v59 = vld [vmem:[#allocation12 + $0x884] sm:$0xf0] }
 0x247   :  { %v7504_v34 = vpop.f32.mrf.mxu0 }
 0x248   :  { %8546 = vst [vmem:[#allocation80_spill] sm:$0xff] %v7504_v34  ;;  %v7506_v26 = vadd.f32 %v1339_v42, %v1291_v40  ;;  %v7508_v13 = vpop.f32.mrf.mxu1  ;;  %v7516_v34 = vor.u32 %v6534_v54, %v5237_v19  ;;  %v7518_v42 = vor.u32 %v6531_v11, %v5239_v4  ;;  %v6174_v19 = vor.u32 %v6768_v39, %v6173_v15  ;;  %v6149_v11 = vld [vmem:[#allocation12 + $0x6f0] sm:$0xf]  ;;  %v6762_v4 = vld [vmem:[#allocation12 + $0x704] sm:$0xf0] }
 0x249   :  { %8548 = vst [vmem:[#allocation82_spill] sm:$0xff] %v7508_v13  ;;  %v6198_v13 = vor.u32 %v6774_v7, %v6197_v56  ;;  %v6366_v54 = vor.u32 %v6816_v10, %v6365_v43  ;;  %v6341_v7 = vld [vmem:[#allocation12 + $0x870] sm:$0xf]  ;;  %v6756_v10 = vld [vmem:[#allocation12 + $0x6d4] sm:$0xf0] }
 0x24a   :  { %8547 = vst [vmem:[#allocation81_spill] sm:$0xff] %v7506_v26  ;;  %v6675_v43 = vld [vmem:[#allocation12 + $0x454] sm:$0xf]  ;;  %v5815_v39 = vld [vmem:[#allocation12 + $0x468] sm:$0xf0] }
 0x24b   :  { %v6317_v15 = vld [vmem:[#allocation12 + $0x840] sm:$0xf]  ;;  %v5818_v45 = vor.u32 %v6675_v43, %v5815_v39  ;;  %v5791_v43 = vld [vmem:[#allocation12 + $0x438] sm:$0xf0] }
 0x24d   :  { %v7512_v12 = vpop.f32.mrf.mxu2  ;;  %3610 = vmatpush.bf16.msra.mxu0 %v5818_v45 }
 0x24e   :  { %8550 = vst [vmem:[#allocation84_spill] sm:$0xff] %v7512_v12  ;;  %v7514_v37 = vpop.f32.mrf.mxu3  ;;  %v7524_v12 = vperm.slane %v6843_v8, 4  ;;  %v6125_v8 = vld [vmem:[#allocation12 + $0x6c0] sm:$0xf] }
 0x24f   :  { %8551 = vst [vmem:[#allocation85_spill] sm:$0xff] %v7514_v37  ;;  %v1549_v40 = vpop.f32.mrf.mxu0  ;;  %v6804_v37 = vld [vmem:[#allocation12 + $0x854] sm:$0xf0] }
 0x250   :  { %v1550_v26 = vadd.f32 %v1549_v40, %v7510_v25  ;;  %v1598_v33 = vpop.f32.mrf.mxu1  ;;  %8553 = vst [vmem:[#allocation87_spill] sm:$0xff] %v7524_v12 }
 0x252   :  { %v7521_v44 = vadd.f32 %v1598_v33, %v1550_v26  ;;  %3506 = vmatmul.bf16.vlgmr.msrb.gmra.mxu2 %v7516_v34  ;;  %v6150_v26 = vor.u32 %v6762_v4, %v6149_v11  ;;  %v6532_v11 = vld [vmem:[#allocation4 + $0xc] sm:$0xf] }
 0x253   :  { %3520 = vmatmul.bf16.vlgmr.msrb.gmra.mxu3 %v7518_v42  ;;  %3554 = vmatpush.bf16.msrb.mxu2 %v6198_v13  ;;  %v6723_v4 = vld [vmem:[#allocation12 + $0x5d4] sm:$0xf] }
 0x254   :  { %8552 = vst [vmem:[#allocation86_spill] sm:$0xff] %v7521_v44  ;;  %3568 = vmatpush.bf16.msrb.mxu3 %v6390_v28  ;;  %v6342_v28 = vor.u32 %v6810_v59, %v6341_v7  ;;  %v6669_v7 = vld [vmem:[#allocation12 + $0x424] sm:$0xf] }
 0x255   :  { %v1451_v56 = vpop.f32.mrf.mxu2 }
 0x256   :  { %v1452_v17 = vadd.f32 %v1451_v56, %v7524_v12  ;;  %v1500_v40 = vpop.f32.mrf.mxu3  ;;  %v6535_v56 = vld [vmem:[#allocation4 + $0x1c] sm:$0xf0] }
 0x257   :  { %3555 = vmatpush.bf16.msrb.mxu2 %v6174_v19  ;;  %v7528_v33 = vpop.f32.mrf.mxu0  ;;  %v6126_v19 = vor.u32 %v6756_v10, %v6125_v8  ;;  %v7538_v27 = vor.u32 %v6535_v56, %v5245_v3  ;;  %v5767_v3 = vld [vmem:[#allocation12 + $0x408] sm:$0xf0]  ;;  %v6269_v56 = vld [vmem:[#allocation12 + $0x7e0] sm:$0xf] }
 0x258   :  { %8554 = vst [vmem:[#allocation88_spill] sm:$0xff] %v7528_v33  ;;  %v7530_v44 = vadd.f32 %v1500_v40, %v1452_v17  ;;  %3569 = vmatpush.bf16.msrb.mxu3 %v6366_v54  ;;  %v7532_v13 = vpop.f32.mrf.mxu1  ;;  %v6750_v33 = vld [vmem:[#allocation12 + $0x6a4] sm:$0xf0]  ;;  %v6318_v54 = vor.u32 %v6804_v37, %v6317_v15  ;;  %v5247_v17 = vld [vmem:[#allocation4 + $0x20] sm:$0xf0] }
 0x259   :  { %8556 = vst [vmem:[#allocation90_spill] sm:$0xff] %v7532_v13  ;;  %v6007_v40 = vld [vmem:[#allocation12 + $0x5e8] sm:$0xf0]  ;;  %v6798_v13 = vld [vmem:[#allocation12 + $0x824] sm:$0xf0]  ;;  %v6102_v45 = vor.u32 %v6750_v33, %v6101_v53  ;;  %v7540_v10 = vor.u32 %v6532_v11, %v5247_v17 }
 0x25a   :  { %8555 = vst [vmem:[#allocation89_spill] sm:$0xff] %v7530_v44  ;;  %v6293_v44 = vld [vmem:[#allocation12 + $0x810] sm:$0xf]  ;;  %v6010_v55 = vor.u32 %v6723_v4, %v6007_v40  ;;  %v6077_v37 = vld [vmem:[#allocation12 + $0x660] sm:$0xf] }
 0x25b   :  { %3556 = vmatpush.bf16.msrb.mxu2 %v6150_v26  ;;  %v5794_v26 = vor.u32 %v6669_v7, %v5791_v43  ;;  %v5983_v15 = vld [vmem:[#allocation12 + $0x5b8] sm:$0xf0]  ;;  %v6294_v4 = vor.u32 %v6798_v13, %v6293_v44  ;;  %v6744_v40 = vld [vmem:[#allocation12 + $0x674] sm:$0xf0]  ;;  %v6053_v33 = vld [vmem:[#allocation12 + $0x630] sm:$0xf] }
 0x25c   :  { %3570 = vmatpush.bf16.msrb.mxu3 %v6342_v28  ;;  %3624 = vmatpush.bf16.msra.mxu1 %v6010_v55  ;;  %v6717_v28 = vld [vmem:[#allocation12 + $0x5a4] sm:$0xf]  ;;  %v6792_v7 = vld [vmem:[#allocation12 + $0x7f4] sm:$0xf0]  ;;  %v6078_v55 = vor.u32 %v6744_v40, %v6077_v37  ;;  %v6711_v11 = vld [vmem:[#allocation12 + $0x574] sm:$0xf] }
 0x25d   :  { %v7534_v59 = vpop.f32.mrf.mxu2  ;;  %3611 = vmatpush.bf16.msra.mxu0 %v5794_v26  ;;  %v6270_v44 = vor.u32 %v6792_v7, %v6269_v56  ;;  %v6738_v13 = vld [vmem:[#allocation12 + $0x644] sm:$0xf0]  ;;  %v6657_v17 = vld [vmem:[#allocation12 + $0x3c4] sm:$0xf]  ;;  %v6732_v40 = vld [vmem:[#allocation12 + $0x614] sm:$0xf0] }
 0x25e   :  { %8557 = vst [vmem:[#allocation91_spill] sm:$0xff] %v7534_v59  ;;  %v7536_v39 = vpop.f32.mrf.mxu3  ;;  %v6705_v56 = vld [vmem:[#allocation12 + $0x544] sm:$0xf]  ;;  %v5935_v7 = vld [vmem:[#allocation12 + $0x558] sm:$0xf0] }
 0x25f   :  { %8558 = vst [vmem:[#allocation92_spill] sm:$0xff] %v7536_v39  ;;  %3557 = vmatpush.bf16.msrb.mxu2 %v6126_v19  ;;  %v1554_v8 = vpop.f32.mrf.mxu0  ;;  %v6663_v39 = vld [vmem:[#allocation12 + $0x3f4] sm:$0xf]  ;;  %v5986_v19 = vor.u32 %v6717_v28, %v5983_v15  ;;  %v6786_v28 = vld [vmem:[#allocation12 + $0x7c4] sm:$0xf0] }
 0x260   :  { %3571 = vmatpush.bf16.msrb.mxu3 %v6318_v54  ;;  %v1555_v59 = vadd.f32 %v1554_v8, %v7510_v25  ;;  %v1603_v22 = vpop.f32.mrf.mxu1  ;;  %v5770_v43 = vor.u32 %v6663_v39, %v5767_v3  ;;  %v5959_v54 = vld [vmem:[#allocation12 + $0x588] sm:$0xf0]  ;;  %v6245_v8 = vld [vmem:[#allocation12 + $0x7b0] sm:$0xf]  ;;  %v6029_v15 = vld [vmem:[#allocation12 + $0x600] sm:$0xf] }
 0x261   :  { %3625 = vmatpush.bf16.msra.mxu1 %v5986_v19 }
 0x262   :  { %v7543_v53 = vadd.f32 %v1603_v22, %v1555_v59  ;;  %3534 = vmatmul.bf16.vlgmr.msra.gmra.mxu2 %v7538_v27  ;;  %3612 = vmatpush.bf16.msra.mxu0 %v5770_v43  ;;  %v5962_v22 = vor.u32 %v6711_v11, %v5959_v54  ;;  %v5743_v59 = vld [vmem:[#allocation12 + $0x3d8] sm:$0xf0]  ;;  %v6246_v43 = vor.u32 %v6786_v28, %v6245_v8  ;;  %v6221_v11 = vld [vmem:[#allocation12 + $0x780] sm:$0xf]  ;;  %v6651_v54 = vld [vmem:[#allocation12 + $0x394] sm:$0xf] }
 0x263   :  { %3558 = vmatpush.bf16.msrb.mxu2 %v6102_v45  ;;  %3548 = vmatmul.bf16.vlgmr.msra.gmra.mxu3 %v7540_v10  ;;  %v5746_v3 = vor.u32 %v6657_v17, %v5743_v59  ;;  %v5431_v17 = vld [vmem:[#allocation12 + $0x168] sm:$0xf0]  ;;  %v6222_v8 = vor.u32 %v6780_v18, %v6221_v11  ;;  %v6693_v18 = vld [vmem:[#allocation12 + $0x4e4] sm:$0xf] }
 0x264   :  { %8559 = vst [vmem:[#allocation93_spill] sm:$0xff] %v7543_v53  ;;  %3572 = vmatpush.bf16.msrb.mxu3 %v6294_v4  ;;  %v6054_v4 = vor.u32 %v6738_v13, %v6053_v33  ;;  %v6627_v33 = vld [vmem:[#allocation12 + $0x2d4] sm:$0xf]  ;;  %v5623_v13 = vld [vmem:[#allocation12 + $0x2e8] sm:$0xf0]  ;;  %v5434_v28 = vor.u32 %v6579_v35, %v5431_v17 }
 0x265   :  { %v1456_v26 = vpop.f32.mrf.mxu2  ;;  %3626 = vmatpush.bf16.msra.mxu1 %v5962_v22  ;;  %v6533_v22 = vld [vmem:[#allocation4 + $0x14] sm:$0xf] }
 0x266   :  { %v1457_v39 = vadd.f32 %v1456_v26, %v7524_v12  ;;  %v1505_v45 = vpop.f32.mrf.mxu3  ;;  %v5719_v26 = vld [vmem:[#allocation12 + $0x3a8] sm:$0xf0]  ;;  %3613 = vmatpush.bf16.msra.mxu0 %v5746_v3  ;;  %v5626_v3 = vor.u32 %v6627_v33, %v5623_v13 }
 0x267   :  { %3559 = vmatpush.bf16.msrb.mxu2 %v6078_v55  ;;  %v7548_v37 = vpop.f32.mrf.mxu0  ;;  %v5938_v55 = vor.u32 %v6705_v56, %v5935_v7  ;;  %v5722_v59 = vor.u32 %v6651_v54, %v5719_v26  ;;  %v5407_v56 = vld [vmem:[#allocation12 + $0x138] sm:$0xf0]  ;;  %v6621_v7 = vld [vmem:[#allocation12 + $0x2a4] sm:$0xf] }
 0x268   :  { %8560 = vst [vmem:[#allocation94_spill] sm:$0xff] %v7548_v37  ;;  %v7550_v19 = vadd.f32 %v1505_v45, %v1457_v39  ;;  %3573 = vmatpush.bf16.msrb.mxu3 %v6270_v44  ;;  %v7552_v53 = vpop.f32.mrf.mxu1  ;;  %v5253_v37 = vld [vmem:[#allocation4 + $0x10] sm:$0xf]  ;;  %v6030_v39 = vor.u32 %v6732_v40, %v6029_v15  ;;  %v6536_v45 = vld [vmem:[#allocation4 + $0x24] sm:$0xf0] }
 0x269   :  { %8562 = vst [vmem:[#allocation96_spill] sm:$0xff] %v7552_v53  ;;  %v6573_v44 = vld [vmem:[#allocation12 + $0x124] sm:$0xf]  ;;  %v5255_v53 = vld [vmem:[#allocation4 + $0x28] sm:$0xf0]  ;;  %3627 = vmatpush.bf16.msra.mxu1 %v5938_v55  ;;  %v7558_v15 = vor.u32 %v6536_v45, %v5253_v37 }
 0x26a   :  { %8561 = vst [vmem:[#allocation95_spill] sm:$0xff] %v7550_v19  ;;  %v6699_v19 = vld [vmem:[#allocation12 + $0x514] sm:$0xf]  ;;  %v5599_v54 = vld [vmem:[#allocation12 + $0x2b8] sm:$0xf0]  ;;  %3614 = vmatpush.bf16.msra.mxu0 %v5722_v59  ;;  %v7560_v11 = vor.u32 %v6533_v22, %v5255_v53  ;;  %v5410_v59 = vor.u32 %v6573_v44, %v5407_v56 }
 0x26b   :  { %3560 = vmatpush.bf16.msrb.mxu2 %v6054_v4  ;;  %v5914_v26 = vor.u32 %v6699_v19, %v5911_v58  ;;  %v6645_v40 = vld [vmem:[#allocation12 + $0x364] sm:$0xf]  ;;  %v5887_v55 = vld [vmem:[#allocation12 + $0x4f8] sm:$0xf0]  ;;  %v6567_v58 = vld [vmem:[#allocation12 + $0xf4] sm:$0xf]  ;;  %v5602_v37 = vor.u32 %v6621_v7, %v5599_v54 }
 0x26c   :  { %3574 = vmatpush.bf16.msrb.mxu3 %v6246_v43  ;;  %v5695_v43 = vld [vmem:[#allocation12 + $0x378] sm:$0xf0]  ;;  %v6639_v19 = vld [vmem:[#allocation12 + $0x334] sm:$0xf]  ;;  %v5383_v45 = vld [vmem:[#allocation12 + $0x108] sm:$0xf0] }
 0x26d   :  { %v7554_v31 = vpop.f32.mrf.mxu2  ;;  %v5698_v17 = vor.u32 %v6645_v40, %v5695_v43  ;;  %3628 = vmatpush.bf16.msra.mxu1 %v5914_v26  ;;  %v5575_v53 = vld [vmem:[#allocation12 + $0x288] sm:$0xf0]  ;;  %v6687_v22 = vld [vmem:[#allocation12 + $0x4b4] sm:$0xf]  ;;  %v6561_v44 = vld [vmem:[#allocation12 + $0xc4] sm:$0xf] }
 0x26e   :  { %8563 = vst [vmem:[#allocation97_spill] sm:$0xff] %v7554_v31  ;;  %v7556_v4 = vpop.f32.mrf.mxu3  ;;  %v5890_v31 = vor.u32 %v6693_v18, %v5887_v55  ;;  %v5863_v40 = vld [vmem:[#allocation12 + $0x4c8] sm:$0xf0]  ;;  %v6609_v56 = vld [vmem:[#allocation12 + $0x244] sm:$0xf] }
 0x26f   :  { %8564 = vst [vmem:[#allocation98_spill] sm:$0xff] %v7556_v4  ;;  %3561 = vmatpush.bf16.msrb.mxu2 %v6030_v39  ;;  %v1559_v35 = vpop.f32.mrf.mxu0  ;;  %v6615_v4 = vld [vmem:[#allocation12 + $0x274] sm:$0xf]  ;;  %v5671_v39 = vld [vmem:[#allocation12 + $0x348] sm:$0xf0]  ;;  %3615 = vmatpush.bf16.msra.mxu0 %v5698_v17  ;;  %v5866_v43 = vor.u32 %v6687_v22, %v5863_v40 }
 0x270   :  { %3575 = vmatpush.bf16.msrb.mxu3 %v6222_v8  ;;  %v1560_v33 = vadd.f32 %v1559_v35, %v7510_v25  ;;  %v1608_v13 = vpop.f32.mrf.mxu1  ;;  %v5674_v8 = vor.u32 %v6639_v19, %v5671_v39  ;;  %v6633_v7 = vld [vmem:[#allocation12 + $0x304] sm:$0xf]  ;;  %v5578_v26 = vor.u32 %v6615_v4, %v5575_v53  ;;  %v5647_v18 = vld [vmem:[#allocation12 + $0x318] sm:$0xf0]  ;;  %v5437_v35 = vld [vmem:[#allocation12 + $0x158] sm:$0xf] }
 0x271   :  { %3629 = vmatpush.bf16.msra.mxu1 %v5890_v31  ;;  %v6583_v55 = vld [vmem:[#allocation12 + $0x16c] sm:$0xf0]  ;;  %v5650_v19 = vor.u32 %v6633_v7, %v5647_v18  ;;  %v6681_v39 = vld [vmem:[#allocation12 + $0x484] sm:$0xf]  ;;  %v6555_v4 = vld [vmem:[#allocation12 + $0x94] sm:$0xf] }
 0x272   :  { %v7563_v1 = vadd.f32 %v1608_v13, %v1560_v33  ;;  %3562 = vmatmul.bf16.vlgmr.msrb.gmra.mxu2 %v7558_v15  ;;  %v5551_v13 = vld [vmem:[#allocation12 + $0x258] sm:$0xf0]  ;;  %v5629_v53 = vld [vmem:[#allocation12 + $0x2d8] sm:$0xf]  ;;  %v6631_v22 = vld [vmem:[#allocation12 + $0x2ec] sm:$0xf0] }
 0x273   :  { %3582 = vmatpush.bf16.msra.mxu2 %v5434_v28  ;;  %3576 = vmatmul.bf16.vlgmr.msrb.gmra.mxu3 %v7560_v11  ;;  %v5386_v28 = vor.u32 %v6567_v58, %v5383_v45  ;;  %v5438_v45 = vor.u32 %v6583_v55, %v5437_v35  ;;  %v5554_v40 = vor.u32 %v6609_v56, %v5551_v13  ;;  %v5413_v7 = vld [vmem:[#allocation12 + $0x128] sm:$0xf]  ;;  %v6577_v18 = vld [vmem:[#allocation12 + $0x13c] sm:$0xf0]  ;;  %v6571_v13 = vld [vmem:[#allocation12 + $0x10c] sm:$0xf0] }
 0x274   :  { %3596 = vmatpush.bf16.msra.mxu3 %v5626_v3  ;;  %8565 = vst [vmem:[#allocation99_spill] sm:$0xff] %v7563_v1  ;;  %v5359_v3 = vld [vmem:[#allocation12 + $0xd8] sm:$0xf0]  ;;  %3616 = vmatpush.bf16.msra.mxu0 %v5674_v8  ;;  %v5630_v35 = vor.u32 %v6631_v22, %v5629_v53  ;;  %v5414_v55 = vor.u32 %v6577_v18, %v5413_v7  ;;  %v5287_v7 = vld [vmem:[#allocation12 + $0x48] sm:$0xf0] }
 0x275   :  { %v1461_v54 = vpop.f32.mrf.mxu2  ;;  %v5362_v31 = vor.u32 %v6561_v44, %v5359_v3  ;;  %3630 = vmatpush.bf16.msra.mxu1 %v5866_v43  ;;  %v5311_v44 = vld [vmem:[#allocation12 + $0x78] sm:$0xf0]  ;;  %v5605_v3 = vld [vmem:[#allocation12 + $0x2a8] sm:$0xf]  ;;  %v5530_v56 = vor.u32 %v6603_v0, %v5527_v46  ;;  %v5389_v43 = vld [vmem:[#allocation12 + $0xf8] sm:$0xf] }
 0x276   :  { %v1462_v17 = vadd.f32 %v1461_v54, %v7524_v12  ;;  %v1510_v33 = vpop.f32.mrf.mxu3  ;;  %v5335_v54 = vld [vmem:[#allocation12 + $0xa8] sm:$0xf0]  ;;  %v6543_v0 = vld [vmem:[#allocation12 + $0x34] sm:$0xf]  ;;  %v5365_v18 = vld [vmem:[#allocation12 + $0xc8] sm:$0xf] }
 0x277   :  { %3583 = vmatpush.bf16.msra.mxu2 %v5410_v59  ;;  %v5839_v59 = vld [vmem:[#allocation12 + $0x498] sm:$0xf0]  ;;  %v7568_v58 = vpop.f32.mrf.mxu0 }
 0x278   :  { %3597 = vmatpush.bf16.msra.mxu3 %v5602_v37  ;;  %8566 = vst [vmem:[#allocation100_spill] sm:$0xff] %v7568_v58  ;;  %v7570_v1 = vadd.f32 %v1510_v33, %v1462_v17  ;;  %v7572_v37 = vpop.f32.mrf.mxu1  ;;  %v5842_v8 = vor.u32 %v6681_v39, %v5839_v59  ;;  %3617 = vmatpush.bf16.msra.mxu0 %v5650_v19  ;;  %v6597_v59 = vld [vmem:[#allocation12 + $0x1e4] sm:$0xf]  ;;  %v5503_v19 = vld [vmem:[#allocation12 + $0x1f8] sm:$0xf0] }
 0x279   :  { %8568 = vst [vmem:[#allocation102_spill] sm:$0xff] %v7572_v37  ;;  %v5338_v17 = vor.u32 %v6555_v4, %v5335_v54  ;;  %v5390_v4 = vor.u32 %v6571_v13, %v5389_v43  ;;  %v6619_v54 = vld [vmem:[#allocation12 + $0x28c] sm:$0xf0]  ;;  %v6537_v13 = vld [vmem:[#allocation12 + $0x4] sm:$0xf] }
 0x27a   :  { %8567 = vst [vmem:[#allocation101_spill] sm:$0xff] %v7570_v1  ;;  %3631 = vmatpush.bf16.msra.mxu1 %v5842_v8  ;;  %v5506_v8 = vor.u32 %v6597_v59, %v5503_v19  ;;  %v5557_v1 = vld [vmem:[#allocation12 + $0x248] sm:$0xf]  ;;  %v6613_v19 = vld [vmem:[#allocation12 + $0x25c] sm:$0xf0] }
 0x27b   :  { %3584 = vmatpush.bf16.msra.mxu2 %v5386_v28  ;;  %v6549_v28 = vld [vmem:[#allocation12 + $0x64] sm:$0xf]  ;;  %3618 = vmatmul.bf16.vlgmr.msra.gmra.mxu0 %v7538_v27  ;;  %v6559_v37 = vld [vmem:[#allocation12 + $0xac] sm:$0xf0] }
 0x27c   :  { %3598 = vmatpush.bf16.msra.mxu3 %v5578_v26  ;;  %3666 = vmatpush.bf16.msrb.mxu0 %v5438_v45  ;;  %v6625_v26 = vld [vmem:[#allocation12 + $0x2bc] sm:$0xf0]  ;;  %v5314_v46 = vor.u32 %v6549_v28, %v5311_v44  ;;  %v5290_v28 = vor.u32 %v6543_v0, %v5287_v7  ;;  %v5263_v44 = vld [vmem:[#allocation12 + $0x18] sm:$0xf0]  ;;  %v6391_v0 = vld [vmem:[#allocation12 + $0x8e8] sm:$0xf0] }
 0x27d   :  { %v7574_v33 = vpop.f32.mrf.mxu2  ;;  %v5606_v45 = vor.u32 %v6625_v26, %v5605_v3  ;;  %3632 = vmatmul.bf16.vlgmr.msra.gmra.mxu1 %v7540_v10  ;;  %v6591_v26 = vld [vmem:[#allocation12 + $0x1b4] sm:$0xf] }
 0x27e   :  { %8569 = vst [vmem:[#allocation103_spill] sm:$0xff] %v7574_v33  ;;  %v7576_v39 = vpop.f32.mrf.mxu3  ;;  %3680 = vmatpush.bf16.msrb.mxu1 %v5630_v35  ;;  %v6565_v35 = vld [vmem:[#allocation12 + $0xdc] sm:$0xf0] }
 0x27f   :  { %3585 = vmatpush.bf16.msra.mxu2 %v5362_v31  ;;  %8570 = vst [vmem:[#allocation104_spill] sm:$0xff] %v7576_v39  ;;  %v1564_v31 = vpop.f32.mrf.mxu0  ;;  %v5341_v39 = vld [vmem:[#allocation12 + $0x98] sm:$0xf] }
 0x280   :  { %3599 = vmatpush.bf16.msra.mxu3 %v5554_v40  ;;  %3667 = vmatpush.bf16.msrb.mxu0 %v5414_v55  ;;  %v1565_v53 = vadd.f32 %v1564_v31, %v7510_v25  ;;  %v1613_v22 = vpop.f32.mrf.mxu1  ;;  %v5581_v40 = vld [vmem:[#allocation12 + $0x278] sm:$0xf]  ;;  %v5479_v55 = vld [vmem:[#allocation12 + $0x1c8] sm:$0xf0]  ;;  %v6585_v31 = vld [vmem:[#allocation12 + $0x184] sm:$0xf]  ;;  %v5342_v7 = vor.u32 %v6559_v37, %v5341_v39 }
 0x281   :  { %v5582_v43 = vor.u32 %v6619_v54, %v5581_v40  ;;  %v5482_v59 = vor.u32 %v6591_v26, %v5479_v55  ;;  %v6199_v40 = vld [vmem:[#allocation12 + $0x768] sm:$0xf0]  ;;  %v5266_v26 = vor.u32 %v6537_v13, %v5263_v44  ;;  %v5533_v55 = vld [vmem:[#allocation12 + $0x218] sm:$0xf]  ;;  %v5317_v39 = vld [vmem:[#allocation12 + $0x68] sm:$0xf] }
 0x282   :  { %v7581_v3 = vadd.f32 %v1613_v22, %v1565_v53  ;;  %3681 = vmatpush.bf16.msrb.mxu1 %v5606_v45  ;;  %v6771_v45 = vld [vmem:[#allocation12 + $0x754] sm:$0xf] }
 0x283   :  { %3586 = vmatpush.bf16.msra.mxu2 %v5338_v17  ;;  %v5366_v17 = vor.u32 %v6565_v35, %v5365_v18  ;;  %v6202_v58 = vor.u32 %v6771_v45, %v6199_v40 }
 0x284   :  { %3600 = vmatpush.bf16.msra.mxu3 %v5530_v56  ;;  %8571 = vst [vmem:[#allocation105_spill] sm:$0xff] %v7581_v3  ;;  %3668 = vmatpush.bf16.msrb.mxu0 %v5390_v4  ;;  %v5455_v3 = vld [vmem:[#allocation12 + $0x198] sm:$0xf0]  ;;  %v5558_v4 = vor.u32 %v6613_v19, %v5557_v1 }
 0x285   :  { %v1466_v56 = vpop.f32.mrf.mxu2  ;;  %v5458_v33 = vor.u32 %v6585_v31, %v5455_v3  ;;  %v6759_v31 = vld [vmem:[#allocation12 + $0x6f4] sm:$0xf] }
 0x286   :  { %v1467_v53 = vadd.f32 %v1466_v56, %v7524_v12  ;;  %v1515_v22 = vpop.f32.mrf.mxu3  ;;  %3682 = vmatpush.bf16.msrb.mxu1 %v5582_v43  ;;  %v6607_v56 = vld [vmem:[#allocation12 + $0x22c] sm:$0xf0]  ;;  %v6175_v43 = vld [vmem:[#allocation12 + $0x738] sm:$0xf0] }
 0x287   :  { %3587 = vmatpush.bf16.msra.mxu2 %v5314_v46  ;;  %v1566_v54 = vpop.f32.mrf.mxu0  ;;  %v6819_v46 = vld [vmem:[#allocation12 + $0x8d4] sm:$0xf]  ;;  %v5534_v37 = vor.u32 %v6607_v56, %v5533_v55  ;;  %v6178_v44 = vor.u32 %v6765_v30, %v6175_v43  ;;  %v6753_v55 = vld [vmem:[#allocation12 + $0x6c4] sm:$0xf]  ;;  %v6127_v56 = vld [vmem:[#allocation12 + $0x6d8] sm:$0xf0] }
 0x288   :  { %3601 = vmatpush.bf16.msra.mxu3 %v5506_v8  ;;  %3669 = vmatpush.bf16.msrb.mxu0 %v5366_v17  ;;  %v7584_v18 = vadd.f32 %v1515_v22, %v1467_v53  ;;  %v1567_v8 = vadd.f32 %v1566_v54, %v7510_v25  ;;  %v1615_v35 = vpop.f32.mrf.mxu1  ;;  %v6394_v19 = vor.u32 %v6819_v46, %v6391_v0  ;;  %v6367_v17 = vld [vmem:[#allocation12 + $0x8b8] sm:$0xf0]  ;;  %v6553_v53 = vld [vmem:[#allocation12 + $0x7c] sm:$0xf0]  ;;  %v5509_v22 = vld [vmem:[#allocation12 + $0x1e8] sm:$0xf] }
 0x289   :  { %v5318_v13 = vor.u32 %v6553_v53, %v5317_v39  ;;  %v6370_v40 = vor.u32 %v6813_v5, %v6367_v17  ;;  %v6807_v54 = vld [vmem:[#allocation12 + $0x874] sm:$0xf]  ;;  %v6547_v0 = vld [vmem:[#allocation12 + $0x4c] sm:$0xf0]  ;;  %v5269_v43 = vld [vmem:[#allocation12 + $0x8] sm:$0xf] }
 0x28a   :  { %8572 = vst [vmem:[#allocation106_spill] sm:$0xff] %v7584_v18  ;;  %v7587_v1 = vadd.f32 %v1615_v35, %v1567_v8  ;;  %3683 = vmatpush.bf16.msrb.mxu1 %v5558_v4  ;;  %v6151_v4 = vld [vmem:[#allocation12 + $0x708] sm:$0xf0]  ;;  %v6595_v35 = vld [vmem:[#allocation12 + $0x1cc] sm:$0xf0] }
 0x28b   :  { %3588 = vmatpush.bf16.msra.mxu2 %v5290_v28  ;;  %v6601_v28 = vld [vmem:[#allocation12 + $0x1fc] sm:$0xf0]  ;;  %v6343_v8 = vld [vmem:[#allocation12 + $0x888] sm:$0xf0]  ;;  %v6154_v5 = vor.u32 %v6759_v31, %v6151_v4  ;;  %v6801_v39 = vld [vmem:[#allocation12 + $0x844] sm:$0xf]  ;;  %v6130_v31 = vor.u32 %v6753_v55, %v6127_v56 }
 0x28c   :  { %3602 = vmatpush.bf16.msra.mxu3 %v5482_v59  ;;  %8573 = vst [vmem:[#allocation107_spill] sm:$0xff] %v7587_v1  ;;  %3670 = vmatpush.bf16.msrb.mxu0 %v5342_v7  ;;  %v5293_v59 = vld [vmem:[#allocation12 + $0x38] sm:$0xf]  ;;  %v5510_v46 = vor.u32 %v6601_v28, %v5509_v22  ;;  %v6775_v28 = vld [vmem:[#allocation12 + $0x76c] sm:$0xf0] }
 0x28d   :  { %v7589_v3 = vpop.f32.mrf.mxu2  ;;  %v6205_v22 = vld [vmem:[#allocation12 + $0x758] sm:$0xf]  ;;  %v6747_v4 = vld [vmem:[#allocation12 + $0x694] sm:$0xf]  ;;  %v6103_v18 = vld [vmem:[#allocation12 + $0x6a8] sm:$0xf0] }
 0x28e   :  { %8574 = vst [vmem:[#allocation108_spill] sm:$0xff] %v7589_v3  ;;  %v7591_v45 = vpop.f32.mrf.mxu3  ;;  %3684 = vmatpush.bf16.msrb.mxu1 %v5534_v37  ;;  %v6346_v37 = vor.u32 %v6807_v54, %v6343_v8  ;;  %v6206_v1 = vor.u32 %v6775_v28, %v6205_v22  ;;  %v6106_v28 = vor.u32 %v6747_v4, %v6103_v18  ;;  %v6735_v4 = vld [vmem:[#allocation12 + $0x634] sm:$0xf]  ;;  %v5607_v3 = vld [vmem:[#allocation12 + $0x2c0] sm:$0xf0] }
 0x28f   :  { %3589 = vmatpush.bf16.msra.mxu2 %v5266_v26  ;;  %8575 = vst [vmem:[#allocation109_spill] sm:$0xff] %v7591_v45  ;;  %v1569_v7 = vpop.f32.mrf.mxu0 }
 0x290   :  { %3603 = vmatpush.bf16.msra.mxu3 %v5458_v33  ;;  %3671 = vmatpush.bf16.msrb.mxu0 %v5318_v13  ;;  %v5485_v33 = vld [vmem:[#allocation12 + $0x1b8] sm:$0xf]  ;;  %v1570_v30 = vadd.f32 %v1569_v7, %v7510_v25  ;;  %v1618_v26 = vpop.f32.mrf.mxu1  ;;  %v6319_v13 = vld [vmem:[#allocation12 + $0x858] sm:$0xf0]  ;;  %v6589_v7 = vld [vmem:[#allocation12 + $0x19c] sm:$0xf0] }
 0x291   :  { %v5486_v53 = vor.u32 %v6595_v35, %v5485_v33  ;;  %v6823_v33 = vld [vmem:[#allocation12 + $0x8ec] sm:$0xf0]  ;;  %v6181_v35 = vld [vmem:[#allocation12 + $0x728] sm:$0xf] }
 0x292   :  { %3590 = vmatmul.bf16.vlgmr.msra.gmra.mxu2 %v7516_v34  ;;  %v7596_v17 = vadd.f32 %v1618_v26, %v1570_v30  ;;  %3685 = vmatpush.bf16.msrb.mxu1 %v5510_v46  ;;  %v6397_v30 = vld [vmem:[#allocation12 + $0x8d8] sm:$0xf]  ;;  %v6322_v46 = vor.u32 %v6801_v39, %v6319_v13  ;;  %v6741_v39 = vld [vmem:[#allocation12 + $0x664] sm:$0xf]  ;;  %v6817_v13 = vld [vmem:[#allocation12 + $0x8bc] sm:$0xf0] }
 0x293   :  { %3638 = vmatpush.bf16.msrb.mxu2 %v6202_v58  ;;  %v5294_v58 = vor.u32 %v6547_v0, %v5293_v59  ;;  %3604 = vmatmul.bf16.vlgmr.msra.gmra.mxu3 %v7518_v42  ;;  %v5461_v0 = vld [vmem:[#allocation12 + $0x188] sm:$0xf] }
 0x294   :  { %3652 = vmatpush.bf16.msrb.mxu3 %v6394_v19  ;;  %v6541_v19 = vld [vmem:[#allocation12 + $0x1c] sm:$0xf0]  ;;  %8576 = vst [vmem:[#allocation110_spill] sm:$0xff] %v7596_v17  ;;  %v5462_v8 = vor.u32 %v6589_v7, %v5461_v0  ;;  %v6751_v17 = vld [vmem:[#allocation12 + $0x6ac] sm:$0xf0] }
 0x295   :  { %3672 = vmatpush.bf16.msrb.mxu0 %v5294_v58  ;;  %v5270_v59 = vor.u32 %v6541_v19, %v5269_v43  ;;  %v6769_v58 = vld [vmem:[#allocation12 + $0x73c] sm:$0xf0]  ;;  %v6795_v43 = vld [vmem:[#allocation12 + $0x814] sm:$0xf]  ;;  %v6295_v19 = vld [vmem:[#allocation12 + $0x828] sm:$0xf0] }
 0x296   :  { %v1520_v54 = vpop.f32.mrf.mxu3  ;;  %3686 = vmatpush.bf16.msrb.mxu1 %v5486_v53  ;;  %v6373_v53 = vld [vmem:[#allocation12 + $0x8a8] sm:$0xf]  ;;  %v6298_v7 = vor.u32 %v6795_v43, %v6295_v19  ;;  %v6757_v19 = vld [vmem:[#allocation12 + $0x6dc] sm:$0xf0] }
 0x297   :  { %3639 = vmatpush.bf16.msrb.mxu2 %v6178_v44  ;;  %v1471_v44 = vpop.f32.mrf.mxu2  ;;  %v1571_v26 = vpop.f32.mrf.mxu0  ;;  %v6133_v43 = vld [vmem:[#allocation12 + $0x6c8] sm:$0xf] }
 0x298   :  { %3653 = vmatpush.bf16.msrb.mxu3 %v6370_v40  ;;  %v1472_v40 = vadd.f32 %v1471_v44, %v7524_v12  ;;  %v1572_v55 = vadd.f32 %v1571_v26, %v7510_v25  ;;  %v1620_v56 = vpop.f32.mrf.mxu1  ;;  %v6079_v44 = vld [vmem:[#allocation12 + $0x678] sm:$0xf0]  ;;  %v6811_v26 = vld [vmem:[#allocation12 + $0x88c] sm:$0xf0] }
 0x299   :  { %3673 = vmatpush.bf16.msrb.mxu0 %v5270_v59  ;;  %v6157_v59 = vld [vmem:[#allocation12 + $0x6f8] sm:$0xf] }
 0x29a   :  { %v7599_v22 = vadd.f32 %v1520_v54, %v1472_v40  ;;  %v7602_v0 = vadd.f32 %v1620_v56, %v1572_v55  ;;  %3687 = vmatpush.bf16.msrb.mxu1 %v5462_v8  ;;  %v6789_v40 = vld [vmem:[#allocation12 + $0x7e4] sm:$0xf]  ;;  %v6271_v54 = vld [vmem:[#allocation12 + $0x7f8] sm:$0xf0]  ;;  %v6783_v55 = vld [vmem:[#allocation12 + $0x7b4] sm:$0xf] }
 0x29b   :  { %3640 = vmatpush.bf16.msrb.mxu2 %v6154_v5  ;;  %v6398_v5 = vor.u32 %v6823_v33, %v6397_v30  ;;  %v6763_v30 = vld [vmem:[#allocation12 + $0x70c] sm:$0xf0]  ;;  %v6374_v33 = vor.u32 %v6817_v13, %v6373_v53  ;;  %v6247_v56 = vld [vmem:[#allocation12 + $0x7c8] sm:$0xf0]  ;;  %v6729_v53 = vld [vmem:[#allocation12 + $0x604] sm:$0xf]  ;;  %v6134_v13 = vor.u32 %v6757_v19, %v6133_v43 }
 0x29c   :  { %3654 = vmatpush.bf16.msrb.mxu3 %v6346_v37  ;;  %8577 = vst [vmem:[#allocation111_spill] sm:$0xff] %v7599_v22  ;;  %v6182_v37 = vor.u32 %v6769_v58, %v6181_v35  ;;  %3674 = vmatmul.bf16.vlgmr.msrb.gmra.mxu0 %v7516_v34  ;;  %v6055_v35 = vld [vmem:[#allocation12 + $0x648] sm:$0xf0]  ;;  %v6274_v58 = vor.u32 %v6789_v40, %v6271_v54  ;;  %v6109_v22 = vld [vmem:[#allocation12 + $0x698] sm:$0xf] }
 0x29d   :  { %3722 = vmatpush.bf16.msra.mxu0 %v6206_v1  ;;  %8578 = vst [vmem:[#allocation112_spill] sm:$0xff] %v7602_v0  ;;  %v6158_v1 = vor.u32 %v6763_v30, %v6157_v59  ;;  %3688 = vmatmul.bf16.vlgmr.msrb.gmra.mxu1 %v7518_v42  ;;  %v6325_v59 = vld [vmem:[#allocation12 + $0x848] sm:$0xf]  ;;  %v6805_v30 = vld [vmem:[#allocation12 + $0x85c] sm:$0xf0]  ;;  %v6250_v54 = vor.u32 %v6783_v55, %v6247_v56 }
 0x29e   :  { %3736 = vmatpush.bf16.msra.mxu1 %v6398_v5  ;;  %v7608_v8 = vpop.f32.mrf.mxu3  ;;  %v6777_v0 = vld [vmem:[#allocation12 + $0x784] sm:$0xf]  ;;  %v6301_v43 = vld [vmem:[#allocation12 + $0x818] sm:$0xf] }
 0x29f   :  { %3641 = vmatpush.bf16.msrb.mxu2 %v6130_v31  ;;  %v7605_v18 = vpop.f32.mrf.mxu2  ;;  %v6082_v31 = vor.u32 %v6741_v39, %v6079_v44  ;;  %8580 = vst [vmem:[#allocation114_spill] sm:$0xff] %v7608_v8  ;;  %v1574_v5 = vpop.f32.mrf.mxu0  ;;  %v6058_v44 = vor.u32 %v6735_v4, %v6055_v35  ;;  %v6013_v8 = vld [vmem:[#allocation12 + $0x5d8] sm:$0xf] }
 0x2a0   :  { %3655 = vmatpush.bf16.msrb.mxu3 %v6322_v46  ;;  %8579 = vst [vmem:[#allocation113_spill] sm:$0xff] %v7605_v18  ;;  %v6349_v46 = vld [vmem:[#allocation12 + $0x878] sm:$0xf]  ;;  %v1623_v39 = vpop.f32.mrf.mxu1 }
 0x2a1   :  { %3723 = vmatpush.bf16.msra.mxu0 %v6182_v37  ;;  %v6350_v37 = vor.u32 %v6811_v26, %v6349_v46  ;;  %v5821_v46 = vld [vmem:[#allocation12 + $0x458] sm:$0xf]  ;;  %v6679_v26 = vld [vmem:[#allocation12 + $0x46c] sm:$0xf0] }
 0x2a2   :  { %3737 = vmatpush.bf16.msra.mxu1 %v6374_v33  ;;  %v6223_v33 = vld [vmem:[#allocation12 + $0x798] sm:$0xf0]  ;;  %v5822_v56 = vor.u32 %v6679_v26, %v5821_v46  ;;  %v5773_v26 = vld [vmem:[#allocation12 + $0x3f8] sm:$0xf] }
 0x2a3   :  { %3642 = vmatpush.bf16.msrb.mxu2 %v6106_v28  ;;  %v1575_v28 = vadd.f32 %v1574_v5, %v7510_v25  ;;  %v6326_v5 = vor.u32 %v6805_v30, %v6325_v59  ;;  %v6226_v55 = vor.u32 %v6777_v0, %v6223_v33  ;;  %v5989_v59 = vld [vmem:[#allocation12 + $0x5a8] sm:$0xf]  ;;  %v6721_v30 = vld [vmem:[#allocation12 + $0x5bc] sm:$0xf0] }
 0x2a4   :  { %3656 = vmatpush.bf16.msrb.mxu3 %v6298_v7  ;;  %v6031_v7 = vld [vmem:[#allocation12 + $0x618] sm:$0xf0]  ;;  %v6793_v0 = vld [vmem:[#allocation12 + $0x7fc] sm:$0xf0] }
 0x2a5   :  { %3724 = vmatpush.bf16.msra.mxu0 %v6158_v1  ;;  %v7611_v40 = vadd.f32 %v1623_v39, %v1575_v28  ;;  %v6727_v1 = vld [vmem:[#allocation12 + $0x5ec] sm:$0xf0]  ;;  %v6034_v35 = vor.u32 %v6729_v53, %v6031_v7  ;;  %v5797_v28 = vld [vmem:[#allocation12 + $0x428] sm:$0xf]  ;;  %v6673_v39 = vld [vmem:[#allocation12 + $0x43c] sm:$0xf0] }
 0x2a6   :  { %3738 = vmatpush.bf16.msra.mxu1 %v6350_v37  ;;  %v1525_v19 = vpop.f32.mrf.mxu3  ;;  %v6014_v37 = vor.u32 %v6727_v1, %v6013_v8  ;;  %v6745_v7 = vld [vmem:[#allocation12 + $0x67c] sm:$0xf0]  ;;  %v5798_v8 = vor.u32 %v6673_v39, %v5797_v28  ;;  %v6667_v1 = vld [vmem:[#allocation12 + $0x40c] sm:$0xf0] }
 0x2a7   :  { %3643 = vmatpush.bf16.msrb.mxu2 %v6082_v31  ;;  %8581 = vst [vmem:[#allocation115_spill] sm:$0xff] %v7611_v40  ;;  %v6110_v31 = vor.u32 %v6751_v17, %v6109_v22  ;;  %v1476_v4 = vpop.f32.mrf.mxu2  ;;  %v6799_v40 = vld [vmem:[#allocation12 + $0x82c] sm:$0xf0]  ;;  %v1576_v45 = vpop.f32.mrf.mxu0  ;;  %v6085_v17 = vld [vmem:[#allocation12 + $0x668] sm:$0xf]  ;;  %v5774_v28 = vor.u32 %v6667_v1, %v5773_v26 }
 0x2a8   :  { %3657 = vmatpush.bf16.msrb.mxu3 %v6274_v58  ;;  %v1477_v58 = vadd.f32 %v1476_v4, %v7524_v12  ;;  %v1577_v53 = vadd.f32 %v1576_v45, %v7510_v25  ;;  %v6086_v33 = vor.u32 %v6745_v7, %v6085_v17  ;;  %v5965_v4 = vld [vmem:[#allocation12 + $0x578] sm:$0xf]  ;;  %v6661_v39 = vld [vmem:[#allocation12 + $0x3dc] sm:$0xf0]  ;;  %v6676_v7 = vld [vmem:[#allocation12 + $0x45c] sm:$0xf] }
 0x2a9   :  { %3725 = vmatpush.bf16.msra.mxu0 %v6134_v13  ;;  %v6302_v13 = vor.u32 %v6799_v40, %v6301_v43  ;;  %v5990_v40 = vor.u32 %v6721_v30, %v5989_v59  ;;  %v6739_v43 = vld [vmem:[#allocation12 + $0x64c] sm:$0xf0]  ;;  %v6733_v59 = vld [vmem:[#allocation12 + $0x61c] sm:$0xf0] }
 0x2aa   :  { %3739 = vmatpush.bf16.msra.mxu1 %v6326_v5  ;;  %v7614_v22 = vadd.f32 %v1525_v19, %v1477_v58  ;;  %v6061_v5 = vld [vmem:[#allocation12 + $0x638] sm:$0xf]  ;;  %v6787_v19 = vld [vmem:[#allocation12 + $0x7cc] sm:$0xf0] }
 0x2ab   :  { %3644 = vmatpush.bf16.msrb.mxu2 %v6058_v44  ;;  %v1625_v44 = vpop.f32.mrf.mxu1  ;;  %v6253_v58 = vld [vmem:[#allocation12 + $0x7b8] sm:$0xf] }
 0x2ac   :  { %3658 = vmatpush.bf16.msrb.mxu3 %v6250_v54  ;;  %8582 = vst [vmem:[#allocation116_spill] sm:$0xff] %v7614_v22  ;;  %v6277_v54 = vld [vmem:[#allocation12 + $0x7e8] sm:$0xf]  ;;  %v7617_v46 = vadd.f32 %v1625_v44, %v1577_v53  ;;  %v6254_v44 = vor.u32 %v6787_v19, %v6253_v58  ;;  %v5725_v22 = vld [vmem:[#allocation12 + $0x398] sm:$0xf] }
 0x2ad   :  { %3726 = vmatpush.bf16.msra.mxu0 %v6110_v31  ;;  %v6278_v45 = vor.u32 %v6793_v0, %v6277_v54  ;;  %v6715_v31 = vld [vmem:[#allocation12 + $0x58c] sm:$0xf0]  ;;  %v5941_v53 = vld [vmem:[#allocation12 + $0x548] sm:$0xf]  ;;  %v5823_v54 = vld [vmem:[#allocation12 + $0x470] sm:$0xf0] }
 0x2ae   :  { %8583 = vst [vmem:[#allocation117_spill] sm:$0xff] %v7617_v46  ;;  %3740 = vmatpush.bf16.msra.mxu1 %v6302_v13  ;;  %v5966_v13 = vor.u32 %v6715_v31, %v5965_v4  ;;  %v6229_v46 = vld [vmem:[#allocation12 + $0x788] sm:$0xf]  ;;  %v5826_v26 = vor.u32 %v6676_v7, %v5823_v54  ;;  %v6655_v4 = vld [vmem:[#allocation12 + $0x3ac] sm:$0xf0] }
 0x2af   :  { %3645 = vmatpush.bf16.msrb.mxu2 %v6034_v35  ;;  %v6062_v35 = vor.u32 %v6739_v43, %v6061_v5  ;;  %v7620_v17 = vpop.f32.mrf.mxu2  ;;  %v1579_v30 = vpop.f32.mrf.mxu0  ;;  %v6709_v5 = vld [vmem:[#allocation12 + $0x55c] sm:$0xf0]  ;;  %v6724_v31 = vld [vmem:[#allocation12 + $0x5dc] sm:$0xf]  ;;  %v6015_v19 = vld [vmem:[#allocation12 + $0x5f0] sm:$0xf0] }
 0x2b0   :  { %3659 = vmatpush.bf16.msrb.mxu3 %v6226_v55  ;;  %8584 = vst [vmem:[#allocation118_spill] sm:$0xff] %v7620_v17  ;;  %v5749_v55 = vld [vmem:[#allocation12 + $0x3c8] sm:$0xf]  ;;  %v1580_v0 = vadd.f32 %v1579_v30, %v7510_v25  ;;  %v6670_v30 = vld [vmem:[#allocation12 + $0x42c] sm:$0xf] }
 0x2b1   :  { %3727 = vmatpush.bf16.msra.mxu0 %v6086_v33  ;;  %v5917_v17 = vld [vmem:[#allocation12 + $0x518] sm:$0xf]  ;;  %v5701_v54 = vld [vmem:[#allocation12 + $0x368] sm:$0xf] }
 0x2b2   :  { %3646 = vmatmul.bf16.vlgmr.msrb.gmra.mxu2 %v7558_v15  ;;  %3741 = vmatpush.bf16.msra.mxu1 %v6278_v45  ;;  %v5942_v45 = vor.u32 %v6709_v5, %v5941_v53  ;;  %v5991_v53 = vld [vmem:[#allocation12 + $0x5c0] sm:$0xf0]  ;;  %v5775_v5 = vld [vmem:[#allocation12 + $0x410] sm:$0xf0] }
 0x2b3   :  { %3694 = vmatpush.bf16.msra.mxu2 %v5822_v56  ;;  %3660 = vmatmul.bf16.vlgmr.msrb.gmra.mxu3 %v7560_v11  ;;  %v7623_v56 = vpop.f32.mrf.mxu3  ;;  %v1628_v33 = vpop.f32.mrf.mxu1 }
 0x2b4   :  { %3708 = vmatpush.bf16.msra.mxu3 %v6014_v37  ;;  %8585 = vst [vmem:[#allocation119_spill] sm:$0xff] %v7623_v56  ;;  %v6037_v37 = vld [vmem:[#allocation12 + $0x608] sm:$0xf]  ;;  %v7626_v1 = vadd.f32 %v1628_v33, %v1580_v0  ;;  %v5799_v56 = vld [vmem:[#allocation12 + $0x440] sm:$0xf0] }
 0x2b5   :  { %3728 = vmatpush.bf16.msra.mxu0 %v6062_v35  ;;  %v6038_v43 = vor.u32 %v6733_v59, %v6037_v37  ;;  %v6703_v35 = vld [vmem:[#allocation12 + $0x52c] sm:$0xf0]  ;;  %v6018_v37 = vor.u32 %v6724_v31, %v6015_v19  ;;  %v5802_v7 = vor.u32 %v6670_v30, %v5799_v56  ;;  %v6649_v0 = vld [vmem:[#allocation12 + $0x37c] sm:$0xf0]  ;;  %v6664_v33 = vld [vmem:[#allocation12 + $0x3fc] sm:$0xf] }
 0x2b6   :  { %8586 = vst [vmem:[#allocation120_spill] sm:$0xff] %v7626_v1  ;;  %3742 = vmatpush.bf16.msra.mxu1 %v6254_v44  ;;  %v5918_v44 = vor.u32 %v6703_v35, %v5917_v17  ;;  %v6697_v31 = vld [vmem:[#allocation12 + $0x4fc] sm:$0xf0]  ;;  %v5702_v17 = vor.u32 %v6649_v0, %v5701_v54  ;;  %v5967_v19 = vld [vmem:[#allocation12 + $0x590] sm:$0xf0] }
 0x2b7   :  { %3695 = vmatpush.bf16.msra.mxu2 %v5798_v8  ;;  %v6781_v8 = vld [vmem:[#allocation12 + $0x79c] sm:$0xf0]  ;;  %v1481_v59 = vpop.f32.mrf.mxu2  ;;  %v6643_v35 = vld [vmem:[#allocation12 + $0x34c] sm:$0xf0] }
 0x2b8   :  { %3709 = vmatpush.bf16.msra.mxu3 %v5990_v40  ;;  %v5750_v40 = vor.u32 %v6661_v39, %v5749_v55  ;;  %v6230_v58 = vor.u32 %v6781_v8, %v6229_v46  ;;  %v5726_v39 = vor.u32 %v6655_v4, %v5725_v22  ;;  %v1581_v46 = vpop.f32.mrf.mxu0  ;;  %v6712_v4 = vld [vmem:[#allocation12 + $0x57c] sm:$0xf]  ;;  %v6637_v0 = vld [vmem:[#allocation12 + $0x31c] sm:$0xf0] }
 0x2b9   :  { %3729 = vmatpush.bf16.msra.mxu0 %v6038_v43  ;;  %v1582_v8 = vadd.f32 %v1581_v46, %v7510_v25  ;;  %v6691_v46 = vld [vmem:[#allocation12 + $0x4cc] sm:$0xf0] }
 0x2ba   :  { %3743 = vmatpush.bf16.msra.mxu1 %v6230_v58  ;;  %v5677_v58 = vld [vmem:[#allocation12 + $0x338] sm:$0xf] }
 0x2bb   :  { %3696 = vmatpush.bf16.msra.mxu2 %v5774_v28  ;;  %v1482_v28 = vadd.f32 %v1481_v59, %v7524_v12  ;;  %v1530_v55 = vpop.f32.mrf.mxu3  ;;  %v1630_v56 = vpop.f32.mrf.mxu1  ;;  %v6658_v59 = vld [vmem:[#allocation12 + $0x3cc] sm:$0xf]  ;;  %v5678_v54 = vor.u32 %v6643_v35, %v5677_v58  ;;  %v6700_v35 = vld [vmem:[#allocation12 + $0x51c] sm:$0xf] }
 0x2bc   :  { %3710 = vmatpush.bf16.msra.mxu3 %v5966_v13  ;;  %v6718_v13 = vld [vmem:[#allocation12 + $0x5ac] sm:$0xf]  ;;  %3730 = vmatmul.bf16.vlgmr.msra.gmra.mxu0 %v7558_v15 }
 0x2bd   :  { %3778 = vmatpush.bf16.msrb.mxu0 %v5826_v26  ;;  %v7629_v43 = vadd.f32 %v1530_v55, %v1482_v28  ;;  %v5893_v26 = vld [vmem:[#allocation12 + $0x4e8] sm:$0xf]  ;;  %v5994_v22 = vor.u32 %v6718_v13, %v5991_v53  ;;  %3744 = vmatmul.bf16.vlgmr.msra.gmra.mxu1 %v7560_v11  ;;  %v5751_v28 = vld [vmem:[#allocation12 + $0x3e0] sm:$0xf0]  ;;  %v5869_v55 = vld [vmem:[#allocation12 + $0x4b8] sm:$0xf] }
 0x2be   :  { %3792 = vmatpush.bf16.msrb.mxu1 %v6018_v37  ;;  %v5894_v30 = vor.u32 %v6697_v31, %v5893_v26  ;;  %v5970_v37 = vor.u32 %v6712_v4, %v5967_v19  ;;  %v5653_v13 = vld [vmem:[#allocation12 + $0x308] sm:$0xf]  ;;  %v5754_v53 = vor.u32 %v6658_v59, %v5751_v28  ;;  %v6652_v26 = vld [vmem:[#allocation12 + $0x39c] sm:$0xf]  ;;  %v5727_v31 = vld [vmem:[#allocation12 + $0x3b0] sm:$0xf0] }
 0x2bf   :  { %3697 = vmatpush.bf16.msra.mxu2 %v5750_v40  ;;  %8587 = vst [vmem:[#allocation121_spill] sm:$0xff] %v7629_v43  ;;  %v5778_v40 = vor.u32 %v6664_v33, %v5775_v5  ;;  %v6706_v33 = vld [vmem:[#allocation12 + $0x54c] sm:$0xf]  ;;  %v6685_v19 = vld [vmem:[#allocation12 + $0x49c] sm:$0xf0]  ;;  %v5730_v58 = vor.u32 %v6652_v26, %v5727_v31 }
 0x2c0   :  { %3711 = vmatpush.bf16.msra.mxu3 %v5942_v45  ;;  %v7633_v45 = vadd.f32 %v1630_v56, %v1582_v8  ;;  %v1584_v5 = vpop.f32.mrf.mxu0  ;;  %v5870_v8 = vor.u32 %v6691_v46, %v5869_v55  ;;  %v5845_v56 = vld [vmem:[#allocation12 + $0x488] sm:$0xf]  ;;  %v6628_v28 = vld [vmem:[#allocation12 + $0x2dc] sm:$0xf]  ;;  %v5919_v55 = vld [vmem:[#allocation12 + $0x530] sm:$0xf0] }
 0x2c1   :  { %3779 = vmatpush.bf16.msrb.mxu0 %v5802_v7  ;;  %v7636_v7 = vpop.f32.mrf.mxu2  ;;  %v5846_v46 = vor.u32 %v6685_v19, %v5845_v56  ;;  %v6694_v31 = vld [vmem:[#allocation12 + $0x4ec] sm:$0xf]  ;;  %v6640_v56 = vld [vmem:[#allocation12 + $0x33c] sm:$0xf] }
 0x2c2   :  { %8588 = vst [vmem:[#allocation122_spill] sm:$0xff] %v7633_v45  ;;  %3793 = vmatpush.bf16.msrb.mxu1 %v5994_v22  ;;  %v1585_v22 = vadd.f32 %v1584_v5, %v7510_v25  ;;  %v6580_v45 = vld [vmem:[#allocation12 + $0x15c] sm:$0xf]  ;;  %v6574_v5 = vld [vmem:[#allocation12 + $0x12c] sm:$0xf] }
 0x2c3   :  { %3698 = vmatpush.bf16.msra.mxu2 %v5726_v39  ;;  %8589 = vst [vmem:[#allocation123_spill] sm:$0xff] %v7636_v7  ;;  %v7638_v39 = vpop.f32.mrf.mxu3  ;;  %v1633_v4 = vpop.f32.mrf.mxu1  ;;  %v6622_v7 = vld [vmem:[#allocation12 + $0x2ac] sm:$0xf] }
 0x2c4   :  { %3712 = vmatpush.bf16.msra.mxu3 %v5918_v44  ;;  %8590 = vst [vmem:[#allocation124_spill] sm:$0xff] %v7638_v39  ;;  %v5943_v44 = vld [vmem:[#allocation12 + $0x560] sm:$0xf0]  ;;  %v7641_v43 = vadd.f32 %v1633_v4, %v1585_v22  ;;  %v5679_v4 = vld [vmem:[#allocation12 + $0x350] sm:$0xf0] }
 0x2c5   :  { %3780 = vmatpush.bf16.msrb.mxu0 %v5778_v40  ;;  %v5439_v40 = vld [vmem:[#allocation12 + $0x170] sm:$0xf0]  ;;  %v5946_v59 = vor.u32 %v6706_v33, %v5943_v44  ;;  %v5415_v39 = vld [vmem:[#allocation12 + $0x140] sm:$0xf0]  ;;  %v6646_v33 = vld [vmem:[#allocation12 + $0x36c] sm:$0xf] }
 0x2c6   :  { %3794 = vmatpush.bf16.msrb.mxu1 %v5970_v37  ;;  %8591 = vst [vmem:[#allocation125_spill] sm:$0xff] %v7641_v43  ;;  %v5442_v1 = vor.u32 %v6580_v45, %v5439_v40  ;;  %v5922_v37 = vor.u32 %v6700_v35, %v5919_v55  ;;  %v5703_v44 = vld [vmem:[#allocation12 + $0x380] sm:$0xf0]  ;;  %v6814_v43 = vld [vmem:[#allocation12 + $0x8ac] sm:$0xf] }
 0x2c7   :  { %3699 = vmatpush.bf16.msra.mxu2 %v5702_v17  ;;  %v5631_v17 = vld [vmem:[#allocation12 + $0x2f0] sm:$0xf0]  ;;  %v5706_v26 = vor.u32 %v6646_v33, %v5703_v44  ;;  %v5895_v22 = vld [vmem:[#allocation12 + $0x500] sm:$0xf0]  ;;  %v6610_v44 = vld [vmem:[#allocation12 + $0x24c] sm:$0xf] }
 0x2c8   :  { %3713 = vmatpush.bf16.msra.mxu3 %v5894_v30  ;;  %v5654_v30 = vor.u32 %v6637_v0, %v5653_v13  ;;  %v5634_v18 = vor.u32 %v6628_v28, %v5631_v17  ;;  %v1586_v45 = vpop.f32.mrf.mxu0  ;;  %v5418_v0 = vor.u32 %v6574_v5, %v5415_v39  ;;  %v5391_v28 = vld [vmem:[#allocation12 + $0x110] sm:$0xf0]  ;;  %v6616_v17 = vld [vmem:[#allocation12 + $0x27c] sm:$0xf]  ;;  %v6634_v5 = vld [vmem:[#allocation12 + $0x30c] sm:$0xf] }
 0x2c9   :  { %3781 = vmatpush.bf16.msrb.mxu0 %v5754_v53  ;;  %v1486_v53 = vpop.f32.mrf.mxu2  ;;  %v1587_v40 = vadd.f32 %v1586_v45, %v7510_v25  ;;  %v6688_v39 = vld [vmem:[#allocation12 + $0x4bc] sm:$0xf]  ;;  %v5655_v33 = vld [vmem:[#allocation12 + $0x320] sm:$0xf0]  ;;  %v6682_v45 = vld [vmem:[#allocation12 + $0x48c] sm:$0xf] }
 0x2ca   :  { %3795 = vmatpush.bf16.msrb.mxu1 %v5946_v59  ;;  %v1487_v13 = vadd.f32 %v1486_v53, %v7524_v12  ;;  %v6568_v59 = vld [vmem:[#allocation12 + $0xfc] sm:$0xf] }
 0x2cb   :  { %3700 = vmatpush.bf16.msra.mxu2 %v5678_v54  ;;  %v1535_v54 = vpop.f32.mrf.mxu3  ;;  %v1635_v35 = vpop.f32.mrf.mxu1  ;;  %v5394_v55 = vor.u32 %v6568_v59, %v5391_v28  ;;  %v6556_v28 = vld [vmem:[#allocation12 + $0x9c] sm:$0xf] }
 0x2cc   :  { %3714 = vmatpush.bf16.msra.mxu3 %v5870_v8  ;;  %v5610_v8 = vor.u32 %v6622_v7, %v5607_v3  ;;  %v7644_v19 = vadd.f32 %v1535_v54, %v1487_v13  ;;  %v5871_v3 = vld [vmem:[#allocation12 + $0x4d0] sm:$0xf0]  ;;  %v7648_v7 = vadd.f32 %v1635_v35, %v1587_v40  ;;  %v5559_v13 = vld [vmem:[#allocation12 + $0x260] sm:$0xf0]  ;;  %v5658_v54 = vor.u32 %v6634_v5, %v5655_v33  ;;  %v6604_v5 = vld [vmem:[#allocation12 + $0x21c] sm:$0xf] }
 0x2cd   :  { %3782 = vmatpush.bf16.msrb.mxu0 %v5730_v58  ;;  %v5898_v58 = vor.u32 %v6694_v31, %v5895_v22  ;;  %v5874_v53 = vor.u32 %v6688_v39, %v5871_v3  ;;  %v5445_v31 = vld [vmem:[#allocation12 + $0x160] sm:$0xf]  ;;  %v6578_v3 = vld [vmem:[#allocation12 + $0x144] sm:$0xf0]  ;;  %v5535_v33 = vld [vmem:[#allocation12 + $0x230] sm:$0xf0] }
 0x2ce   :  { %8592 = vst [vmem:[#allocation126_spill] sm:$0xff] %v7644_v19  ;;  %3796 = vmatpush.bf16.msrb.mxu1 %v5922_v37 }
 0x2cf   :  { %3701 = vmatpush.bf16.msra.mxu2 %v5654_v30  ;;  %v5583_v30 = vld [vmem:[#allocation12 + $0x290] sm:$0xf0]  ;;  %8593 = vst [vmem:[#allocation127_spill] sm:$0xff] %v7648_v7  ;;  %v6183_v7 = vld [vmem:[#allocation12 + $0x740] sm:$0xf0] }
 0x2d0   :  { %3715 = vmatpush.bf16.msra.mxu3 %v5846_v46  ;;  %v5367_v46 = vld [vmem:[#allocation12 + $0xe0] sm:$0xf0]  ;;  %v5586_v37 = vor.u32 %v6616_v17, %v5583_v30  ;;  %v6632_v17 = vld [vmem:[#allocation12 + $0x2f4] sm:$0xf0]  ;;  %v5343_v30 = vld [vmem:[#allocation12 + $0xb0] sm:$0xf0] }
 0x2d1   :  { %3783 = vmatpush.bf16.msrb.mxu0 %v5706_v26  ;;  %v6584_v26 = vld [vmem:[#allocation12 + $0x174] sm:$0xf0]  ;;  %v1488_v22 = vpop.f32.mrf.mxu2 }
 0x2d2   :  { %3702 = vmatmul.bf16.vlgmr.msra.gmra.mxu2 %v7538_v27  ;;  %3797 = vmatpush.bf16.msrb.mxu1 %v5898_v58  ;;  %v5446_v40 = vor.u32 %v6584_v26, %v5445_v31  ;;  %v5562_v58 = vor.u32 %v6610_v44, %v5559_v13  ;;  %v6626_v26 = vld [vmem:[#allocation12 + $0x2c4] sm:$0xf0]  ;;  %v5397_v44 = vld [vmem:[#allocation12 + $0x100] sm:$0xf] }
 0x2d3   :  { %3750 = vmatpush.bf16.msrb.mxu2 %v5442_v1  ;;  %v5682_v1 = vor.u32 %v6640_v56, %v5679_v4  ;;  %3716 = vmatmul.bf16.vlgmr.msra.gmra.mxu3 %v7540_v10  ;;  %v5847_v56 = vld [vmem:[#allocation12 + $0x4a0] sm:$0xf0]  ;;  %v1489_v4 = vadd.f32 %v1488_v22, %v7524_v12 }
 0x2d4   :  { %3764 = vmatpush.bf16.msrb.mxu3 %v5634_v18  ;;  %v6562_v18 = vld [vmem:[#allocation12 + $0xcc] sm:$0xf]  ;;  %v5850_v39 = vor.u32 %v6682_v45, %v5847_v56  ;;  %v5511_v56 = vld [vmem:[#allocation12 + $0x200] sm:$0xf0] }
 0x2d5   :  { %3784 = vmatpush.bf16.msrb.mxu0 %v5682_v1  ;;  %v5370_v59 = vor.u32 %v6562_v18, %v5367_v46  ;;  %v5421_v1 = vld [vmem:[#allocation12 + $0x130] sm:$0xf]  ;;  %v5346_v18 = vor.u32 %v6556_v28, %v5343_v30  ;;  %v6598_v45 = vld [vmem:[#allocation12 + $0x1ec] sm:$0xf]  ;;  %v6375_v12 = vld [vmem:[#allocation12 + $0x8c0] sm:$0xf0] }
 0x2d6   :  { %3798 = vmatpush.bf16.msrb.mxu1 %v5874_v53  ;;  %v5422_v31 = vor.u32 %v6578_v3, %v5421_v1  ;;  %v5613_v46 = vld [vmem:[#allocation12 + $0x2b0] sm:$0xf]  ;;  %v6572_v53 = vld [vmem:[#allocation12 + $0x114] sm:$0xf0]  ;;  %v5514_v30 = vor.u32 %v6598_v45, %v5511_v56  ;;  %v6566_v3 = vld [vmem:[#allocation12 + $0xe4] sm:$0xf0] }
 0x2d7   :  { %3751 = vmatpush.bf16.msrb.mxu2 %v5418_v0  ;;  %v1537_v0 = vpop.f32.mrf.mxu3  ;;  %v5373_v1 = vld [vmem:[#allocation12 + $0xd0] sm:$0xf]  ;;  %v5463_v56 = vld [vmem:[#allocation12 + $0x1a0] sm:$0xf0] }
 0x2d8   :  { %3765 = vmatpush.bf16.msrb.mxu3 %v5610_v8  ;;  %v5637_v8 = vld [vmem:[#allocation12 + $0x2e0] sm:$0xf]  ;;  %v7652_v35 = vadd.f32 %v1537_v0, %v1489_v4  ;;  %v5538_v4 = vor.u32 %v6604_v5, %v5535_v33  ;;  %v5614_v0 = vor.u32 %v6626_v26, %v5613_v46  ;;  %v6592_v5 = vld [vmem:[#allocation12 + $0x1bc] sm:$0xf]  ;;  %v5487_v33 = vld [vmem:[#allocation12 + $0x1d0] sm:$0xf0] }
 0x2d9   :  { %3785 = vmatpush.bf16.msrb.mxu0 %v5658_v54  ;;  %v5638_v22 = vor.u32 %v6632_v17, %v5637_v8  ;;  %v3507_v13 = vpop.f32.mrf.mxu2  ;;  %v6544_v8 = vld [vmem:[#allocation12 + $0x3c] sm:$0xf]  ;;  %v5589_v17 = vld [vmem:[#allocation12 + $0x280] sm:$0xf]  ;;  %v5565_v46 = vld [vmem:[#allocation12 + $0x250] sm:$0xf] }
 0x2da   :  { %8594 = vst [vmem:[#allocation128_spill] sm:$0xff] %v7652_v35  ;;  %3799 = vmatpush.bf16.msrb.mxu1 %v5850_v39  ;;  %v5295_v39 = vld [vmem:[#allocation12 + $0x50] sm:$0xf0]  ;;  %v5271_v26 = vld [vmem:[#allocation12 + $0x20] sm:$0xf0] }
 0x2db   :  { %3752 = vmatpush.bf16.msrb.mxu2 %v5394_v55  ;;  %v6550_v55 = vld [vmem:[#allocation12 + $0x6c] sm:$0xf]  ;;  %v6207_v35 = vld [vmem:[#allocation12 + $0x770] sm:$0xf0] }
 0x2dc   :  { %3766 = vmatpush.bf16.msrb.mxu3 %v5586_v37  ;;  %v5319_v37 = vld [vmem:[#allocation12 + $0x80] sm:$0xf0]  ;;  %3786 = vmatmul.bf16.vlgmr.msrb.gmra.mxu0 %v7538_v27 }
 0x2dd   :  { %3834 = vmatpush.bf16.msra.mxu0 %v5446_v40  ;;  %v5398_v40 = vor.u32 %v6572_v53, %v5397_v44  ;;  %v5322_v28 = vor.u32 %v6550_v55, %v5319_v37  ;;  %3800 = vmatmul.bf16.vlgmr.msrb.gmra.mxu1 %v7540_v10  ;;  %v6538_v55 = vld [vmem:[#allocation12 + $0xc] sm:$0xf]  ;;  %v6614_v37 = vld [vmem:[#allocation12 + $0x264] sm:$0xf0]  ;;  %v5490_v44 = vor.u32 %v6592_v5, %v5487_v33 }
 0x2de   :  { %3848 = vmatpush.bf16.msra.mxu1 %v5638_v22  ;;  %v6586_v53 = vld [vmem:[#allocation12 + $0x18c] sm:$0xf] }
 0x2df   :  { %3753 = vmatpush.bf16.msrb.mxu2 %v5370_v59  ;;  %v3521_v54 = vpop.f32.mrf.mxu3  ;;  %v6766_v33 = vld [vmem:[#allocation12 + $0x72c] sm:$0xf] }
 0x2e0   :  { %3767 = vmatpush.bf16.msrb.mxu3 %v5562_v58  ;;  %v7655_v59 = vadd.f32 %v3521_v54, %v3507_v13  ;;  %v6620_v58 = vld [vmem:[#allocation12 + $0x294] sm:$0xf0]  ;;  %v6772_v54 = vld [vmem:[#allocation12 + $0x75c] sm:$0xf] }
 0x2e1   :  { %3835 = vmatpush.bf16.msra.mxu0 %v5422_v31  ;;  %v5590_v22 = vor.u32 %v6620_v58, %v5589_v17  ;;  %v5374_v31 = vor.u32 %v6566_v3, %v5373_v1  ;;  %v6560_v13 = vld [vmem:[#allocation12 + $0xb4] sm:$0xf0]  ;;  %v3509_v45 = vpop.f32.mrf.mxu2  ;;  %v6399_v58 = vld [vmem:[#allocation12 + $0x8f0] sm:$0xf0]  ;;  %v5466_v3 = vor.u32 %v6586_v53, %v5463_v56  ;;  %v6210_v5 = vor.u32 %v6772_v54, %v6207_v35  ;;  %v6760_v53 = vld [vmem:[#allocation12 + $0x6fc] sm:$0xf] }
 0x2e2   :  { %3849 = vmatpush.bf16.msra.mxu1 %v5614_v0  ;;  %v5566_v0 = vor.u32 %v6614_v37, %v5565_v46  ;;  %v6608_v1 = vld [vmem:[#allocation12 + $0x234] sm:$0xf0]  ;;  %v5325_v46 = vld [vmem:[#allocation12 + $0x70] sm:$0xf]  ;;  %v6554_v37 = vld [vmem:[#allocation12 + $0x84] sm:$0xf0] }
 0x2e3   :  { %3754 = vmatpush.bf16.msrb.mxu2 %v5346_v18  ;;  %v5298_v18 = vor.u32 %v6544_v8, %v5295_v39  ;;  %v5274_v39 = vor.u32 %v6538_v55, %v5271_v26  ;;  %v5301_v55 = vld [vmem:[#allocation12 + $0x40] sm:$0xf]  ;;  %v6548_v26 = vld [vmem:[#allocation12 + $0x54] sm:$0xf0]  ;;  %v6808_v56 = vld [vmem:[#allocation12 + $0x87c] sm:$0xf] }
 0x2e4   :  { %3768 = vmatpush.bf16.msrb.mxu3 %v5538_v4  ;;  %v5349_v4 = vld [vmem:[#allocation12 + $0xa0] sm:$0xf] }
 0x2e5   :  { %3836 = vmatpush.bf16.msra.mxu0 %v5398_v40  ;;  %v6820_v40 = vld [vmem:[#allocation12 + $0x8dc] sm:$0xf] }
 0x2e6   :  { %3850 = vmatpush.bf16.msra.mxu1 %v5590_v22  ;;  %v6402_v19 = vor.u32 %v6820_v40, %v6399_v58  ;;  %v6351_v40 = vld [vmem:[#allocation12 + $0x890] sm:$0xf0]  ;;  %v5302_v58 = vor.u32 %v6548_v26, %v5301_v55  ;;  %v6405_v26 = vld [vmem:[#allocation12 + $0x8e0] sm:$0xf] }
 0x2e7   :  { %3755 = vmatpush.bf16.msrb.mxu2 %v5322_v28  ;;  %v3523_v17 = vpop.f32.mrf.mxu3  ;;  %v5350_v28 = vor.u32 %v6560_v13, %v5349_v4  ;;  %v5517_v4 = vld [vmem:[#allocation12 + $0x1f0] sm:$0xf]  ;;  %v6602_v13 = vld [vmem:[#allocation12 + $0x204] sm:$0xf0] }
 0x2e8   :  { %3769 = vmatpush.bf16.msrb.mxu3 %v5514_v30  ;;  %v7658_v8 = vadd.f32 %v3523_v17, %v3509_v45  ;;  %v5541_v30 = vld [vmem:[#allocation12 + $0x220] sm:$0xf]  ;;  %v6159_v45 = vld [vmem:[#allocation12 + $0x710] sm:$0xf0]  ;;  %v5518_v54 = vor.u32 %v6602_v13, %v5517_v4  ;;  %v6590_v4 = vld [vmem:[#allocation12 + $0x1a4] sm:$0xf0] }
 0x2e9   :  { %3837 = vmatpush.bf16.msra.mxu0 %v5374_v31  ;;  %v5542_v22 = vor.u32 %v6608_v1, %v5541_v30  ;;  %v5326_v31 = vor.u32 %v6554_v37, %v5325_v46  ;;  %v3535_v35 = vpop.f32.mrf.mxu2  ;;  %v5277_v30 = vld [vmem:[#allocation12 + $0x10] sm:$0xf]  ;;  %v6542_v1 = vld [vmem:[#allocation12 + $0x24] sm:$0xf0]  ;;  %v6327_v46 = vld [vmem:[#allocation12 + $0x860] sm:$0xf0] }
 0x2ea   :  { %3851 = vmatpush.bf16.msra.mxu1 %v5566_v0  ;;  %v3536_v0 = vadd.f32 %v3535_v35, %v7655_v59  ;;  %v6354_v59 = vor.u32 %v6808_v56, %v6351_v40  ;;  %v5278_v37 = vor.u32 %v6542_v1, %v5277_v30  ;;  %v6824_v35 = vld [vmem:[#allocation12 + $0x8f4] sm:$0xf0]  ;;  %v6742_v1 = vld [vmem:[#allocation12 + $0x66c] sm:$0xf] }
 0x2eb   :  { %3756 = vmatpush.bf16.msrb.mxu2 %v5298_v18  ;;  %v6186_v18 = vor.u32 %v6766_v33, %v6183_v7  ;;  %v6596_v7 = vld [vmem:[#allocation12 + $0x1d4] sm:$0xf0]  ;;  %v6213_v33 = vld [vmem:[#allocation12 + $0x760] sm:$0xf] }
 0x2ec   :  { %3770 = vmatpush.bf16.msrb.mxu3 %v5490_v44  ;;  %v6378_v44 = vor.u32 %v6814_v43, %v6375_v12  ;;  %v6162_v12 = vor.u32 %v6760_v53, %v6159_v45  ;;  %v6135_v43 = vld [vmem:[#allocation12 + $0x6e0] sm:$0xf0]  ;;  %v6111_v45 = vld [vmem:[#allocation12 + $0x6b0] sm:$0xf0] }
 0x2ed   :  { %3838 = vmatpush.bf16.msra.mxu0 %v5350_v28  ;;  %v5493_v28 = vld [vmem:[#allocation12 + $0x1c0] sm:$0xf] }
 0x2ee   :  { %3852 = vmatpush.bf16.msra.mxu1 %v5542_v22  ;;  %v6776_v22 = vld [vmem:[#allocation12 + $0x774] sm:$0xf0] }
 0x2ef   :  { %3757 = vmatpush.bf16.msrb.mxu2 %v5274_v39  ;;  %v3549_v17 = vpop.f32.mrf.mxu3  ;;  %v6754_v39 = vld [vmem:[#allocation12 + $0x6cc] sm:$0xf]  ;;  %v6214_v13 = vor.u32 %v6776_v22, %v6213_v33  ;;  %v6165_v33 = vld [vmem:[#allocation12 + $0x700] sm:$0xf] }
 0x2f0   :  { %3771 = vmatpush.bf16.msrb.mxu3 %v5466_v3  ;;  %v6802_v3 = vld [vmem:[#allocation12 + $0x84c] sm:$0xf]  ;;  %v6138_v55 = vor.u32 %v6754_v39, %v6135_v43 }
 0x2f1   :  { %3839 = vmatpush.bf16.msra.mxu0 %v5326_v31  ;;  %v5469_v31 = vld [vmem:[#allocation12 + $0x190] sm:$0xf]  ;;  %v3537_v53 = vpop.f32.mrf.mxu2  ;;  %v6790_v22 = vld [vmem:[#allocation12 + $0x7ec] sm:$0xf] }
 0x2f2   :  { %3758 = vmatmul.bf16.vlgmr.msrb.gmra.mxu2 %v7516_v34  ;;  %3853 = vmatpush.bf16.msra.mxu1 %v5518_v54  ;;  %v5470_v56 = vor.u32 %v6590_v4, %v5469_v31  ;;  %v6189_v54 = vld [vmem:[#allocation12 + $0x730] sm:$0xf]  ;;  %v6357_v4 = vld [vmem:[#allocation12 + $0x880] sm:$0xf] }
 0x2f3   :  { %3806 = vmatpush.bf16.msra.mxu2 %v6210_v5  ;;  %3772 = vmatmul.bf16.vlgmr.msrb.gmra.mxu3 %v7518_v42  ;;  %v5494_v5 = vor.u32 %v6596_v7, %v5493_v28  ;;  %v6303_v28 = vld [vmem:[#allocation12 + $0x830] sm:$0xf0]  ;;  %v6406_v7 = vor.u32 %v6824_v35, %v6405_v26 }
 0x2f4   :  { %3820 = vmatpush.bf16.msra.mxu3 %v6402_v19  ;;  %v7663_v19 = vadd.f32 %v3549_v17, %v3536_v0  ;;  %v6770_v0 = vld [vmem:[#allocation12 + $0x744] sm:$0xf0]  ;;  %v3538_v17 = vadd.f32 %v3537_v53, %v7658_v8  ;;  %v6764_v8 = vld [vmem:[#allocation12 + $0x714] sm:$0xf0]  ;;  %v6063_v53 = vld [vmem:[#allocation12 + $0x650] sm:$0xf0] }
 0x2f5   :  { %3840 = vmatpush.bf16.msra.mxu0 %v5302_v58  ;;  %v6796_v58 = vld [vmem:[#allocation12 + $0x81c] sm:$0xf]  ;;  %v6190_v39 = vor.u32 %v6770_v0, %v6189_v54  ;;  %v6166_v31 = vor.u32 %v6764_v8, %v6165_v33  ;;  %v6231_v33 = vld [vmem:[#allocation12 + $0x7a0] sm:$0xf0]  ;;  %v5829_v8 = vld [vmem:[#allocation12 + $0x460] sm:$0xf] }
 0x2f6   :  { %3854 = vmatpush.bf16.msra.mxu1 %v5494_v5  ;;  %v6087_v5 = vld [vmem:[#allocation12 + $0x680] sm:$0xf0]  ;;  %v6784_v0 = vld [vmem:[#allocation12 + $0x7bc] sm:$0xf] }
 0x2f7   :  { %3807 = vmatpush.bf16.msra.mxu2 %v6186_v18  ;;  %v6748_v18 = vld [vmem:[#allocation12 + $0x69c] sm:$0xf]  ;;  %v3551_v40 = vpop.f32.mrf.mxu3 }
 0x2f8   :  { %3821 = vmatpush.bf16.msra.mxu3 %v6378_v44  ;;  %v6330_v44 = vor.u32 %v6802_v3, %v6327_v46  ;;  %v7666_v43 = vadd.f32 %v3551_v40, %v3538_v17  ;;  %v6114_v30 = vor.u32 %v6748_v18, %v6111_v45  ;;  %v6306_v3 = vor.u32 %v6796_v58, %v6303_v28  ;;  %v6279_v46 = vld [vmem:[#allocation12 + $0x800] sm:$0xf0]  ;;  %v6812_v18 = vld [vmem:[#allocation12 + $0x894] sm:$0xf0]  ;;  %v6758_v45 = vld [vmem:[#allocation12 + $0x6e4] sm:$0xf0] }
 0x2f9   :  { %3841 = vmatpush.bf16.msra.mxu0 %v5278_v37  ;;  %v3563_v26 = vpop.f32.mrf.mxu2  ;;  %v6282_v35 = vor.u32 %v6790_v22, %v6279_v46  ;;  %v6255_v17 = vld [vmem:[#allocation12 + $0x7d0] sm:$0xf0]  ;;  %v6358_v40 = vor.u32 %v6812_v18, %v6357_v4  ;;  %v6333_v28 = vld [vmem:[#allocation12 + $0x850] sm:$0xf]  ;;  %v6680_v22 = vld [vmem:[#allocation12 + $0x474] sm:$0xf0] }
 0x2fa   :  { %3855 = vmatpush.bf16.msra.mxu1 %v5470_v56  ;;  %v3564_v56 = vadd.f32 %v3563_v26, %v7663_v19  ;;  %v6752_v19 = vld [vmem:[#allocation12 + $0x6b4] sm:$0xf0]  ;;  %v6309_v18 = vld [vmem:[#allocation12 + $0x820] sm:$0xf] }
 0x2fb   :  { %3808 = vmatpush.bf16.msra.mxu2 %v6162_v12  ;;  %v6381_v12 = vld [vmem:[#allocation12 + $0x8b0] sm:$0xf] }
 0x2fc   :  { %3822 = vmatpush.bf16.msra.mxu3 %v6354_v59  ;;  %v6818_v59 = vld [vmem:[#allocation12 + $0x8c4] sm:$0xf0]  ;;  %3842 = vmatmul.bf16.vlgmr.msra.gmra.mxu0 %v7516_v34 }
 0x2fd   :  { %3890 = vmatpush.bf16.msrb.mxu0 %v6214_v13  ;;  %v6382_v37 = vor.u32 %v6818_v59, %v6381_v12  ;;  %v6090_v13 = vor.u32 %v6742_v1, %v6087_v5  ;;  %3856 = vmatmul.bf16.vlgmr.msra.gmra.mxu1 %v7518_v42  ;;  %v6730_v12 = vld [vmem:[#allocation12 + $0x60c] sm:$0xf]  ;;  %v6806_v1 = vld [vmem:[#allocation12 + $0x864] sm:$0xf0]  ;;  %v6258_v59 = vor.u32 %v6784_v0, %v6255_v17  ;;  %v6117_v5 = vld [vmem:[#allocation12 + $0x6a0] sm:$0xf] }
 0x2fe   :  { %3904 = vmatpush.bf16.msrb.mxu1 %v6406_v7  ;;  %v6334_v46 = vor.u32 %v6806_v1, %v6333_v28  ;;  %v6118_v4 = vor.u32 %v6752_v19, %v6117_v5  ;;  %v6674_v17 = vld [vmem:[#allocation12 + $0x444] sm:$0xf0]  ;;  %v6069_v5 = vld [vmem:[#allocation12 + $0x640] sm:$0xf] }
 0x2ff   :  { %3809 = vmatpush.bf16.msra.mxu2 %v6138_v55  ;;  %v6736_v55 = vld [vmem:[#allocation12 + $0x63c] sm:$0xf]  ;;  %v3577_v54 = vpop.f32.mrf.mxu3  ;;  %v6722_v1 = vld [vmem:[#allocation12 + $0x5c4] sm:$0xf0] }
 0x300   :  { %3823 = vmatpush.bf16.msra.mxu3 %v6330_v44  ;;  %v6141_v44 = vld [vmem:[#allocation12 + $0x6d0] sm:$0xf]  ;;  %v7671_v7 = vadd.f32 %v3577_v54, %v3564_v56 }
 0x301   :  { %3891 = vmatpush.bf16.msrb.mxu0 %v6190_v39  ;;  %v6142_v58 = vor.u32 %v6758_v45, %v6141_v44  ;;  %v6066_v39 = vor.u32 %v6736_v55, %v6063_v53  ;;  %v6800_v55 = vld [vmem:[#allocation12 + $0x834] sm:$0xf0]  ;;  %v3565_v26 = vpop.f32.mrf.mxu2  ;;  %v5830_v53 = vor.u32 %v6680_v22, %v5829_v8  ;;  %v5805_v44 = vld [vmem:[#allocation12 + $0x430] sm:$0xf]  ;;  %v5973_v22 = vld [vmem:[#allocation12 + $0x580] sm:$0xf] }
 0x302   :  { %3905 = vmatpush.bf16.msrb.mxu1 %v6382_v37  ;;  %v6021_v37 = vld [vmem:[#allocation12 + $0x5e0] sm:$0xf]  ;;  %v6093_v45 = vld [vmem:[#allocation12 + $0x670] sm:$0xf]  ;;  %v3566_v56 = vadd.f32 %v3565_v26, %v7666_v43  ;;  %v6310_v28 = vor.u32 %v6800_v55, %v6309_v18  ;;  %v6740_v43 = vld [vmem:[#allocation12 + $0x654] sm:$0xf0] }
 0x303   :  { %3810 = vmatpush.bf16.msra.mxu2 %v6114_v30  ;;  %v6039_v30 = vld [vmem:[#allocation12 + $0x620] sm:$0xf0]  ;;  %v6668_v8 = vld [vmem:[#allocation12 + $0x414] sm:$0xf0]  ;;  %v6045_v55 = vld [vmem:[#allocation12 + $0x610] sm:$0xf] }
 0x304   :  { %3824 = vmatpush.bf16.msra.mxu3 %v6306_v3  ;;  %v6778_v3 = vld [vmem:[#allocation12 + $0x78c] sm:$0xf]  ;;  %v6788_v18 = vld [vmem:[#allocation12 + $0x7d4] sm:$0xf0]  ;;  %v6734_v26 = vld [vmem:[#allocation12 + $0x624] sm:$0xf0] }
 0x305   :  { %3892 = vmatpush.bf16.msrb.mxu0 %v6166_v31  ;;  %v6728_v31 = vld [vmem:[#allocation12 + $0x5f4] sm:$0xf0] }
 0x306   :  { %3906 = vmatpush.bf16.msrb.mxu1 %v6358_v40  ;;  %v6022_v0 = vor.u32 %v6728_v31, %v6021_v37  ;;  %v5997_v40 = vld [vmem:[#allocation12 + $0x5b0] sm:$0xf]  ;;  %v6716_v37 = vld [vmem:[#allocation12 + $0x594] sm:$0xf0]  ;;  %v6070_v31 = vor.u32 %v6740_v43, %v6069_v5 }
 0x307   :  { %3811 = vmatpush.bf16.msra.mxu2 %v6090_v13  ;;  %v6042_v13 = vor.u32 %v6730_v12, %v6039_v30  ;;  %v3579_v54 = vpop.f32.mrf.mxu3  ;;  %v6285_v12 = vld [vmem:[#allocation12 + $0x7f0] sm:$0xf]  ;;  %v6794_v30 = vld [vmem:[#allocation12 + $0x804] sm:$0xf0]  ;;  %v5998_v19 = vor.u32 %v6722_v1, %v5997_v40  ;;  %v5831_v1 = vld [vmem:[#allocation12 + $0x478] sm:$0xf0] }
 0x308   :  { %3825 = vmatpush.bf16.msra.mxu3 %v6282_v35  ;;  %v6234_v35 = vor.u32 %v6778_v3, %v6231_v33  ;;  %v5806_v3 = vor.u32 %v6674_v17, %v5805_v44  ;;  %v5781_v33 = vld [vmem:[#allocation12 + $0x400] sm:$0xf]  ;;  %v6662_v44 = vld [vmem:[#allocation12 + $0x3e4] sm:$0xf0]  ;;  %v6237_v17 = vld [vmem:[#allocation12 + $0x790] sm:$0xf] }
 0x309   :  { %3893 = vmatpush.bf16.msrb.mxu0 %v6142_v58  ;;  %v6746_v58 = vld [vmem:[#allocation12 + $0x684] sm:$0xf0] }
 0x30a   :  { %3907 = vmatpush.bf16.msrb.mxu1 %v6334_v46  ;;  %v6286_v46 = vor.u32 %v6794_v30, %v6285_v12  ;;  %v6782_v40 = vld [vmem:[#allocation12 + $0x7a4] sm:$0xf0]  ;;  %v5733_v12 = vld [vmem:[#allocation12 + $0x3a0] sm:$0xf]  ;;  %v6656_v30 = vld [vmem:[#allocation12 + $0x3b4] sm:$0xf0] }
 0x30b   :  { %3812 = vmatpush.bf16.msra.mxu2 %v6066_v39  ;;  %v6094_v39 = vor.u32 %v6746_v58, %v6093_v45  ;;  %v5949_v45 = vld [vmem:[#allocation12 + $0x550] sm:$0xf]  ;;  %v6677_v58 = vld [vmem:[#allocation12 + $0x464] sm:$0xf]  ;;  %v6238_v5 = vor.u32 %v6782_v40, %v6237_v17  ;;  %v5783_v40 = vld [vmem:[#allocation12 + $0x418] sm:$0xf0] }
 0x30c   :  { %3826 = vmatpush.bf16.msra.mxu3 %v6258_v59  ;;  %v7674_v59 = vadd.f32 %v3579_v54, %v3566_v56  ;;  %v6710_v54 = vld [vmem:[#allocation12 + $0x564] sm:$0xf0]  ;;  %v5834_v43 = vor.u32 %v6677_v58, %v5831_v1  ;;  %v6665_v17 = vld [vmem:[#allocation12 + $0x404] sm:$0xf]  ;;  %v5685_v58 = vld [vmem:[#allocation12 + $0x340] sm:$0xf] }
 0x30d   :  { %3894 = vmatpush.bf16.msrb.mxu0 %v6118_v4  ;;  %v6261_v4 = vld [vmem:[#allocation12 + $0x7c0] sm:$0xf]  ;;  %v6644_v1 = vld [vmem:[#allocation12 + $0x354] sm:$0xf0] }
 0x30e   :  { %3908 = vmatpush.bf16.msrb.mxu1 %v6310_v28  ;;  %v6262_v56 = vor.u32 %v6788_v18, %v6261_v4  ;;  %v5709_v18 = vld [vmem:[#allocation12 + $0x370] sm:$0xf] }
 0x30f   :  { %3813 = vmatpush.bf16.msra.mxu2 %v6042_v13  ;;  %v5782_v13 = vor.u32 %v6668_v8, %v5781_v33  ;;  %v6725_v33 = vld [vmem:[#allocation12 + $0x5e4] sm:$0xf]  ;;  %v6023_v8 = vld [vmem:[#allocation12 + $0x5f8] sm:$0xf0] }
 0x310   :  { %3827 = vmatpush.bf16.msra.mxu3 %v6234_v35  ;;  %v5974_v35 = vor.u32 %v6716_v37, %v5973_v22  ;;  %v6026_v22 = vor.u32 %v6725_v33, %v6023_v8  ;;  %v6671_v37 = vld [vmem:[#allocation12 + $0x434] sm:$0xf]  ;;  %v5661_v33 = vld [vmem:[#allocation12 + $0x310] sm:$0xf] }
 0x311   :  { %3895 = vmatpush.bf16.msrb.mxu0 %v6094_v39  ;;  %v5950_v39 = vor.u32 %v6710_v54, %v5949_v45  ;;  %v6719_v45 = vld [vmem:[#allocation12 + $0x5b4] sm:$0xf] }
 0x312   :  { %3814 = vmatmul.bf16.vlgmr.msra.gmra.mxu2 %v7558_v15  ;;  %3909 = vmatpush.bf16.msrb.mxu1 %v6286_v46  ;;  %v5734_v46 = vor.u32 %v6656_v30, %v5733_v12  ;;  %v5786_v30 = vor.u32 %v6665_v17, %v5783_v40  ;;  %v5951_v17 = vld [vmem:[#allocation12 + $0x568] sm:$0xf0]  ;;  %v6629_v40 = vld [vmem:[#allocation12 + $0x2e4] sm:$0xf] }
 0x313   :  { %3862 = vmatpush.bf16.msrb.mxu2 %v5830_v53  ;;  %3828 = vmatmul.bf16.vlgmr.msra.gmra.mxu3 %v7560_v11  ;;  %v5757_v53 = vld [vmem:[#allocation12 + $0x3d0] sm:$0xf] }
 0x314   :  { %3876 = vmatpush.bf16.msrb.mxu3 %v6022_v0  ;;  %v6046_v0 = vor.u32 %v6734_v26, %v6045_v55  ;;  %v5758_v28 = vor.u32 %v6662_v44, %v5757_v53  ;;  %v5901_v55 = vld [vmem:[#allocation12 + $0x4f0] sm:$0xf]  ;;  %v3619_v26 = vpop.f32.mrf.mxu0  ;;  %v6698_v44 = vld [vmem:[#allocation12 + $0x504] sm:$0xf0] }
 0x315   :  { %3896 = vmatpush.bf16.msrb.mxu0 %v6070_v31  ;;  %v5807_v31 = vld [vmem:[#allocation12 + $0x448] sm:$0xf0]  ;;  %v3591_v12 = vpop.f32.mrf.mxu2 }
 0x316   :  { %3910 = vmatpush.bf16.msrb.mxu1 %v6262_v56  ;;  %v5810_v53 = vor.u32 %v6671_v37, %v5807_v31  ;;  %v5999_v56 = vld [vmem:[#allocation12 + $0x5c8] sm:$0xf0]  ;;  %v6638_v37 = vld [vmem:[#allocation12 + $0x324] sm:$0xf0]  ;;  %v6659_v31 = vld [vmem:[#allocation12 + $0x3d4] sm:$0xf] }
 0x317   :  { %3863 = vmatpush.bf16.msrb.mxu2 %v5806_v3  ;;  %v5925_v3 = vld [vmem:[#allocation12 + $0x520] sm:$0xf]  ;;  %v6002_v54 = vor.u32 %v6719_v45, %v5999_v56  ;;  %v5447_v56 = vld [vmem:[#allocation12 + $0x178] sm:$0xf0] }
 0x318   :  { %3877 = vmatpush.bf16.msrb.mxu3 %v5998_v19  ;;  %v6704_v19 = vld [vmem:[#allocation12 + $0x534] sm:$0xf0] }
 0x319   :  { %3897 = vmatpush.bf16.msrb.mxu0 %v6046_v0  ;;  %v5926_v4 = vor.u32 %v6704_v19, %v5925_v3  ;;  %v6692_v3 = vld [vmem:[#allocation12 + $0x4d4] sm:$0xf0]  ;;  %v5975_v19 = vld [vmem:[#allocation12 + $0x598] sm:$0xf0] }
 0x31a   :  { %3911 = vmatpush.bf16.msrb.mxu1 %v6238_v5  ;;  %v3605_v5 = vpop.f32.mrf.mxu3 }
 0x31b   :  { %3864 = vmatpush.bf16.msrb.mxu2 %v5782_v13  ;;  %v6650_v13 = vld [vmem:[#allocation12 + $0x384] sm:$0xf0]  ;;  %v3606_v8 = vadd.f32 %v3605_v5, %v3591_v12  ;;  %v5639_v12 = vld [vmem:[#allocation12 + $0x2f8] sm:$0xf0] }
 0x31c   :  { %3878 = vmatpush.bf16.msrb.mxu3 %v5974_v35  ;;  %v3633_v35 = vpop.f32.mrf.mxu1  ;;  %3898 = vmatmul.bf16.vlgmr.msrb.gmra.mxu0 %v7558_v15  ;;  %v5710_v0 = vor.u32 %v6650_v13, %v5709_v18  ;;  %v5853_v13 = vld [vmem:[#allocation12 + $0x490] sm:$0xf] }
 0x31d   :  { %3946 = vmatpush.bf16.msra.mxu0 %v5834_v43  ;;  %3912 = vmatmul.bf16.vlgmr.msrb.gmra.mxu1 %v7560_v11  ;;  %v6713_v43 = vld [vmem:[#allocation12 + $0x584] sm:$0xf] }
 0x31e   :  { %3960 = vmatpush.bf16.msra.mxu1 %v6026_v22  ;;  %v5978_v22 = vor.u32 %v6713_v43, %v5975_v19  ;;  %v6575_v43 = vld [vmem:[#allocation12 + $0x134] sm:$0xf]  ;;  %v5423_v19 = vld [vmem:[#allocation12 + $0x148] sm:$0xf0] }
 0x31f   :  { %3865 = vmatpush.bf16.msrb.mxu2 %v5758_v28  ;;  %v5902_v28 = vor.u32 %v6698_v44, %v5901_v55  ;;  %v6686_v55 = vld [vmem:[#allocation12 + $0x4a4] sm:$0xf0]  ;;  %v3620_v44 = vadd.f32 %v3619_v26, %v3606_v8 }
 0x320   :  { %3879 = vmatpush.bf16.msrb.mxu3 %v5950_v39  ;;  %v5877_v39 = vld [vmem:[#allocation12 + $0x4c0] sm:$0xf]  ;;  %v5854_v5 = vor.u32 %v6686_v55, %v5853_v13  ;;  %v5426_v13 = vor.u32 %v6575_v43, %v5423_v19  ;;  %v6569_v55 = vld [vmem:[#allocation12 + $0x104] sm:$0xf]  ;;  %v6563_v19 = vld [vmem:[#allocation12 + $0xd4] sm:$0xf] }
 0x321   :  { %3947 = vmatpush.bf16.msra.mxu0 %v5810_v53  ;;  %v5878_v18 = vor.u32 %v6692_v3, %v5877_v39  ;;  %v6581_v53 = vld [vmem:[#allocation12 + $0x164] sm:$0xf]  ;;  %v5735_v3 = vld [vmem:[#allocation12 + $0x3b8] sm:$0xf0] }
 0x322   :  { %3961 = vmatpush.bf16.msra.mxu1 %v6002_v54  ;;  %v6707_v54 = vld [vmem:[#allocation12 + $0x554] sm:$0xf]  ;;  %v6653_v39 = vld [vmem:[#allocation12 + $0x3a4] sm:$0xf]  ;;  %v5450_v26 = vor.u32 %v6581_v53, %v5447_v56  ;;  %v3607_v25 = vpop.f32.mrf.mxu3  ;;  %v5399_v53 = vld [vmem:[#allocation12 + $0x118] sm:$0xf0] }
 0x323   :  { %3866 = vmatpush.bf16.msrb.mxu2 %v5734_v46  ;;  %v5686_v46 = vor.u32 %v6644_v1, %v5685_v58  ;;  %v5954_v1 = vor.u32 %v6707_v54, %v5951_v17  ;;  %v5738_v8 = vor.u32 %v6653_v39, %v5735_v3  ;;  %v6617_v17 = vld [vmem:[#allocation12 + $0x284] sm:$0xf]  ;;  %v5402_v43 = vor.u32 %v6569_v55, %v5399_v53  ;;  %v5351_v55 = vld [vmem:[#allocation12 + $0xb8] sm:$0xf0]  ;;  %v6683_v53 = vld [vmem:[#allocation12 + $0x494] sm:$0xf] }
 0x324   :  { %3880 = vmatpush.bf16.msrb.mxu3 %v5926_v4  ;;  %v5759_v4 = vld [vmem:[#allocation12 + $0x3e8] sm:$0xf0]  ;;  %v3635_v58 = vpop.f32.mrf.mxu1 }
 0x325   :  { %3948 = vmatpush.bf16.msra.mxu0 %v5786_v30  ;;  %v5762_v45 = vor.u32 %v6659_v31, %v5759_v4  ;;  %v7680_v30 = vadd.f32 %v3633_v35, %v3620_v44  ;;  %v6623_v31 = vld [vmem:[#allocation12 + $0x2b4] sm:$0xf]  ;;  %v3593_v4 = vpop.f32.mrf.mxu2  ;;  %v6701_v35 = vld [vmem:[#allocation12 + $0x524] sm:$0xf]  ;;  %v5927_v44 = vld [vmem:[#allocation12 + $0x538] sm:$0xf0] }
 0x326   :  { %3962 = vmatpush.bf16.msra.mxu1 %v5978_v22  ;;  %v5642_v22 = vor.u32 %v6629_v40, %v5639_v12  ;;  %v5618_v54 = vor.u32 %v6623_v31, %v5615_v57  ;;  %v6695_v40 = vld [vmem:[#allocation12 + $0x4f4] sm:$0xf]  ;;  %v5903_v12 = vld [vmem:[#allocation12 + $0x508] sm:$0xf0] }
 0x327   :  { %3867 = vmatpush.bf16.msrb.mxu2 %v5710_v0  ;;  %v3621_v0 = vpop.f32.mrf.mxu0  ;;  %v5906_v39 = vor.u32 %v6695_v40, %v5903_v12  ;;  %v6611_v31 = vld [vmem:[#allocation12 + $0x254] sm:$0xf] }
 0x328   :  { %3881 = vmatpush.bf16.msrb.mxu3 %v5902_v28  ;;  %v5662_v28 = vor.u32 %v6638_v37, %v5661_v33  ;;  %v6647_v33 = vld [vmem:[#allocation12 + $0x374] sm:$0xf]  ;;  %v5711_v37 = vld [vmem:[#allocation12 + $0x388] sm:$0xf0] }
 0x329   :  { %3949 = vmatpush.bf16.msra.mxu0 %v5762_v45  ;;  %v3608_v45 = vadd.f32 %v3607_v25, %v3593_v4  ;;  %v5591_v25 = vld [vmem:[#allocation12 + $0x298] sm:$0xf0] }
 0x32a   :  { %3963 = vmatpush.bf16.msra.mxu1 %v5954_v1  ;;  %v5879_v4 = vld [vmem:[#allocation12 + $0x4d8] sm:$0xf0] }
 0x32b   :  { %3868 = vmatpush.bf16.msrb.mxu2 %v5686_v46  ;;  %v5930_v46 = vor.u32 %v6701_v35, %v5927_v44  ;;  %v3622_v56 = vadd.f32 %v3621_v0, %v3608_v45  ;;  %v5567_v35 = vld [vmem:[#allocation12 + $0x268] sm:$0xf0]  ;;  %v6635_v45 = vld [vmem:[#allocation12 + $0x314] sm:$0xf] }
 0x32c   :  { %3882 = vmatpush.bf16.msrb.mxu3 %v5878_v18  ;;  %v5714_v18 = vor.u32 %v6647_v33, %v5711_v37  ;;  %v3689_v3 = vpop.f32.mrf.mxu1 }
 0x32d   :  { %3950 = vmatpush.bf16.msra.mxu0 %v5738_v8  ;;  %v7683_v1 = vadd.f32 %v3635_v58, %v3622_v56  ;;  %v5375_v8 = vld [vmem:[#allocation12 + $0xe8] sm:$0xf0]  ;;  %v6689_v58 = vld [vmem:[#allocation12 + $0x4c4] sm:$0xf] }
 0x32e   :  { %3964 = vmatpush.bf16.msra.mxu1 %v5930_v46  ;;  %v5882_v44 = vor.u32 %v6689_v58, %v5879_v4  ;;  %v5663_v46 = vld [vmem:[#allocation12 + $0x328] sm:$0xf0]  ;;  %v5378_v37 = vor.u32 %v6563_v19, %v5375_v8  ;;  %v5303_v58 = vld [vmem:[#allocation12 + $0x58] sm:$0xf0] }
 0x32f   :  { %3869 = vmatpush.bf16.msrb.mxu2 %v5662_v28  ;;  %v3675_v28 = vpop.f32.mrf.mxu0  ;;  %v5666_v33 = vor.u32 %v6635_v45, %v5663_v46  ;;  %v5855_v56 = vld [vmem:[#allocation12 + $0x4a8] sm:$0xf0]  ;;  %v5495_v45 = vld [vmem:[#allocation12 + $0x1d8] sm:$0xf0] }
 0x330   :  { %3883 = vmatpush.bf16.msrb.mxu3 %v5854_v5  ;;  %v6641_v5 = vld [vmem:[#allocation12 + $0x344] sm:$0xf]  ;;  %v7686_v0 = vadd.f32 %v3689_v3, %v3675_v28  ;;  %v5858_v12 = vor.u32 %v6683_v53, %v5855_v56  ;;  %v6215_v56 = vld [vmem:[#allocation12 + $0x778] sm:$0xf0] }
 0x331   :  { %3951 = vmatpush.bf16.msra.mxu0 %v5714_v18  ;;  %v6557_v18 = vld [vmem:[#allocation12 + $0xa4] sm:$0xf] }
 0x332   :  { %3870 = vmatmul.bf16.vlgmr.msrb.gmra.mxu2 %v7538_v27  ;;  %3965 = vmatpush.bf16.msra.mxu1 %v5906_v39  ;;  %v5354_v39 = vor.u32 %v6557_v18, %v5351_v55  ;;  %v6587_v18 = vld [vmem:[#allocation12 + $0x194] sm:$0xf]  ;;  %v6773_v55 = vld [vmem:[#allocation12 + $0x764] sm:$0xf] }
 0x333   :  { %3918 = vmatpush.bf16.msra.mxu2 %v5450_v26  ;;  %v5687_v26 = vld [vmem:[#allocation12 + $0x358] sm:$0xf0]  ;;  %3884 = vmatmul.bf16.vlgmr.msrb.gmra.mxu3 %v7540_v10 }
 0x334   :  { %3932 = vmatpush.bf16.msra.mxu3 %v5642_v22  ;;  %v5690_v57 = vor.u32 %v6641_v5, %v5687_v26  ;;  %v5594_v22 = vor.u32 %v6617_v17, %v5591_v25  ;;  %v5543_v17 = vld [vmem:[#allocation12 + $0x238] sm:$0xf0]  ;;  %v3691_v25 = vpop.f32.mrf.mxu1  ;;  %v6551_v5 = vld [vmem:[#allocation12 + $0x74] sm:$0xf]  ;;  %v5327_v26 = vld [vmem:[#allocation12 + $0x88] sm:$0xf0] }
 0x335   :  { %v5330_v19 = vor.u32 %v6551_v5, %v5327_v26  ;;  %v3647_v8 = vpop.f32.mrf.mxu2  ;;  %v6218_v5 = vor.u32 %v6773_v55, %v6215_v56 }
 0x336   :  { %3952 = vmatpush.bf16.msra.mxu0 %v5690_v57  ;;  %3966 = vmatpush.bf16.msra.mxu1 %v5882_v44  ;;  %v6599_v57 = vld [vmem:[#allocation12 + $0x1f4] sm:$0xf]  ;;  %v3648_v4 = vadd.f32 %v3647_v8, %v7680_v30  ;;  %v6593_v44 = vld [vmem:[#allocation12 + $0x1c4] sm:$0xf]  ;;  %v6191_v8 = vld [vmem:[#allocation12 + $0x748] sm:$0xf0] }
 0x337   :  { %3919 = vmatpush.bf16.msra.mxu2 %v5426_v13  ;;  %v5570_v13 = vor.u32 %v6611_v31, %v5567_v35  ;;  %v3677_v40 = vpop.f32.mrf.mxu0  ;;  %v6545_v31 = vld [vmem:[#allocation12 + $0x44] sm:$0xf]  ;;  %v3661_v35 = vpop.f32.mrf.mxu3 }
 0x338   :  { %3933 = vmatpush.bf16.msra.mxu3 %v5618_v54  ;;  %v6605_v54 = vld [vmem:[#allocation12 + $0x224] sm:$0xf]  ;;  %v7688_v28 = vadd.f32 %v3691_v25, %v3677_v40  ;;  %v3662_v46 = vadd.f32 %v3661_v35, %v3648_v4  ;;  %v6383_v4 = vld [vmem:[#allocation12 + $0x8c8] sm:$0xf0] }
 0x339   :  { %v5546_v3 = vor.u32 %v6605_v54, %v5543_v17  ;;  %v6821_v54 = vld [vmem:[#allocation12 + $0x8e4] sm:$0xf]  ;;  %v6407_v17 = vld [vmem:[#allocation12 + $0x8f8] sm:$0xf0] }
 0x33a   :  { %3953 = vmatpush.bf16.msra.mxu0 %v5666_v33  ;;  %3967 = vmatpush.bf16.msra.mxu1 %v5858_v12  ;;  %v5306_v33 = vor.u32 %v6545_v31, %v5303_v58  ;;  %v4066_v53 = vrot.slane %v3662_v46, 7  ;;  %v6815_v58 = vld [vmem:[#allocation12 + $0x8b4] sm:$0xf] }
 0x33b   :  { %3920 = vmatpush.bf16.msra.mxu2 %v5402_v43  ;;  %v5519_v43 = vld [vmem:[#allocation12 + $0x208] sm:$0xf0] }
 0x33c   :  { %3934 = vmatpush.bf16.msra.mxu3 %v5594_v22  ;;  %v5522_v22 = vor.u32 %v6599_v57, %v5519_v43  ;;  %v7695_v40 = vsel %vm4076_vm0, %v7671_v7, %v4066_v53  ;;  %v7699_v12 = vsel %vm4080_vm1, %v7671_v7, %v4066_v53  ;;  %v7703_v25 = vsel %vm8485_vm2, %v7671_v7, %v4066_v53 }
 0x33d   :  { %3954 = vmatmul.bf16.vlgmr.msra.gmra.mxu0 %v7538_v27  ;;  %3968 = vmatmul.bf16.vlgmr.msra.gmra.mxu1 %v7540_v10  ;;  %v5279_v27 = vld [vmem:[#allocation12 + $0x28] sm:$0xf0]  ;;  %v5498_v10 = vor.u32 %v6593_v44, %v5495_v45  ;;  %v6410_v43 = vor.u32 %v6821_v54, %v6407_v17  ;;  %v7712_v31 = vsel %vm4086_vm5, %v7671_v7, %v4066_v53  ;;  %v6755_v54 = vld [vmem:[#allocation12 + $0x6d4] sm:$0xf] }
 0x33e   :  { %v7716_v35 = vsel %vm4119_vm3, %v4066_v53, %v7671_v7  ;;  %v7724_v45 = vsel %vm8484_vm7, %v7671_v7, %v4066_v53  ;;  %v6335_v17 = vld [vmem:[#allocation12 + $0x868] sm:$0xf0] }
 0x33f   :  { %3921 = vmatpush.bf16.msra.mxu2 %v5378_v37  ;;  %v6539_v37 = vld [vmem:[#allocation12 + $0x14] sm:$0xf]  ;;  %v3663_v57 = vpop.f32.mrf.mxu3 }
 0x340   :  { %3935 = vmatpush.bf16.msra.mxu3 %v5570_v13  ;;  %v5471_v13 = vld [vmem:[#allocation12 + $0x1a8] sm:$0xf0]  ;;  %v5282_v30 = vor.u32 %v6539_v37, %v5279_v27  ;;  %v6386_v37 = vor.u32 %v6815_v58, %v6383_v4  ;;  %v6761_v27 = vld [vmem:[#allocation12 + $0x704] sm:$0xf] }
 0x343   :  { %3922 = vmatpush.bf16.msra.mxu2 %v5354_v39  ;;  %v3649_v39 = vpop.f32.mrf.mxu2 }
 0x344   :  { %3936 = vmatpush.bf16.msra.mxu3 %v5546_v3  ;;  %v5474_v3 = vor.u32 %v6587_v18, %v5471_v13  ;;  %v3650_v26 = vadd.f32 %v3649_v39, %v7683_v1  ;;  %v7720_v1 = vsel %vm8481_vm6, %v7671_v7, %v4066_v53  ;;  %v6809_v18 = vld [vmem:[#allocation12 + $0x884] sm:$0xf]  ;;  %v6359_v13 = vld [vmem:[#allocation12 + $0x898] sm:$0xf0] }
 0x345   :  { %v6362_v56 = vor.u32 %v6809_v18, %v6359_v13 }
 0x346   :  { %v3664_v44 = vadd.f32 %v3663_v57, %v3650_v26  ;;  %v6797_v26 = vld [vmem:[#allocation12 + $0x824] sm:$0xf]  ;;  %v6311_v57 = vld [vmem:[#allocation12 + $0x838] sm:$0xf0] }
 0x347   :  { %3923 = vmatpush.bf16.msra.mxu2 %v5330_v19  ;;  %v6767_v19 = vld [vmem:[#allocation12 + $0x734] sm:$0xf]  ;;  %v6314_v4 = vor.u32 %v6797_v26, %v6311_v57  ;;  %v6047_v57 = vld [vmem:[#allocation12 + $0x628] sm:$0xf0] }
 0x348   :  { %3937 = vmatpush.bf16.msra.mxu3 %v5522_v22  ;;  %v7708_v22 = vsel %vm4097_vm4, %v7671_v7, %v4066_v53  ;;  %v6194_v46 = vor.u32 %v6767_v19, %v6191_v8  ;;  %v6731_v26 = vld [vmem:[#allocation12 + $0x614] sm:$0xf] }
 0x34b   :  { %3924 = vmatpush.bf16.msra.mxu2 %v5306_v33  ;;  %v7726_v33 = vrot.slane %v3664_v44, 7  ;;  %v6743_v44 = vld [vmem:[#allocation12 + $0x674] sm:$0xf] }
 0x34c   :  { %3938 = vmatpush.bf16.msra.mxu3 %v5498_v10  ;;  %v6167_v10 = vld [vmem:[#allocation12 + $0x718] sm:$0xf0] }
 0x34d   :  { %v7733_v7 = vsel %vm4080_vm1, %v7674_v59, %v7726_v33  ;;  %v7738_v55 = vsel %vm4097_vm4, %v7674_v59, %v7726_v33  ;;  %v6170_v53 = vor.u32 %v6761_v27, %v6167_v10  ;;  %v7748_v19 = vsel %vm8481_vm6, %v7674_v59, %v7726_v33  ;;  %v6287_v27 = vld [vmem:[#allocation12 + $0x808] sm:$0xf0] }
 0x34e   :  { %v7753_v8 = vsel %vm4086_vm5, %v7674_v59, %v7726_v33 }
 0x34f   :  { %3925 = vmatpush.bf16.msra.mxu2 %v5282_v30  ;;  %v6803_v30 = vld [vmem:[#allocation12 + $0x854] sm:$0xf] }
 0x350   :  { %3939 = vmatpush.bf16.msra.mxu3 %v5474_v3  ;;  %v6338_v39 = vor.u32 %v6803_v30, %v6335_v17  ;;  %v6749_v3 = vld [vmem:[#allocation12 + $0x6a4] sm:$0xf] }
 0x351   :  { %v6785_v17 = vld [vmem:[#allocation12 + $0x7c4] sm:$0xf] }
 0x352   :  { %3926 = vmatmul.bf16.vlgmr.msra.gmra.mxu2 %v7516_v34  ;;  %v6143_v34 = vld [vmem:[#allocation12 + $0x6e8] sm:$0xf0] }
 0x353   :  { %3974 = vmatpush.bf16.msrb.mxu2 %v6218_v5  ;;  %3940 = vmatmul.bf16.vlgmr.msra.gmra.mxu3 %v7518_v42  ;;  %v6146_v42 = vor.u32 %v6755_v54, %v6143_v34  ;;  %v6119_v5 = vld [vmem:[#allocation12 + $0x6b8] sm:$0xf0] }
 0x354   :  { %3988 = vmatpush.bf16.msrb.mxu3 %v6410_v43  ;;  %v7743_v43 = vsel %vm4076_vm0, %v7674_v59, %v7726_v33  ;;  %v6122_v58 = vor.u32 %v6749_v3, %v6119_v5  ;;  %v6071_v54 = vld [vmem:[#allocation12 + $0x658] sm:$0xf0]  ;;  %v3745_v3 = vpop.f32.mrf.mxu1 }
 0x355   :  { %v3703_v18 = vpop.f32.mrf.mxu2 }
 0x356   :  { %v3704_v34 = vadd.f32 %v3703_v18, %v7686_v0  ;;  %v3717_v30 = vpop.f32.mrf.mxu3 }
 0x357   :  { %3975 = vmatpush.bf16.msrb.mxu2 %v6194_v46  ;;  %v6095_v46 = vld [vmem:[#allocation12 + $0x688] sm:$0xf0] }
 0x358   :  { %3989 = vmatpush.bf16.msrb.mxu3 %v6386_v37  ;;  %v6791_v37 = vld [vmem:[#allocation12 + $0x7f4] sm:$0xf]  ;;  %v6098_v10 = vor.u32 %v6743_v44, %v6095_v46  ;;  %v4170_v46 = vsel %vm8485_vm2, %v7674_v59, %v7726_v33 }
 0x359   :  { %v6290_v13 = vor.u32 %v6791_v37, %v6287_v27  ;;  %v6779_v44 = vld [vmem:[#allocation12 + $0x794] sm:$0xf]  ;;  %v6050_v27 = vor.u32 %v6731_v26, %v6047_v57 }
 0x35b   :  { %3976 = vmatpush.bf16.msrb.mxu2 %v6170_v53  ;;  %v3731_v53 = vpop.f32.mrf.mxu0 }
 0x35c   :  { %3990 = vmatpush.bf16.msrb.mxu3 %v6362_v56  ;;  %v6737_v56 = vld [vmem:[#allocation12 + $0x644] sm:$0xf] }
 0x35d   :  { %v6074_v5 = vor.u32 %v6737_v56, %v6071_v54 }
 0x35e   :  { %v3719_v54 = vpop.f32.mrf.mxu3 }
 0x35f   :  { %3977 = vmatpush.bf16.msrb.mxu2 %v6146_v42  ;;  %v6263_v42 = vld [vmem:[#allocation12 + $0x7d8] sm:$0xf0] }
 0x360   :  { %3991 = vmatpush.bf16.msrb.mxu3 %v6338_v39  ;;  %v3718_v39 = vadd.f32 %v3717_v30, %v3704_v34 }
 0x362   :  { %v3732_v37 = vadd.f32 %v3731_v53, %v3718_v39  ;;  %v4182_v53 = vsel %vm8484_vm7, %v7674_v59, %v7726_v33 }
 0x363   :  { %3978 = vmatpush.bf16.msrb.mxu2 %v6122_v58  ;;  %v6266_v58 = vor.u32 %v6785_v17, %v6263_v42  ;;  %v3733_v34 = vpop.f32.mrf.mxu0 }
 0x364   :  { %3992 = vmatpush.bf16.msrb.mxu3 %v6314_v4  ;;  %v6239_v4 = vld [vmem:[#allocation12 + $0x7a8] sm:$0xf0]  ;;  %v3746_v0 = vadd.f32 %v3745_v3, %v3732_v37  ;;  %v3747_v3 = vpop.f32.mrf.mxu1 }
 0x365   :  { %v6242_v18 = vor.u32 %v6779_v44, %v6239_v4 }
 0x367   :  { %3979 = vmatpush.bf16.msrb.mxu2 %v6098_v10  ;;  %v3705_v10 = vpop.f32.mrf.mxu2 }
 0x368   :  { %3993 = vmatpush.bf16.msrb.mxu3 %v6290_v13  ;;  %v4067_v13 = vrot.slane %v3746_v0, 6  ;;  %v3706_v56 = vadd.f32 %v3705_v10, %v7688_v28 }
 0x36a   :  { %v3720_v30 = vadd.f32 %v3719_v54, %v3706_v56  ;;  %v7765_v17 = vsel %vm4078_vm8, %v7695_v40, %v4067_v13  ;;  %v7769_v42 = vsel %vm4082_vm9, %v7699_v12, %v4067_v13  ;;  %v7773_v28 = vsel %vm4092_vm10, %v7703_v25, %v4067_v13 }
 0x36b   :  { %3980 = vmatpush.bf16.msrb.mxu2 %v6074_v5  ;;  %8595 = vst [vmem:[#allocation129_spill] sm:$0xff] %v7769_v42  ;;  %v7777_v39 = vsel %vm4099_vm12, %v7708_v22, %v4067_v13  ;;  %v7781_v5 = vsel %vm8479_vm14, %v7712_v31, %v4067_v13  ;;  %v7785_v40 = vsel %vm4121_vm11, %v4067_v13, %v7716_v35 }
 0x36c   :  { %3994 = vmatpush.bf16.msrb.mxu3 %v6266_v58  ;;  %v7789_v12 = vsel %vm4103_vm13, %v7720_v1, %v4067_v13  ;;  %v3734_v25 = vadd.f32 %v3733_v34, %v3720_v30  ;;  %v7793_v26 = vsel %vm8480_vm15, %v4067_v13, %v7724_v45  ;;  %v4188_v22 = vsel %vm4119_vm3, %v7726_v33, %v7674_v59 }
 0x36d   :  { %8596 = vst [vmem:[#allocation130_spill] sm:$0xff] %v7789_v12 }
 0x36e   :  { %8597 = vst [vmem:[#allocation131_spill] sm:$0xff] %v7793_v26  ;;  %v3748_v31 = vadd.f32 %v3747_v3, %v3734_v25  ;;  %v8621_v25 = vld [vmem:[#allocation45_spill] sm:$0xff] }
 0x36f   :  { %3981 = vmatpush.bf16.msrb.mxu2 %v6050_v27 }
 0x370   :  { %3995 = vmatpush.bf16.msrb.mxu3 %v6242_v18  ;;  %v4072_v35 = vrot.slane %v3748_v31, 6 }
 0x372   :  { %3982 = vmatmul.bf16.vlgmr.msrb.gmra.mxu2 %v7558_v15  ;;  %v7802_v57 = vsel %vm4082_vm9, %v7733_v7, %v4072_v35  ;;  %v7806_v1 = vsel %vm4099_vm12, %v7738_v55, %v4072_v35  ;;  %v7810_v45 = vsel %vm4078_vm8, %v7743_v43, %v4072_v35  ;;  %v7814_v59 = vsel %vm4103_vm13, %v7748_v19, %v4072_v35  ;;  %v7826_v55 = vpop.f32.mrf.mxu1 }
 0x373   :  { %3996 = vmatmul.bf16.vlgmr.msrb.gmra.mxu3 %v7560_v11  ;;  %8598 = vst [vmem:[#allocation132_spill] sm:$0xff] %v7802_v57  ;;  %v7818_v15 = vsel %vm8479_vm14, %v7753_v8, %v4072_v35  ;;  %v7820_v11 = vpop.f32.mrf.mxu0  ;;  %v7829_v43 = vsel %vm4092_vm10, %v4170_v46, %v4072_v35  ;;  %v7832_v8 = vsel %vm8480_vm15, %v4072_v35, %v4182_v53  ;;  %v4002_v53 = vunpack.c.l.bf16 %v1734_v62 }
 0x374   :  { %8599 = vst [vmem:[#allocation133_spill] sm:$0xff] %v7806_v1  ;;  %v7835_v18 = vsel %vm4121_vm11, %v4072_v35, %v4188_v22  ;;  %v4005_v1 = vunpack.c.h.bf16 %v1735_v61  ;;  %vm4084_vm14 = vcmask 1042432   ;;  %vm4123_vm15 = vcmask 1046532  }
 0x375   :  { %8600 = vst [vmem:[#allocation134_spill] sm:$0xff] %v7810_v45  ;;  %v7822_v33 = vpop.f32.mrf.mxu2  ;;  %v1736_v45 = vld [vmem:[#allocation4 + $0x10] sm:$0xff] }
 0x376   :  { %8601 = vst [vmem:[#allocation135_spill] sm:$0xff] %v7814_v59  ;;  %v7824_v7 = vpop.f32.mrf.mxu3  ;;  %v4006_v49 = vunpack.c.l.bf16 %v1736_v45 }
 0x377   :  { %8602 = vst [vmem:[#allocation136_spill] sm:$0xff] %v7818_v15  ;;  %v8622_v15 = vld [vmem:[#allocation65_spill] sm:$0xff] }
 0x378   :  { %8603 = vst [vmem:[#allocation137_spill] sm:$0xff] %v7829_v43  ;;  %v4003_v43 = vunpack.c.h.bf16 %v1734_v62 }
 0x379   :  { %8604 = vst [vmem:[#allocation138_spill] sm:$0xff] %v7832_v8  ;;  %v8624_v8 = vld [vmem:[#allocation57_spill] sm:$0xff] }
 0x37a   :  { %v3803_v37 = vpop.f32.mrf.mxu1  ;;  %8605 = vst [vmem:[#allocation139_spill] sm:$0xff] %v7835_v18 }
 0x37b   :  { %v3789_v58 = vpop.f32.mrf.mxu0 }
 0x37d   :  { %v3761_v44 = vpop.f32.mrf.mxu2 }
 0x37e   :  { %v3775_v4 = vpop.f32.mrf.mxu3 }
 0x37f   :  { %v3776_v19 = vadd.f32 %v3775_v4, %v3761_v44  ;;  %v7885_v4 = vld [vmem:[#allocation13] sm:$0x3f]  ;;  %v1376_v44 = vadd.f32 %v8622_v15, %v8621_v25 }
 0x380   :  { %v4018_v62 = vperm.slane %v7885_v4, 2  ;;  %v4019_v15 = vperm.slane %v7885_v4, 3  ;;  %v4020_v26 = vperm.slane %v7885_v4, 4 }
 0x381   :  { %v3790_v27 = vadd.f32 %v3789_v58, %v3776_v19  ;;  %v8614_v58 = vld [vmem:[#allocation49_spill] sm:$0xff]  ;;  %v8617_v19 = vld [vmem:[#allocation52_spill] sm:$0xff] }
 0x382   :  { %v7850_v35 = vpop.f32.mrf.mxu1  ;;  %v4030_v9 = vmul.f32 %v4018_v62, %v4004_v52  ;;  %v4031_v59 = vmul.f32 %v4019_v15, %v4005_v1  ;;  %v4032_v47 = vmul.f32 %v4020_v26, %v4006_v49  ;;  %v1738_v1 = vld [vmem:[#allocation4 + $0x20] sm:$0xff]  ;;  %v1739_v52 = vld [vmem:[#allocation4 + $0x28] sm:$0xff] }
 0x383   :  { %v3804_v0 = vadd.f32 %v3803_v37, %v3790_v27  ;;  %v7843_v30 = vpop.f32.mrf.mxu0  ;;  %v4016_v27 = vperm.slane %v7885_v4, 0  ;;  %v4010_v31 = vunpack.c.l.bf16 %v1738_v1 }
 0x385   :  { %v4028_v23 = vmul.f32 %v4016_v27, %v4002_v53  ;;  %v7909_v53 = vadd.f32 %v8629_v38, %v1376_v44  ;;  %v1737_v38 = vld [vmem:[#allocation4 + $0x18] sm:$0xff]  ;;  %v4007_v44 = vunpack.c.h.bf16 %v1736_v45  ;;  %v4036_v42 = vmul.f32 %v4018_v62, %v4010_v31 }
 0x386   :  { %v4008_v57 = vunpack.c.l.bf16 %v1737_v38  ;;  %v8646_v31 = vld [vmem:[#allocation83_spill] sm:$0xff] }
 0x387   :  { %8630 = vst [vmem:[#allocation47_spill] sm:$0xff] %v7909_v53  ;;  %v8653_v53 = vld [vmem:[#allocation84_spill] sm:$0xff] }
 0x38a   :  { %v7896_v37 = vpop.f32.mrf.mxu1 }
 0x38b   :  { %v7876_v18 = vpop.f32.mrf.mxu0 }
 0x395   :  { %v7837_v10 = vpop.f32.mrf.mxu2 }
 0x396   :  { %v7839_v13 = vpop.f32.mrf.mxu3 }
 0x399   :  { %v7918_v51 = vpop.f32.mrf.mxu0 }
 0x39d   :  { %v3817_v56 = vpop.f32.mrf.mxu2 }
 0x39e   :  { %v3818_v54 = vadd.f32 %v3817_v56, %v3804_v0  ;;  %v3831_v46 = vpop.f32.mrf.mxu3  ;;  %v4017_v0 = vperm.slane %v7885_v4, 1  ;;  %v8618_v56 = vld [vmem:[#allocation53_spill] sm:$0xff] }
 0x3a0   :  { %v7841_v34 = vadd.f32 %v3831_v46, %v3818_v54  ;;  %v4029_v32 = vmul.f32 %v4017_v0, %v4003_v43  ;;  %v8631_v43 = vld [vmem:[#allocation70_spill] sm:$0xff]  ;;  %v8641_v46 = vld [vmem:[#allocation71_spill] sm:$0xff] }
 0x3a1   :  { %v1381_v21 = vadd.f32 %v8631_v43, %v8621_v25  ;;  %v4021_v43 = vperm.slane %v7885_v4, 5 }
 0x3a2   :  { %v4040_v20 = vadd.f32 %v4029_v32, %v4028_v23  ;;  %v4009_v23 = vunpack.c.h.bf16 %v1737_v38  ;;  %v4011_v38 = vunpack.c.h.bf16 %v1738_v1  ;;  %v8649_v1 = vld [vmem:[#allocation91_spill] sm:$0xff] }
 0x3a3   :  { %v7922_v36 = vadd.f32 %v8636_v29, %v1381_v21  ;;  %v4033_v32 = vmul.f32 %v4021_v43, %v4007_v44  ;;  %v4034_v21 = vmul.f32 %v4016_v27, %v4008_v57  ;;  %v3774_v57 = vadd.f32 %v7824_v7, %v7822_v33  ;;  %v8684_v33 = vld [vmem:[#allocation119_spill] sm:$0xff] }
 0x3a4   :  { %v4041_v61 = vadd.f32 %v4040_v20, %v4030_v9  ;;  %v8638_v9 = vld [vmem:[#allocation75_spill] sm:$0xff]  ;;  %v4012_v27 = vunpack.c.l.bf16 %v1739_v52 }
 0x3a5   :  { %8637 = vst [vmem:[#allocation49_spill] sm:$0xff] %v7922_v36  ;;  %v1386_v20 = vadd.f32 %v8638_v9, %v8621_v25  ;;  %v3858_v9 = vadd.f32 %v7850_v35, %v7843_v30  ;;  %v4037_v30 = vmul.f32 %v4019_v15, %v4011_v38  ;;  %v8691_v36 = vld [vmem:[#allocation111_spill] sm:$0xff] }
 0x3a6   :  { %v4042_v50 = vadd.f32 %v4041_v61, %v4031_v59  ;;  %v7929_v59 = vpop.f32.mrf.mxu1  ;;  %v4035_v61 = vmul.f32 %v4017_v0, %v4009_v23  ;;  %v3860_v23 = vadd.f32 %v7896_v37, %v7876_v18  ;;  %v3901_v0 = vpop.f32.mrf.mxu0  ;;  %v3788_v37 = vadd.f32 %v7820_v11, %v3774_v57  ;;  %v8669_v57 = vld [vmem:[#allocation89_spill] sm:$0xff]  ;;  %v8693_v15 = vld [vmem:[#allocation115_spill] sm:$0xff] }
 0x3a8   :  { %v4043_v54 = vadd.f32 %v4042_v50, %v4032_v47  ;;  %v8642_v50 = vld [vmem:[#allocation77_spill] sm:$0xff]  ;;  %v4047_v49 = vadd.f32 %v4035_v61, %v4034_v21  ;;  %v4038_v47 = vmul.f32 %v4020_v26, %v4012_v27  ;;  %v8674_v26 = vld [vmem:[#allocation104_spill] sm:$0xff] }
 0x3a9   :  { %v7936_v44 = vadd.f32 %v8642_v50, %v1386_v20  ;;  %v8648_v20 = vld [vmem:[#allocation87_spill] sm:$0xff]  ;;  %v4013_v50 = vunpack.c.h.bf16 %v1739_v52 }
 0x3aa   :  { %v4044_v12 = vadd.f32 %v4043_v54, %v4033_v32  ;;  %v8647_v54 = vld [vmem:[#allocation88_spill] sm:$0xff]  ;;  %v4048_v32 = vadd.f32 %v4047_v49, %v4036_v42  ;;  %v1454_v21 = vadd.f32 %v8649_v1, %v8648_v20  ;;  %v8654_v42 = vld [vmem:[#allocation94_spill] sm:$0xff] }
 0x3ab   :  { %8643 = vst [vmem:[#allocation52_spill] sm:$0xff] %v7936_v44  ;;  %v1552_v62 = vadd.f32 %v8647_v54, %v8646_v31  ;;  %v8652_v54 = vld [vmem:[#allocation48_spill] sm:$0xff]  ;;  %v1557_v18 = vadd.f32 %v8654_v42, %v8646_v31 }
 0x3ac   :  { %4045 = vadd.xlane.f32.xlu0 %v4044_v12  ;;  %v4049_v4 = vadd.f32 %v4048_v32, %v4037_v30  ;;  %v1293_v35 = vadd.f32 %v8653_v53, %v8652_v54  ;;  %v8657_v30 = vld [vmem:[#allocation80_spill] sm:$0xff]  ;;  %v8659_v53 = vld [vmem:[#allocation90_spill] sm:$0xff] }
 0x3ad   :  { %v7962_v32 = vadd.f32 %v8657_v30, %v8621_v25  ;;  %v7965_v54 = vadd.f32 %v8659_v53, %v1552_v62  ;;  %v8660_v42 = vld [vmem:[#allocation92_spill] sm:$0xff]  ;;  %v8664_v25 = vld [vmem:[#allocation85_spill] sm:$0xff] }
 0x3ae   :  { %v4050_v7 = vadd.f32 %v4049_v4, %v4038_v47  ;;  %v7968_v38 = vadd.f32 %v8660_v42, %v1454_v21  ;;  %v3915_v47 = vpop.f32.mrf.mxu1  ;;  %v7977_v30 = vadd.f32 %v8664_v25, %v1293_v35  ;;  %v8666_v62 = vld [vmem:[#allocation96_spill] sm:$0xff] }
 0x3af   :  { %8658 = vst [vmem:[#allocation53_spill] sm:$0xff] %v7962_v32  ;;  %v7980_v53 = vadd.f32 %v8666_v62, %v1557_v18  ;;  %v8667_v21 = vld [vmem:[#allocation108_spill] sm:$0xff]  ;;  %v8671_v18 = vld [vmem:[#allocation113_spill] sm:$0xff] }
 0x3b0   :  { %8665 = vst [vmem:[#allocation45_spill] sm:$0xff] %v7977_v30  ;;  %v1469_v42 = vadd.f32 %v8667_v21, %v8648_v20  ;;  %v8672_v62 = vld [vmem:[#allocation93_spill] sm:$0xff] }
 0x3b5   :  { %v7887_v22 = vpop.f32.mrf.mxu2 }
 0x3b6   :  { %v7898_v3 = vpop.f32.mrf.mxu3  ;;  %v3872_v61 = vadd.f32 %v7887_v22, %v3858_v9  ;;  %v4039_v22 = vmul.f32 %v4021_v43, %v4013_v50  ;;  %v8656_v9 = vld [vmem:[#allocation97_spill] sm:$0xff]  ;;  %v8662_v50 = vld [vmem:[#allocation100_spill] sm:$0xff]  ;;  %v8681_v43 = vld [vmem:[#allocation114_spill] sm:$0xff] }
 0x3b7   :  { %v1459_v27 = vadd.f32 %v8656_v9, %v8648_v20  ;;  %v1562_v9 = vadd.f32 %v8662_v50, %v8646_v31  ;;  %v8670_v50 = vld [vmem:[#allocation98_spill] sm:$0xff] }
 0x3b8   :  { %v3886_v11 = vadd.f32 %v7898_v3, %v3872_v61  ;;  %v3802_v3 = vadd.f32 %v7826_v55, %v3788_v37  ;;  %v8668_v61 = vld [vmem:[#allocation86_spill] sm:$0xff]  ;;  %v8679_v55 = vld [vmem:[#allocation99_spill] sm:$0xff] }
 0x3b9   :  { %v7988_v32 = vadd.f32 %v8670_v50, %v1459_v27  ;;  %v8673_v37 = vld [vmem:[#allocation102_spill] sm:$0xff] }
 0x3ba   :  { %v3900_v25 = vadd.f32 %v7918_v51, %v3886_v11  ;;  %v7997_v21 = vadd.f32 %v8673_v37, %v1562_v9  ;;  %v3816_v51 = vadd.f32 %v7837_v10, %v3802_v3  ;;  %v8678_v9 = vld [vmem:[#allocation123_spill] sm:$0xff]  ;;  %v8694_v3 = vld [vmem:[#allocation116_spill] sm:$0xff] }
 0x3bb   :  { %v1484_v37 = vadd.f32 %v8678_v9, %v8648_v20  ;;  %v8687_v9 = vld [vmem:[#allocation107_spill] sm:$0xff] }
 0x3bc   :  { %v3914_v35 = vadd.f32 %v7929_v59, %v3900_v25  ;;  %v3830_v59 = vadd.f32 %v7839_v13, %v3816_v51  ;;  %v4073_v13 = vrot.slane %v7841_v34, 5 }
 0x3bd   :  { %v3873_v60 = vpop.f32.mrf.mxu2 }
 0x3be   :  { %v3887_v29 = vpop.f32.mrf.mxu3  ;;  %v3874_v1 = vadd.f32 %v3873_v60, %v3860_v23  ;;  %v8663_v60 = vld [vmem:[#allocation103_spill] sm:$0xff]  ;;  %v4051_v23 = vadd.f32 %v4050_v7, %v4039_v22  ;;  %v1474_v22 = vadd.f32 %v8671_v18, %v8648_v20  ;;  %v8677_v7 = vld [vmem:[#allocation109_spill] sm:$0xff] }
 0x3bf   :  { %v1464_v4 = vadd.f32 %v8663_v60, %v8648_v20  ;;  %v8007_v18 = vadd.f32 %v8677_v7, %v1469_v42  ;;  %v8689_v7 = vld [vmem:[#allocation124_spill] sm:$0xff] }
 0x3c0   :  { %v3888_v60 = vadd.f32 %v3887_v29, %v3874_v1  ;;  %4052 = vadd.xlane.f32.xlu0 %v4051_v23  ;;  %v8675_v29 = vld [vmem:[#allocation118_spill] sm:$0xff]  ;;  %v3955_v1 = vpop.f32.mrf.mxu0  ;;  %v8676_v23 = vld [vmem:[#allocation95_spill] sm:$0xff]  ;;  %v8016_v50 = vadd.f32 %v8681_v43, %v1474_v22  ;;  %v8031_v52 = vadd.f32 %v8689_v7, %v1484_v37 }
 0x3c1   :  { %v8000_v31 = vadd.f32 %v8674_v26, %v1464_v4  ;;  %v1479_v27 = vadd.f32 %v8675_v29, %v8648_v20  ;;  %v8680_v29 = vld [vmem:[#allocation101_spill] sm:$0xff] }
 0x3c2   :  { %v3902_v26 = vadd.f32 %v3901_v0, %v3888_v60  ;;  %8682 = vst [vmem:[#allocation65_spill] sm:$0xff] %v8016_v50  ;;  %v3969_v0 = vpop.f32.mrf.mxu1  ;;  %v4069_v60 = vrot.slane %v3914_v35, 4 }
 0x3c3   :  { %v8023_v20 = vadd.f32 %v8684_v33, %v1479_v27  ;;  %8690 = vst [vmem:[#allocation57_spill] sm:$0xff] %v8031_v52 }
 0x3c4   :  { %v3916_v10 = vadd.f32 %v3915_v47, %v3902_v26 }
 0x3c5   :  { %8685 = vst [vmem:[#allocation56_spill] sm:$0xff] %v8023_v20 }
 0x3c6   :  { %v4074_v44 = vrot.slane %v3916_v10, 4 }
 0x3c8   :  { %v3957_v27 = vpop.f32.mrf.mxu0  ;;  %v8072_v45 = vsel %vm8484_vm7, %v4073_v13, %v4074_v44 }
 0x3c9   :  { %8702 = vst [vmem:[#allocation70_spill] sm:$0xff] %v8072_v45 }
 0x3ca   :  { %v3971_v34 = vpop.f32.mrf.mxu1 }
 0x3d5   :  { %v3927_v49 = vpop.f32.mrf.mxu2 }
 0x3d6   :  { %v3941_v12 = vpop.f32.mrf.mxu3 }
 0x3d7   :  { %v3942_v4 = vadd.f32 %v3941_v12, %v3927_v49 }
 0x3d9   :  { %v3956_v11 = vadd.f32 %v3955_v1, %v3942_v4  ;;  %v4068_v1 = vrot.slane %v3830_v59, 5 }
 0x3db   :  { %v3970_v35 = vadd.f32 %v3969_v0, %v3956_v11  ;;  %v4081_v37 = vsel %vm4080_vm1, %v4068_v1, %v4069_v60  ;;  %v4102_v59 = vsel %vm8481_vm6, %v4068_v1, %v4069_v60  ;;  %v4091_v11 = vsel %vm8485_vm2, %v4068_v1, %v4069_v60 }
 0x3dc   :  { %v8053_v0 = vsel %vm4097_vm4, %v4068_v1, %v4069_v60  ;;  %v8056_v50 = vsel %vm8484_vm7, %v4068_v1, %v4069_v60  ;;  %v8063_v33 = vsel %vm4086_vm5, %v4068_v1, %v4069_v60  ;;  %vm4114_vm7 = vcmask 1045507  }
 0x3dd   :  { %v3929_v42 = vpop.f32.mrf.mxu2 }
 0x3de   :  { %v3943_v12 = vpop.f32.mrf.mxu3 }
 0x3df   :  { %v3944_v26 = vadd.f32 %v3943_v12, %v3929_v42  ;;  %v4128_v42 = vsel %vm4076_vm0, %v4068_v1, %v4069_v60  ;;  %v4120_v12 = vsel %vm4119_vm3, %v4069_v60, %v4068_v1  ;;  %v8080_v60 = vsel %vm4086_vm5, %v4073_v13, %v4074_v44 }
 0x3e0   :  { %8704 = vst [vmem:[#allocation75_spill] sm:$0xff] %v8080_v60  ;;  %v8083_v1 = vsel %vm4097_vm4, %v4073_v13, %v4074_v44 }
 0x3e1   :  { %v3958_v10 = vadd.f32 %v3957_v27, %v3944_v26  ;;  %v8066_v27 = vsel %vm4080_vm1, %v4073_v13, %v4074_v44  ;;  %v8069_v26 = vsel %vm8485_vm2, %v4073_v13, %v4074_v44  ;;  %8705 = vst [vmem:[#allocation71_spill] sm:$0xff] %v8083_v1  ;;  %vm4130_vm2 = vcmask 1044480  }
 0x3e2   :  { %8701 = vst [vmem:[#allocation67_spill] sm:$0xff] %v8069_v26 }
 0x3f5   :  { %v3983_v51 = vpop.f32.mrf.mxu2 }
 0x3f6   :  { %v3984_v25 = vadd.f32 %v3983_v51, %v3970_v35  ;;  %v3997_v47 = vpop.f32.mrf.mxu3  ;;  %v4178_v51 = vsel %vm4076_vm0, %v4073_v13, %v4074_v44  ;;  %v8060_v35 = vsel %vm8481_vm6, %v4073_v13, %v4074_v44  ;;  %vm4105_vm0 = vcmask 1044482  }
 0x3f7   :  { %vm4094_vm6 = vcmask 1043457  }
 0x3f8   :  { %v3998_v22 = vadd.f32 %v3997_v47, %v3984_v25  ;;  %v8077_v25 = vsel %vm4119_vm3, %v4074_v44, %v4073_v13  ;;  %v3972_v47 = vadd.f32 %v3971_v34, %v3958_v10  ;;  %vm4144_vm3 = vcmask 1046530  }
 0x3f9   :  { %8703 = vst [vmem:[#allocation72_spill] sm:$0xff] %v8077_v25 }
 0x3fa   :  { %v8074_v30 = vrot.slane %v3998_v22, 3 }
 0x3fc   :  { %v4083_v43 = vsel %vm4082_vm9, %v4081_v37, %v8074_v30  ;;  %v8089_v22 = vsel %vm4078_vm8, %v4128_v42, %v8074_v30  ;;  %v4122_v7 = vsel %vm4121_vm11, %v8074_v30, %v4120_v12  ;;  %v4104_v10 = vsel %vm4103_vm13, %v4102_v59, %v8074_v30 }
 0x3fd   :  { %v3985_v34 = vpop.f32.mrf.mxu2  ;;  %v4085_v49 = vsel %vm4084_vm14, %v7765_v17, %v4083_v43  ;;  %v4124_v44 = vsel %vm4123_vm15, %v7773_v28, %v4122_v7  ;;  %v4106_v13 = vsel %vm4105_vm0, %v7777_v39, %v4104_v10  ;;  %v4093_v37 = vsel %vm4092_vm10, %v4091_v11, %v8074_v30 }
 0x3fe   :  { %v3986_v42 = vadd.f32 %v3985_v34, %v3972_v47  ;;  %v4194_v20 = vperm.slane %v4085_v49, 0  ;;  %v4195_v1 = vperm.slane %v4085_v49, 1  ;;  %v4196_v12 = vperm.slane %v4085_v49, 2  ;;  %v3999_v60 = vpop.f32.mrf.mxu3 }
 0x3ff   :  { %v4197_v25 = vperm.slane %v4085_v49, 3  ;;  %v4198_v59 = vperm.slane %v4085_v49, 4  ;;  %v4199_v4 = vperm.slane %v4085_v49, 5  ;;  %v4125_v52 = vrot.slane %v4124_v44, 4 }
 0x400   :  { %v4000_v45 = vadd.f32 %v3999_v60, %v3986_v42  ;;  %v8706_v17 = vmax.f32 %v7255_v24, 0.0  ;;  %v8707_v28 = vmax.f32 %v7245_v16, 0.0  ;;  %v8708_v39 = vmax.f32 %v8614_v58, 0.0 }
 0x401   :  { %v8709_v11 = vmax.f32 %v8613_v2, 0.0  ;;  %v8710_v34 = vmax.f32 %v8669_v57, 0.0  ;;  %v8711_v49 = vmax.f32 %v8668_v61, 0.0  ;;  %v4218_v60 = vperm.slane %v4125_v52, 0 }
 0x402   :  { %v4386_v43 = vmul.f32 %v4194_v20, %v8706_v17  ;;  %v4387_v7 = vmul.f32 %v4195_v1, %v8707_v28  ;;  %v4388_v10 = vmul.f32 %v4196_v12, %v8708_v39  ;;  %v8115_v24 = vrot.slane %v4000_v45, 3 }
 0x403   :  { %v4389_v47 = vmul.f32 %v4197_v25, %v8709_v11  ;;  %v4390_v26 = vmul.f32 %v4198_v59, %v8710_v34  ;;  %v4391_v44 = vmul.f32 %v4199_v4, %v8711_v49  ;;  %v4219_v20 = vperm.slane %v4125_v52, 1 }
 0x404   :  { %v4482_v16 = vadd.f32 %v4387_v7, %v4386_v43  ;;  %v4220_v1 = vperm.slane %v4125_v52, 2  ;;  %v4221_v58 = vperm.slane %v4125_v52, 3  ;;  %v4222_v42 = vperm.slane %v4125_v52, 4 }
 0x405   :  { %v4223_v12 = vperm.slane %v4125_v52, 5  ;;  %v8712_v2 = vmax.f32 %v7287_v6, 0.0  ;;  %v8121_v57 = vsel %vm4078_vm8, %v4178_v51, %v8115_v24  ;;  %v8713_v4 = vmax.f32 %v7280_v63, 0.0 }
 0x406   :  { %v4483_v61 = vadd.f32 %v4482_v16, %v4388_v10  ;;  %v8714_v45 = vmax.f32 %v8624_v8, 0.0  ;;  %v8715_v43 = vmax.f32 %v8623_v14, 0.0  ;;  %v8716_v7 = vmax.f32 %v8680_v29, 0.0 }
 0x407   :  { %v4410_v25 = vmul.f32 %v4218_v60, %v8712_v2  ;;  %v4411_v59 = vmul.f32 %v4219_v20, %v8713_v4  ;;  %v8717_v6 = vmax.f32 %v8679_v55, 0.0  ;;  %v4107_v11 = vrot.slane %v4106_v13, 2 }
 0x408   :  { %v4412_v17 = vmul.f32 %v4220_v1, %v8714_v45  ;;  %v4413_v28 = vmul.f32 %v4221_v58, %v8715_v43  ;;  %v4414_v52 = vmul.f32 %v4222_v42, %v8716_v7  ;;  %v4484_v34 = vadd.f32 %v4483_v61, %v4389_v47 }
 0x409   :  { %v4415_v39 = vmul.f32 %v4223_v12, %v8717_v6  ;;  %v4510_v51 = vadd.f32 %v4411_v59, %v4410_v25  ;;  %v4095_v10 = vsel %vm4094_vm6, %v7781_v5, %v4093_v37  ;;  %v4143_v63 = vsel %vm4099_vm12, %v8053_v0, %v8074_v30 }
 0x40a   :  { %v4206_v8 = vperm.slane %v4107_v11, 0  ;;  %v4207_v49 = vperm.slane %v4107_v11, 1  ;;  %v4208_v14 = vperm.slane %v4107_v11, 2  ;;  %v4209_v60 = vperm.slane %v4107_v11, 3 }
 0x40b   :  { %v4485_v16 = vadd.f32 %v4484_v34, %v4390_v26  ;;  %v4511_v29 = vadd.f32 %v4510_v51, %v4412_v17  ;;  %v4210_v20 = vperm.slane %v4107_v11, 4  ;;  %v4211_v1 = vperm.slane %v4107_v11, 5 }
 0x40c   :  { %v8718_v55 = vmax.f32 %v7271_v48, 0.0  ;;  %v8719_v47 = vmax.f32 %v7264_v41, 0.0  ;;  %v8720_v5 = vmax.f32 %v8618_v56, 0.0  ;;  %v8721_v42 = vmax.f32 %v8617_v19, 0.0 }
 0x40d   :  { %v4486_v12 = vadd.f32 %v4485_v16, %v4391_v44  ;;  %v4512_v2 = vadd.f32 %v4511_v29, %v4413_v28  ;;  %v8722_v25 = vmax.f32 %v8676_v23, 0.0  ;;  %v8723_v61 = vmax.f32 %v8672_v62, 0.0  ;;  %v8725_v44 = vld [vmem:[#allocation129_spill] sm:$0xff]  ;;  %v8726_v23 = vld [vmem:[#allocation130_spill] sm:$0xff] }
 0x40e   :  { %v4398_v13 = vmul.f32 %v4206_v8, %v8718_v55  ;;  %v4399_v58 = vmul.f32 %v4207_v49, %v8719_v47  ;;  %v4400_v37 = vmul.f32 %v4208_v14, %v8720_v5  ;;  %v4401_v0 = vmul.f32 %v4209_v60, %v8721_v42  ;;  %v8729_v8 = vld [vmem:[#allocation20_spill] sm:$0xff]  ;;  %v8731_v60 = vld [vmem:[#allocation51_spill] sm:$0xff] }
 0x40f   :  { %v4402_v26 = vmul.f32 %v4210_v20, %v8722_v25  ;;  %v4403_v4 = vmul.f32 %v4211_v1, %v8723_v61  ;;  %v4096_v48 = vrot.slane %v4095_v10, 1  ;;  %v4145_v41 = vsel %vm4144_vm3, %v4143_v63, %v7785_v40  ;;  %4487 = vadd.xlane.f32.xlu1 %v4486_v12  ;;  %v8737_v61 = vld [vmem:[#allocation29_spill] sm:$0xff] }
 0x410   :  { %v4496_v59 = vadd.f32 %v4399_v58, %v4398_v13  ;;  %vm8724_vm8 = vcmask 1045504   ;;  %v4513_v19 = vadd.f32 %v4512_v2, %v4414_v52  ;;  %v4146_v45 = vrot.slane %v4145_v41, 7 }
 0x411   :  { %v4113_v56 = vsel %vm8724_vm8, %v8074_v30, %v8056_v50  ;;  %v4131_v62 = vsel %vm4130_vm2, %v8089_v22, %v8726_v23  ;;  %v4200_v28 = vperm.slane %v4096_v48, 0  ;;  %v4201_v7 = vperm.slane %v4096_v48, 1  ;;  %v8727_v50 = vld [vmem:[#allocation21_spill] sm:$0xff]  ;;  %v8733_v22 = vld [vmem:[#allocation50_spill] sm:$0xff]  ;;  %v8741_v23 = vld [vmem:[#allocation63_spill] sm:$0xff] }
 0x412   :  { %v4115_v17 = vsel %vm4114_vm7, %v8725_v44, %v4113_v56  ;;  %v4497_v43 = vadd.f32 %v4496_v59, %v4400_v37  ;;  %v4202_v6 = vperm.slane %v4096_v48, 2  ;;  %v4514_v11 = vadd.f32 %v4513_v19, %v4415_v39  ;;  %v8739_v19 = vld [vmem:[#allocation28_spill] sm:$0xff] }
 0x413   :  { %v4203_v40 = vperm.slane %v4096_v48, 3  ;;  %v4204_v34 = vperm.slane %v4096_v48, 4  ;;  %v4205_v51 = vperm.slane %v4096_v48, 5  ;;  %v8728_v63 = vmax.f32 %v8727_v50, 0.0 }
 0x414   :  { %v4498_v10 = vadd.f32 %v4497_v43, %v4401_v0  ;;  %v8730_v49 = vmax.f32 %v8729_v8, 0.0  ;;  %v8732_v16 = vmax.f32 %v8731_v60, 0.0  ;;  %4515 = vadd.xlane.f32.xlu0 %v4514_v11  ;;  %v8734_v20 = vmax.f32 %v8733_v22, 0.0 }
 0x415   :  { %v4392_v52 = vmul.f32 %v4200_v28, %v8728_v63  ;;  %v8735_v55 = vmax.f32 %v7968_v38, 0.0  ;;  %v8736_v13 = vmax.f32 %v7965_v54, 0.0  ;;  %v4236_v58 = vperm.slane %v4146_v45, 0  ;;  %v8743_v28 = vld [vmem:[#allocation62_spill] sm:$0xff] }
 0x416   :  { %v4393_v14 = vmul.f32 %v4201_v7, %v8730_v49  ;;  %v4394_v29 = vmul.f32 %v4202_v6, %v8732_v16  ;;  %v4395_v1 = vmul.f32 %v4203_v40, %v8734_v20  ;;  %v4499_v5 = vadd.f32 %v4498_v10, %v4402_v26 }
 0x417   :  { %v4396_v39 = vmul.f32 %v4204_v34, %v8735_v55  ;;  %v4397_v47 = vmul.f32 %v4205_v51, %v8736_v13  ;;  %v4237_v42 = vperm.slane %v4146_v45, 1  ;;  %v4238_v0 = vperm.slane %v4146_v45, 2  ;;  %v8751_v55 = vld [vmem:[#allocation55_spill] sm:$0xff] }
 0x418   :  { %v4489_v37 = vadd.f32 %v4393_v14, %v4392_v52  ;;  %v4239_v12 = vperm.slane %v4146_v45, 3  ;;  %v4240_v2 = vperm.slane %v4146_v45, 4  ;;  %v4241_v25 = vperm.slane %v4146_v45, 5 }
 0x419   :  { %v8738_v59 = vmax.f32 %v8737_v61, 0.0  ;;  %v4500_v41 = vadd.f32 %v4499_v5, %v4403_v4  ;;  %v8740_v44 = vmax.f32 %v8739_v19, 0.0  ;;  %v8742_v43 = vmax.f32 %v8741_v23, 0.0  ;;  %v8757_v23 = vld [vmem:[#allocation25_spill] sm:$0xff] }
 0x41a   :  { %v4490_v56 = vadd.f32 %v4489_v37, %v4394_v29  ;;  %v8744_v7 = vmax.f32 %v8743_v28, 0.0  ;;  %v8745_v6 = vmax.f32 %v8007_v18, 0.0  ;;  %v8746_v40 = vmax.f32 %v8687_v9, 0.0  ;;  %v8747_v29 = vld [vmem:[#allocation23_spill] sm:$0xff] }
 0x41b   :  { %v4428_v48 = vmul.f32 %v4236_v58, %v8738_v59  ;;  %v4429_v38 = vmul.f32 %v4237_v42, %v8740_v44  ;;  %v4430_v54 = vmul.f32 %v4238_v0, %v8742_v43  ;;  %v4116_v34 = vrot.slane %v4115_v17, 3  ;;  %4501 = vadd.xlane.f32.xlu2 %v4500_v41  ;;  %v8749_v17 = vld [vmem:[#allocation22_spill] sm:$0xff] }
 0x41c   :  { %v4431_v26 = vmul.f32 %v4239_v12, %v8744_v7  ;;  %v4432_v11 = vmul.f32 %v4240_v2, %v8745_v6  ;;  %v4433_v45 = vmul.f32 %v4241_v25, %v8746_v40  ;;  %v4491_v51 = vadd.f32 %v4490_v56, %v4395_v1  ;;  %v8753_v58 = vld [vmem:[#allocation54_spill] sm:$0xff]  ;;  %v8761_v7 = vld [vmem:[#allocation59_spill] sm:$0xff] }
 0x41d   :  { %v4531_v4 = vadd.f32 %v4429_v38, %v4428_v48  ;;  %v4132_v10 = vrot.slane %v4131_v62, 5  ;;  %v4161_v50 = vsel %vm4103_vm13, %v8060_v35, %v8115_v24  ;;  %v4212_v63 = vperm.slane %v4116_v34, 0  ;;  %v8763_v40 = vld [vmem:[#allocation58_spill] sm:$0xff] }
 0x41e   :  { %v4213_v52 = vperm.slane %v4116_v34, 1  ;;  %v4214_v8 = vperm.slane %v4116_v34, 2  ;;  %v4215_v49 = vperm.slane %v4116_v34, 3  ;;  %v4492_v14 = vadd.f32 %v4491_v51, %v4396_v39 }
 0x41f   :  { %v4532_v60 = vadd.f32 %v4531_v4, %v4430_v54  ;;  %v4216_v18 = vperm.slane %v4116_v34, 4  ;;  %v4217_v16 = vperm.slane %v4116_v34, 5  ;;  %v8748_v9 = vmax.f32 %v8747_v29, 0.0  ;;  %v8759_v54 = vld [vmem:[#allocation24_spill] sm:$0xff] }
 0x420   :  { %v8750_v20 = vmax.f32 %v8749_v17, 0.0  ;;  %v8752_v62 = vmax.f32 %v8751_v55, 0.0  ;;  %v8754_v5 = vmax.f32 %v8753_v58, 0.0  ;;  %v4493_v37 = vadd.f32 %v4492_v14, %v4397_v47  ;;  %v8772_v58 = vld [vmem:[#allocation35_spill] sm:$0xff] }
 0x421   :  { %v4404_v22 = vmul.f32 %v4212_v63, %v8748_v9  ;;  %v4533_v42 = vadd.f32 %v4532_v60, %v4431_v26  ;;  %v8755_v0 = vmax.f32 %v7988_v32, 0.0  ;;  %v8756_v12 = vmax.f32 %v7980_v53, 0.0  ;;  %v8770_v9 = vld [vmem:[#allocation131_spill] sm:$0xff] }
 0x422   :  { %v4405_v1 = vmul.f32 %v4213_v52, %v8750_v20  ;;  %v4406_v13 = vmul.f32 %v4214_v8, %v8752_v62  ;;  %v4407_v35 = vmul.f32 %v4215_v49, %v8754_v5  ;;  %v4224_v61 = vperm.slane %v4132_v10, 0  ;;  %4494 = vadd.xlane.f32.xlu1 %v4493_v37  ;;  %v8767_v49 = vld [vmem:[#allocation133_spill] sm:$0xff] }
 0x423   :  { %v4408_v39 = vmul.f32 %v4216_v18, %v8755_v0  ;;  %v4409_v2 = vmul.f32 %v4217_v16, %v8756_v12  ;;  %v4225_v59 = vperm.slane %v4132_v10, 1  ;;  %v4226_v48 = vperm.slane %v4132_v10, 2  ;;  %v8769_v18 = vld [vmem:[#allocation135_spill] sm:$0xff]  ;;  %v8777_v12 = vld [vmem:[#allocation69_spill] sm:$0xff] }
 0x424   :  { %v4503_v25 = vadd.f32 %v4405_v1, %v4404_v22  ;;  %v4534_v41 = vadd.f32 %v4533_v42, %v4432_v11  ;;  %v4227_v56 = vperm.slane %v4132_v10, 3  ;;  %v4228_v19 = vperm.slane %v4132_v10, 4  ;;  %v8771_v22 = vld [vmem:[#allocation134_spill] sm:$0xff] }
 0x425   :  { %v4229_v44 = vperm.slane %v4132_v10, 5  ;;  %v8758_v43 = vmax.f32 %v8757_v23, 0.0  ;;  %v8760_v28 = vmax.f32 %v8759_v54, 0.0  ;;  %v8762_v26 = vmax.f32 %v8761_v7, 0.0 }
 0x426   :  { %v4504_v38 = vadd.f32 %v4503_v25, %v4406_v13  ;;  %v4535_v6 = vadd.f32 %v4534_v41, %v4433_v45  ;;  %v8764_v34 = vmax.f32 %v8763_v40, 0.0  ;;  %v8765_v4 = vmax.f32 %v8000_v31, 0.0 }
 0x427   :  { %v4416_v47 = vmul.f32 %v4224_v61, %v8758_v43  ;;  %v4417_v32 = vmul.f32 %v4225_v59, %v8760_v28  ;;  %v4418_v53 = vmul.f32 %v4226_v48, %v8762_v26  ;;  %v8766_v63 = vmax.f32 %v7997_v21, 0.0 }
 0x428   :  { %v4419_v51 = vmul.f32 %v4227_v56, %v8764_v34  ;;  %v4420_v11 = vmul.f32 %v4228_v19, %v8765_v4  ;;  %v4505_v52 = vadd.f32 %v4504_v38, %v4407_v35  ;;  %v4162_v14 = vsel %vm4105_vm0, %v8767_v49, %v4161_v50  ;;  %4536 = vadd.xlane.f32.xlu0 %v4535_v6  ;;  %v8781_v6 = vld [vmem:[#allocation27_spill] sm:$0xff]  ;;  %v8783_v34 = vld [vmem:[#allocation26_spill] sm:$0xff]  ;;  %v8785_v4 = vld [vmem:[#allocation61_spill] sm:$0xff] }
 0x429   :  { %v4421_v10 = vmul.f32 %v4229_v44, %v8766_v63  ;;  %v4517_v8 = vadd.f32 %v4417_v32, %v4416_v47  ;;  %vm8768_vm13 = vcmask 1042433   ;;  %v4163_v45 = vrot.slane %v4162_v14, 2 }
 0x42a   :  { %v4136_v60 = vsel %vm8768_vm13, %v8063_v33, %v8074_v30  ;;  %vm4137_vm8 = vcmask 1045505   ;;  %v4150_v31 = vsel %vm4082_vm9, %v8066_v27, %v8115_v24  ;;  %v4180_v21 = vsel %vm4130_vm2, %v8121_v57, %v8769_v18  ;;  %v8774_v57 = vld [vmem:[#allocation34_spill] sm:$0xff]  ;;  %v8791_v18 = vld [vmem:[#allocation105_spill] sm:$0xff]  ;;  %vm8824_vm9 = vmmov %vm8768_vm13 }
 0x42b   :  { %v4506_v16 = vadd.f32 %v4505_v52, %v4408_v39  ;;  %v4518_v29 = vadd.f32 %v4517_v8, %v4418_v53  ;;  %v4138_v50 = vsel %vm4137_vm8, %v4136_v60, %v8770_v9  ;;  %v4151_v17 = vsel %vm4084_vm14, %v8771_v22, %v4150_v31  ;;  %v8789_v60 = vld [vmem:[#allocation106_spill] sm:$0xff] }
 0x42c   :  { %v4254_v30 = vperm.slane %v4163_v45, 0  ;;  %v4255_v33 = vperm.slane %v4163_v45, 1  ;;  %v4256_v20 = vperm.slane %v4163_v45, 2  ;;  %v4257_v1 = vperm.slane %v4163_v45, 3 }
 0x42d   :  { %v4507_v55 = vadd.f32 %v4506_v16, %v4409_v2  ;;  %v4519_v62 = vadd.f32 %v4518_v29, %v4419_v51  ;;  %v4258_v13 = vperm.slane %v4163_v45, 4  ;;  %v4259_v27 = vperm.slane %v4163_v45, 5 }
 0x42e   :  { %v8773_v5 = vmax.f32 %v8772_v58, 0.0  ;;  %v8775_v37 = vmax.f32 %v8774_v57, 0.0  ;;  %v8776_v0 = vmax.f32 %v8641_v46, 0.0  ;;  %v8778_v25 = vmax.f32 %v8777_v12, 0.0  ;;  %v8802_v12 = vld [vmem:[#allocation110_spill] sm:$0xff] }
 0x42f   :  { %4508 = vadd.xlane.f32.xlu2 %v4507_v55  ;;  %v4520_v59 = vadd.f32 %v4519_v62, %v4420_v11  ;;  %v8779_v48 = vmax.f32 %v8694_v3, 0.0  ;;  %v8780_v41 = vmax.f32 %v8693_v15, 0.0  ;;  %v4139_v19 = vrot.slane %v4138_v50, 6  ;;  %v8795_v55 = vld [vmem:[#allocation30_spill] sm:$0xff] }
 0x430   :  { %v4446_v35 = vmul.f32 %v4254_v30, %v8773_v5  ;;  %v4447_v42 = vmul.f32 %v4255_v33, %v8775_v37  ;;  %v4448_v39 = vmul.f32 %v4256_v20, %v8776_v0  ;;  %v4449_v61 = vmul.f32 %v4257_v1, %v8778_v25  ;;  %v8793_v30 = vld [vmem:[#allocation31_spill] sm:$0xff] }
 0x431   :  { %v4450_v2 = vmul.f32 %v4258_v13, %v8779_v48  ;;  %v4451_v56 = vmul.f32 %v4259_v27, %v8780_v41  ;;  %v4242_v38 = vperm.slane %v4151_v17, 0  ;;  %v4243_v23 = vperm.slane %v4151_v17, 1  ;;  %v8797_v27 = vld [vmem:[#allocation66_spill] sm:$0xff] }
 0x432   :  { %v4552_v44 = vadd.f32 %v4447_v42, %v4446_v35  ;;  %v4244_v43 = vperm.slane %v4151_v17, 2  ;;  %v4521_v47 = vadd.f32 %v4520_v59, %v4421_v10  ;;  %v4230_v54 = vperm.slane %v4139_v19, 0  ;;  %v8787_v10 = vld [vmem:[#allocation60_spill] sm:$0xff] }
 0x433   :  { %v4231_v46 = vperm.slane %v4139_v19, 1  ;;  %v4232_v28 = vperm.slane %v4139_v19, 2  ;;  %v4233_v7 = vperm.slane %v4139_v19, 3  ;;  %v4234_v26 = vperm.slane %v4139_v19, 4  ;;  %v8799_v35 = vld [vmem:[#allocation64_spill] sm:$0xff] }
 0x434   :  { %v4553_v32 = vadd.f32 %v4552_v44, %v4448_v39  ;;  %v4235_v53 = vperm.slane %v4139_v19, 5  ;;  %4522 = vadd.xlane.f32.xlu1 %v4521_v47  ;;  %v8782_v3 = vmax.f32 %v8781_v6, 0.0  ;;  %v8784_v15 = vmax.f32 %v8783_v34, 0.0  ;;  %v8805_v19 = vld [vmem:[#allocation70_spill] sm:$0xff] }
 0x435   :  { %v8786_v11 = vmax.f32 %v8785_v4, 0.0  ;;  %v4245_v52 = vperm.slane %v4151_v17, 3  ;;  %v8788_v49 = vmax.f32 %v8787_v10, 0.0  ;;  %v8790_v45 = vmax.f32 %v8789_v60, 0.0  ;;  %v8817_v10 = vld [vmem:[#allocation122_spill] sm:$0xff] }
 0x436   :  { %v4422_v40 = vmul.f32 %v4230_v54, %v8782_v3  ;;  %v4423_v51 = vmul.f32 %v4231_v46, %v8784_v15  ;;  %v4554_v8 = vadd.f32 %v4553_v32, %v4449_v61  ;;  %v8792_v16 = vmax.f32 %v8791_v18, 0.0  ;;  %v8811_v3 = vld [vmem:[#allocation78_spill] sm:$0xff] }
 0x437   :  { %v4424_v63 = vmul.f32 %v4232_v28, %v8786_v11  ;;  %v4425_v14 = vmul.f32 %v4233_v7, %v8788_v49  ;;  %v4426_v31 = vmul.f32 %v4234_v26, %v8790_v45  ;;  %v4246_v50 = vperm.slane %v4151_v17, 4  ;;  %v8809_v26 = vld [vmem:[#allocation40_spill] sm:$0xff] }
 0x438   :  { %v4427_v29 = vmul.f32 %v4235_v53, %v8792_v16  ;;  %v4524_v9 = vadd.f32 %v4423_v51, %v4422_v40  ;;  %v4247_v22 = vperm.slane %v4151_v17, 5  ;;  %v8794_v33 = vmax.f32 %v8793_v30, 0.0  ;;  %v8813_v51 = vld [vmem:[#allocation52_spill] sm:$0xff] }
 0x439   :  { %v4555_v1 = vadd.f32 %v4554_v8, %v4450_v2  ;;  %v8796_v62 = vmax.f32 %v8795_v55, 0.0  ;;  %v8798_v58 = vmax.f32 %v8797_v27, 0.0  ;;  %v8800_v57 = vmax.f32 %v8799_v35, 0.0  ;;  %v8804_v2 = vld [vmem:[#allocation67_spill] sm:$0xff]  ;;  %v8820_v16 = vld [vmem:[#allocation132_spill] sm:$0xff]  ;;  %v8822_v55 = vld [vmem:[#allocation137_spill] sm:$0xff] }
 0x43a   :  { %v4434_v20 = vmul.f32 %v4242_v38, %v8794_v33  ;;  %v4525_v42 = vadd.f32 %v4524_v9, %v4424_v63  ;;  %v8801_v0 = vmax.f32 %v8691_v36, 0.0  ;;  %v8803_v25 = vmax.f32 %v8802_v12, 0.0  ;;  %v8815_v63 = vld [vmem:[#allocation57_spill] sm:$0xff]  ;;  %v8821_v33 = vld [vmem:[#allocation72_spill] sm:$0xff]  ;;  %v8825_v27 = vld [vmem:[#allocation71_spill] sm:$0xff] }
 0x43b   :  { %v4435_v13 = vmul.f32 %v4243_v23, %v8796_v62  ;;  %v4436_v5 = vmul.f32 %v4244_v43, %v8798_v58  ;;  %v4437_v37 = vmul.f32 %v4245_v52, %v8800_v57  ;;  %v4181_v61 = vrot.slane %v4180_v21, 5 }
 0x43c   :  { %v4438_v39 = vmul.f32 %v4246_v50, %v8801_v0  ;;  %v4439_v17 = vmul.f32 %v4247_v22, %v8803_v25  ;;  %v4556_v59 = vadd.f32 %v4555_v1, %v4451_v56  ;;  %v4155_v41 = vsel %vm4092_vm10, %v8804_v2, %v8115_v24  ;;  %v8807_v56 = vld [vmem:[#allocation41_spill] sm:$0xff] }
 0x43d   :  { %v4538_v48 = vadd.f32 %v4435_v13, %v4434_v20  ;;  %vm8806_vm2 = vcmask 1045504   ;;  %v4526_v38 = vadd.f32 %v4525_v42, %v4425_v14  ;;  %v4272_v23 = vperm.slane %v4181_v61, 0  ;;  %v8826_v25 = vld [vmem:[#allocation33_spill] sm:$0xff] }
 0x43e   :  { %v4167_v44 = vsel %vm8806_vm2, %v8115_v24, %v8805_v19  ;;  %v4273_v43 = vperm.slane %v4181_v61, 1  ;;  %v4274_v47 = vperm.slane %v4181_v61, 2  ;;  %4557 = vadd.xlane.f32.xlu0 %v4556_v59  ;;  %v4275_v54 = vperm.slane %v4181_v61, 3  ;;  %v8830_v19 = vld [vmem:[#allocation68_spill] sm:$0xff] }
 0x43f   :  { %v4539_v36 = vadd.f32 %v4538_v48, %v4436_v5  ;;  %v4276_v46 = vperm.slane %v4181_v61, 4  ;;  %v4277_v28 = vperm.slane %v4181_v61, 5  ;;  %v4527_v21 = vadd.f32 %v4526_v38, %v4426_v31  ;;  %v8819_v31 = vld [vmem:[#allocation136_spill] sm:$0xff] }
 0x440   :  { %v8808_v32 = vmax.f32 %v8807_v56, 0.0  ;;  %v8810_v53 = vmax.f32 %v8809_v26, 0.0  ;;  %v8812_v40 = vmax.f32 %v8811_v3, 0.0  ;;  %v8814_v4 = vmax.f32 %v8813_v51, 0.0  ;;  %v8828_v48 = vld [vmem:[#allocation32_spill] sm:$0xff] }
 0x441   :  { %v4540_v15 = vadd.f32 %v4539_v36, %v4437_v37  ;;  %v8816_v52 = vmax.f32 %v8815_v63, 0.0  ;;  %v8818_v49 = vmax.f32 %v8817_v10, 0.0  ;;  %v4528_v60 = vadd.f32 %v4527_v21, %v4427_v29  ;;  %v8823_v29 = vld [vmem:[#allocation75_spill] sm:$0xff]  ;;  %v8834_v36 = vld [vmem:[#allocation65_spill] sm:$0xff] }
 0x442   :  { %v4464_v7 = vmul.f32 %v4272_v23, %v8808_v32  ;;  %v4465_v6 = vmul.f32 %v4273_v43, %v8810_v53  ;;  %v4466_v34 = vmul.f32 %v4274_v47, %v8812_v40  ;;  %v4467_v11 = vmul.f32 %v4275_v54, %v8814_v4 }
 0x443   :  { %v4468_v8 = vmul.f32 %v4276_v46, %v8816_v52  ;;  %v4469_v14 = vmul.f32 %v4277_v28, %v8818_v49  ;;  %v4156_v18 = vsel %vm4094_vm6, %v8819_v31, %v4155_v41  ;;  %v4168_v9 = vsel %vm4114_vm7, %v8820_v16, %v4167_v44  ;;  %4529 = vadd.xlane.f32.xlu2 %v4528_v60  ;;  %v8836_v28 = vld [vmem:[#allocation112_spill] sm:$0xff]  ;;  %v8844_v60 = vld [vmem:[#allocation49_spill] sm:$0xff] }
 0x444   :  { %v4573_v45 = vadd.f32 %v4465_v6, %v4464_v7  ;;  %v4541_v50 = vadd.f32 %v4540_v15, %v4438_v39  ;;  %v4157_v22 = vrot.slane %v4156_v18, 1  ;;  %v4169_v30 = vrot.slane %v4168_v9, 3  ;;  %v8846_v18 = vld [vmem:[#allocation56_spill] sm:$0xff] }
 0x445   :  { %v4173_v20 = vsel %vm4121_vm11, %v8115_v24, %v8821_v33  ;;  %v4185_v13 = vsel %vm8824_vm9, %v8823_v29, %v8115_v24  ;;  %v4191_v58 = vsel %vm4099_vm12, %v8825_v27, %v8115_v24  ;;  %v8827_v61 = vmax.f32 %v8826_v25, 0.0  ;;  %v8850_v33 = vld [vmem:[#allocation138_spill] sm:$0xff]  ;;  %v8851_v27 = vld [vmem:[#allocation139_spill] sm:$0xff] }
 0x446   :  { %v4574_v1 = vadd.f32 %v4573_v45, %v4466_v34  ;;  %v4174_v62 = vsel %vm4123_vm15, %v8822_v55, %v4173_v20  ;;  %v4542_v5 = vadd.f32 %v4541_v50, %v4439_v17  ;;  %v4248_v35 = vperm.slane %v4157_v22, 0  ;;  %v8832_v17 = vld [vmem:[#allocation47_spill] sm:$0xff]  ;;  %v8838_v34 = vld [vmem:[#allocation37_spill] sm:$0xff] }
 0x447   :  { %v4249_v57 = vperm.slane %v4157_v22, 1  ;;  %v4250_v37 = vperm.slane %v4157_v22, 2  ;;  %v4251_v0 = vperm.slane %v4157_v22, 3  ;;  %v4252_v39 = vperm.slane %v4157_v22, 4 }
 0x448   :  { %v4575_v42 = vadd.f32 %v4574_v1, %v4467_v11  ;;  %v4253_v12 = vperm.slane %v4157_v22, 5  ;;  %4543 = vadd.xlane.f32.xlu1 %v4542_v5  ;;  %v4440_v59 = vmul.f32 %v4248_v35, %v8827_v61  ;;  %v8829_v2 = vmax.f32 %v8828_v48, 0.0  ;;  %v8840_v11 = vld [vmem:[#allocation36_spill] sm:$0xff]  ;;  %v8852_v61 = vld [vmem:[#allocation39_spill] sm:$0xff]  ;;  %v8854_v48 = vld [vmem:[#allocation38_spill] sm:$0xff] }
 0x449   :  { %v8831_v44 = vmax.f32 %v8830_v19, 0.0  ;;  %v4260_v23 = vperm.slane %v4169_v30, 0  ;;  %v8833_v43 = vmax.f32 %v8832_v17, 0.0  ;;  %v8835_v54 = vmax.f32 %v8834_v36, 0.0 }
 0x44a   :  { %v4441_v41 = vmul.f32 %v4249_v57, %v8829_v2  ;;  %v4576_v24 = vadd.f32 %v4575_v42, %v4468_v8  ;;  %v8837_v21 = vmax.f32 %v8836_v28, 0.0  ;;  %v4261_v7 = vperm.slane %v4169_v30, 1  ;;  %v8842_v8 = vld [vmem:[#allocation73_spill] sm:$0xff] }
 0x44b   :  { %v4442_v38 = vmul.f32 %v4250_v37, %v8831_v44  ;;  %v4443_v47 = vmul.f32 %v4251_v0, %v8833_v43  ;;  %v4444_v46 = vmul.f32 %v4252_v39, %v8835_v54  ;;  %v4262_v26 = vperm.slane %v4169_v30, 2  ;;  %v8860_v43 = vld [vmem:[#allocation121_spill] sm:$0xff]  ;;  %v8862_v54 = vld [vmem:[#allocation120_spill] sm:$0xff] }
 0x44c   :  { %v4445_v56 = vmul.f32 %v4253_v12, %v8837_v21  ;;  %v4545_v32 = vadd.f32 %v4441_v41, %v4440_v59  ;;  %v4263_v53 = vperm.slane %v4169_v30, 3  ;;  %v4577_v6 = vadd.f32 %v4576_v24, %v4469_v14  ;;  %v8848_v14 = vld [vmem:[#allocation117_spill] sm:$0xff]  ;;  %v8856_v41 = vld [vmem:[#allocation76_spill] sm:$0xff] }
 0x44d   :  { %v4264_v3 = vperm.slane %v4169_v30, 4  ;;  %v4265_v40 = vperm.slane %v4169_v30, 5  ;;  %v8839_v15 = vmax.f32 %v8838_v34, 0.0  ;;  %v8841_v63 = vmax.f32 %v8840_v11, 0.0 }
 0x44e   :  { %v4546_v4 = vadd.f32 %v4545_v32, %v4442_v38  ;;  %v8843_v10 = vmax.f32 %v8842_v8, 0.0  ;;  %v8845_v45 = vmax.f32 %v8844_v60, 0.0  ;;  %4578 = vadd.xlane.f32.xlu0 %v4577_v6  ;;  %v8847_v16 = vmax.f32 %v8846_v18, 0.0  ;;  %v8858_v38 = vld [vmem:[#allocation74_spill] sm:$0xff]  ;;  %v8870_v60 = vld [vmem:[#allocation79_spill] sm:$0xff] }
 0x44f   :  { %v4452_v51 = vmul.f32 %v4260_v23, %v8839_v15  ;;  %v4453_v52 = vmul.f32 %v4261_v7, %v8841_v63  ;;  %v8849_v50 = vmax.f32 %v8848_v14, 0.0  ;;  %v4175_v30 = vrot.slane %v4174_v62, 4  ;;  %v8864_v15 = vld [vmem:[#allocation43_spill] sm:$0xff]  ;;  %v8872_v18 = vld [vmem:[#allocation126_spill] sm:$0xff]  ;;  %v8874_v14 = vld [vmem:[#allocation125_spill] sm:$0xff] }
 0x450   :  { %v4454_v49 = vmul.f32 %v4262_v26, %v8843_v10  ;;  %v4455_v31 = vmul.f32 %v4263_v53, %v8845_v45  ;;  %v4456_v9 = vmul.f32 %v4264_v3, %v8847_v16  ;;  %v4186_v20 = vsel %vm4137_vm8, %v4185_v13, %v8850_v33  ;;  %v8876_v33 = vld [vmem:[#allocation46_spill] sm:$0xff] }
 0x451   :  { %v4457_v22 = vmul.f32 %v4265_v40, %v8849_v50  ;;  %v4547_v1 = vadd.f32 %v4546_v4, %v4443_v47  ;;  %v4559_v55 = vadd.f32 %v4453_v52, %v4452_v51  ;;  %v4187_v29 = vrot.slane %v4186_v20, 6  ;;  %v8866_v4 = vld [vmem:[#allocation42_spill] sm:$0xff]  ;;  %v8868_v52 = vld [vmem:[#allocation81_spill] sm:$0xff] }
 0x452   :  { %v4192_v5 = vsel %vm4144_vm3, %v4191_v58, %v8851_v27  ;;  %v4266_v35 = vperm.slane %v4175_v30, 0  ;;  %v4267_v57 = vperm.slane %v4175_v30, 1  ;;  %v4268_v37 = vperm.slane %v4175_v30, 2  ;;  %v8877_v27 = vld [vmem:[#allocation53_spill] sm:$0xff] }
 0x453   :  { %v4269_v42 = vperm.slane %v4175_v30, 3  ;;  %v4548_v0 = vadd.f32 %v4547_v1, %v4444_v46  ;;  %v4560_v39 = vadd.f32 %v4559_v55, %v4454_v49  ;;  %v4270_v12 = vperm.slane %v4175_v30, 4 }
 0x454   :  { %v4271_v25 = vperm.slane %v4175_v30, 5  ;;  %v8853_v59 = vmax.f32 %v8852_v61, 0.0  ;;  %v8855_v2 = vmax.f32 %v8854_v48, 0.0  ;;  %v8857_v19 = vmax.f32 %v8856_v41, 0.0 }
 0x455   :  { %v8859_v23 = vmax.f32 %v8858_v38, 0.0  ;;  %v4549_v24 = vadd.f32 %v4548_v0, %v4445_v56  ;;  %v4561_v17 = vadd.f32 %v4560_v39, %v4455_v31  ;;  %v8861_v47 = vmax.f32 %v8860_v43, 0.0  ;;  %v8881_v39 = vld [vmem:[#allocation128_spill] sm:$0xff] }
 0x456   :  { %v4458_v62 = vmul.f32 %v4266_v35, %v8853_v59  ;;  %v4459_v13 = vmul.f32 %v4267_v57, %v8855_v2  ;;  %v4460_v44 = vmul.f32 %v4268_v37, %v8857_v19  ;;  %v8863_v46 = vmax.f32 %v8862_v54, 0.0  ;;  %v8878_v35 = vld [vmem:[#allocation82_spill] sm:$0xff]  ;;  %v8879_v37 = vld [vmem:[#allocation45_spill] sm:$0xff]  ;;  %v8882_v38 = vld [vmem:[#allocation44_spill] sm:$0xff] }
 0x457   :  { %v4461_v58 = vmul.f32 %v4269_v42, %v8859_v23  ;;  %v4462_v36 = vmul.f32 %v4270_v12, %v8861_v47  ;;  %v4278_v32 = vperm.slane %v4187_v29, 0  ;;  %v4279_v7 = vperm.slane %v4187_v29, 1  ;;  %4550 = vadd.xlane.f32.xlu2 %v4549_v24 }
 0x458   :  { %v4463_v28 = vmul.f32 %v4271_v25, %v8863_v46  ;;  %v4566_v21 = vadd.f32 %v4459_v13, %v4458_v62  ;;  %v4280_v26 = vperm.slane %v4187_v29, 2  ;;  %v4562_v53 = vadd.f32 %v4561_v17, %v4456_v9 }
 0x459   :  { %v4281_v6 = vperm.slane %v4187_v29, 3  ;;  %v4282_v3 = vperm.slane %v4187_v29, 4  ;;  %v4283_v40 = vperm.slane %v4187_v29, 5  ;;  %v8865_v51 = vmax.f32 %v8864_v15, 0.0 }
 0x45a   :  { %v4567_v34 = vadd.f32 %v4566_v21, %v4460_v44  ;;  %v8867_v11 = vmax.f32 %v8866_v4, 0.0  ;;  %v8869_v8 = vmax.f32 %v8868_v52, 0.0  ;;  %v4563_v49 = vadd.f32 %v4562_v53, %v4457_v22  ;;  %v8880_v22 = vld [vmem:[#allocation127_spill] sm:$0xff] }
 0x45b   :  { %v4470_v56 = vmul.f32 %v4278_v32, %v8865_v51  ;;  %v8871_v45 = vmax.f32 %v8870_v60, 0.0  ;;  %v8873_v16 = vmax.f32 %v8872_v18, 0.0  ;;  %v8875_v50 = vmax.f32 %v8874_v14, 0.0 }
 0x45c   :  { %v4471_v63 = vmul.f32 %v4279_v7, %v8867_v11  ;;  %v4472_v10 = vmul.f32 %v4280_v26, %v8869_v8  ;;  %v1728_v20 = vmax.f32 %v8876_v33, 0.0  ;;  %v4568_v1 = vadd.f32 %v4567_v34, %v4461_v58  ;;  %4564 = vadd.xlane.f32.xlu1 %v4563_v49 }
 0x45d   :  { %v4473_v31 = vmul.f32 %v4281_v6, %v8871_v45  ;;  %v4474_v9 = vmul.f32 %v4282_v3, %v8873_v16  ;;  %v4475_v30 = vmul.f32 %v4283_v40, %v8875_v50  ;;  %v4193_v29 = vrot.slane %v4192_v5, 7  ;;  %v4046_v6 = vpop.xlane.xlu0 %4045 }
 0x45e   :  { %v4580_v55 = vadd.f32 %v4471_v63, %v4470_v56  ;;  %v1440_v57 = vadd.f32 %v8878_v35, %v8877_v27  ;;  %v1730_v42 = vmax.f32 %v8879_v37, 0.0  ;;  %v1733_v0 = vmax.f32 %v8880_v22, 0.0 }
 0x45f   :  { %v1732_v12 = vmax.f32 %v8881_v39, 0.0  ;;  %v4569_v25 = vadd.f32 %v4568_v1, %v4462_v36  ;;  %v4284_v59 = vperm.slane %v4193_v29, 0  ;;  %v4285_v62 = vperm.slane %v4193_v29, 1 }
 0x460   :  { %v4581_v61 = vadd.f32 %v4580_v55, %v4472_v10  ;;  %v4286_v48 = vperm.slane %v4193_v29, 2  ;;  %v4287_v2 = vperm.slane %v4193_v29, 3  ;;  %v4288_v13 = vperm.slane %v4193_v29, 4 }
 0x461   :  { %v4289_v41 = vperm.slane %v4193_v29, 5  ;;  %v4570_v19 = vadd.f32 %v4569_v25, %v4463_v28  ;;  %v4476_v44 = vmul.f32 %v4284_v59, %v1728_v20  ;;  %v8883_v23 = vmax.f32 %v8882_v38, 0.0 }
 0x462   :  { %v4582_v5 = vadd.f32 %v4581_v61, %v4473_v31  ;;  %v4478_v24 = vmul.f32 %v4286_v48, %v1730_v42  ;;  %v4480_v17 = vmul.f32 %v4288_v13, %v1732_v12  ;;  %v1731_v47 = vmax.f32 %v1440_v57, 0.0 }
 0x463   :  { %v4477_v58 = vmul.f32 %v4285_v62, %v8883_v23  ;;  %v4481_v43 = vmul.f32 %v4289_v41, %v1733_v0  ;;  %4571 = vadd.xlane.f32.xlu2 %v4570_v19  ;;  %v7060_v28 = vmov 0   ;;  %v4596_v3 = vperm.slane %v4046_v6, 0 }
 0x464   :  { %v4583_v54 = vadd.f32 %v4582_v5, %v4474_v9  ;;  %v4479_v21 = vmul.f32 %v4287_v2, %v1731_v47  ;;  %6840 = vset.pattern.permute.xlu0 %v7060_v28  ;;  %6842 = vset.pattern.permute.xlu2 %v7060_v28  ;;  %v4598_v51 = vperm.slane %v4046_v6, 2  ;;  %v4597_v63 = vperm.slane %v4046_v6, 1 }
 0x465   :  { %v4587_v36 = vadd.f32 %v4477_v58, %v4476_v44  ;;  %6841 = vset.pattern.permute.xlu1 %v7060_v28  ;;  %v8355_v40 = vpop.xlane.xlu0 %4052  ;;  %v4603_v10 = vperm.slane %v4046_v6, 7  ;;  %v4600_v60 = vperm.slane %v4046_v6, 4  ;;  %v4599_v31 = vperm.slane %v4046_v6, 3 }
 0x466   :  { %v4584_v46 = vadd.f32 %v4583_v54, %v4475_v30  ;;  %v4601_v50 = vperm.slane %v4046_v6, 5  ;;  %v4606_v33 = vperm.slane %v8355_v40, 2  ;;  %v4602_v55 = vperm.slane %v4046_v6, 6 }
 0x467   :  { %v4588_v32 = vadd.f32 %v4587_v36, %v4478_v24  ;;  %v4604_v35 = vperm.slane %v8355_v40, 0  ;;  %v4609_v42 = vperm.slane %v8355_v40, 5  ;;  %v4605_v39 = vperm.slane %v8355_v40, 1 }
 0x468   :  { %4585 = vadd.xlane.f32.xlu1 %v4584_v46  ;;  %v4607_v61 = vperm.slane %v8355_v40, 3  ;;  %v4608_v48 = vperm.slane %v8355_v40, 4  ;;  %v4610_v41 = vperm.slane %v8355_v40, 6  ;;  %v4611_v44 = vperm.slane %v8355_v40, 7 }
 0x469   :  { %v4589_v7 = vadd.f32 %v4588_v32, %v4479_v21  ;;  %vm8884_vm6 = vcmask 1044484   ;;  %vm4732_vm7 = vcmask 1047559   ;;  %vm8885_vm10 = vcmask 1045509  }
 0x46a   :  { %vm4743_vm11 = vcmask 64512   ;;  %vm8886_vm12 = vcmask 1046534   ;;  %vm8887_vm14 = vmmov %vm8884_vm6 }
 0x46b   :  { %v4590_v26 = vadd.f32 %v4589_v7, %v4480_v17  ;;  %v4708_v17 = vlaneseq  ;;  %vm8888_vm15 = vmmov %vm8885_vm10 }
 0x46c   :  { %vm8889_vm0 = vmmov %vm8886_vm12 }
 0x46d   :  { %v4591_v53 = vadd.f32 %v4590_v26, %v4481_v43  ;;  %v4709_v43 = vand.u32 127, %v4708_v17 }
 0x46f   :  { %4592 = vadd.xlane.f32.xlu2 %v4591_v53 }
 0x482   :  { %v4488_v34 = vpop.xlane.xlu1 %4487 }
 0x483   :  { %v4628_v15 = vadd.f32 %v4596_v3, %v4488_v34 }
 0x485   :  { %4661 = vperm.xlu0 %6840, %v4628_v15  }
 0x487   :  { %v4516_v56 = vpop.xlane.xlu0 %4515 }
 0x488   :  { %v4632_v18 = vadd.f32 %v4600_v60, %v4516_v56 }
 0x48e   :  { %v4502_v4 = vpop.xlane.xlu2 %4501 }
 0x48f   :  { %v4630_v11 = vadd.f32 %v4598_v51, %v4502_v4 }
 0x491   :  { %4667 = vperm.xlu2 %6842, %v4630_v11  }
 0x495   :  { %v4495_v52 = vpop.xlane.xlu1 %4494 }
 0x496   :  { %v4629_v8 = vadd.f32 %v4597_v63, %v4495_v52 }
 0x498   :  { %4664 = vperm.xlu1 %6841, %v4629_v8  }
 0x49b   :  { %v4537_v49 = vpop.xlane.xlu0 %4536 }
 0x49c   :  { %v4635_v45 = vadd.f32 %v4603_v10, %v4537_v49 }
 0x49e   :  { %4682 = vperm.xlu0 %6840, %v4635_v45  }
 0x4a0   :  { %4673 = vperm.xlu1 %6841, %v4632_v18  }
 0x4a2   :  { %v4509_v16 = vpop.xlane.xlu2 %4508 }
 0x4a3   :  { %v4631_v9 = vadd.f32 %v4599_v31, %v4509_v16 }
 0x4a5   :  { %4670 = vperm.xlu2 %6842, %v4631_v9  }
 0x4a7   :  { %v4523_v14 = vpop.xlane.xlu1 %4522 }
 0x4a8   :  { %v4633_v30 = vadd.f32 %v4601_v50, %v4523_v14 }
 0x4ad   :  { %4676 = vperm.xlu2 %6842, %v4633_v30  }
 0x4b1   :  { %v4558_v20 = vpop.xlane.xlu0 %4557 }
 0x4b2   :  { %v4638_v1 = vadd.f32 %v4606_v33, %v4558_v20 }
 0x4b4   :  { %4691 = vperm.xlu0 %6840, %v4638_v1  }
 0x4b6   :  { %v4530_v29 = vpop.xlane.xlu2 %4529 }
 0x4b7   :  { %v4634_v27 = vadd.f32 %v4602_v55, %v4530_v29 }
 0x4b9   :  { %4679 = vperm.xlu1 %6841, %v4634_v27  }
 0x4bb   :  { %v4544_v57 = vpop.xlane.xlu1 %4543 }
 0x4bc   :  { %v4636_v37 = vadd.f32 %v4604_v35, %v4544_v57 }
 0x4be   :  { %4685 = vperm.xlu2 %6842, %v4636_v37  }
 0x4c1   :  { %v4579_v22 = vpop.xlane.xlu0 %4578 }
 0x4c2   :  { %v4641_v0 = vadd.f32 %v4609_v42, %v4579_v22 }
 0x4c4   :  { %4700 = vperm.xlu0 %6840, %v4641_v0  }
 0x4ca   :  { %v4551_v12 = vpop.xlane.xlu2 %4550 }
 0x4cb   :  { %v4637_v25 = vadd.f32 %v4605_v39, %v4551_v12 }
 0x4cd   :  { %4688 = vperm.xlu1 %6841, %v4637_v25  }
 0x4cf   :  { %v4565_v59 = vpop.xlane.xlu1 %4564 }
 0x4d0   :  { %v4639_v62 = vadd.f32 %v4607_v61, %v4565_v59 }
 0x4d2   :  { %4694 = vperm.xlu2 %6842, %v4639_v62  }
 0x4d6   :  { %v4572_v2 = vpop.xlane.xlu2 %4571 }
 0x4d7   :  { %v4640_v13 = vadd.f32 %v4608_v48, %v4572_v2 }
 0x4d9   :  { %4697 = vperm.xlu1 %6841, %v4640_v13  }
 0x4db   :  { %v4586_v19 = vpop.xlane.xlu1 %4585 }
 0x4dc   :  { %v4642_v5 = vadd.f32 %v4610_v41, %v4586_v19 }
 0x4de   :  { %4703 = vperm.xlu2 %6842, %v4642_v5  }
 0x4e2   :  { %v4593_v38 = vpop.xlane.xlu2 %4592 }
 0x4e3   :  { %v4643_v23 = vadd.f32 %v4611_v44, %v4593_v38 }
 0x4e5   :  { %4706 = vperm.xlu1 %6841, %v4643_v23  }
 0x4eb   :  { %v4668_v58 = vpop.permute.xlu2 %4667 }
 0x4ec   :  { %v4712_v7 = vperm.slane %v4668_v58, %v4709_v43 }
 0x4f7   :  { %v4662_v54 = vpop.permute.xlu0 %4661 }
 0x4f8   :  { %v4710_v46 = vperm.slane %v4662_v54, %v4709_v43 }
 0x4ff   :  { %v4671_v47 = vpop.permute.xlu2 %4670 }
 0x500   :  { %v4713_v28 = vperm.slane %v4671_v47, %v4709_v43 }
 0x507   :  { %v4677_v6 = vpop.permute.xlu2 %4676 }
 0x508   :  { %v4715_v15 = vperm.slane %v4677_v6, %v4709_v43 }
 0x50a   :  { %v4665_v24 = vpop.permute.xlu1 %4664 }
 0x50b   :  { %v4711_v36 = vperm.slane %v4665_v24, %v4709_v43 }
 0x50d   :  { %v4726_v32 = vsel %vm4086_vm5, %v4711_v36, %v4710_v46 }
 0x50e   :  { %v4727_v26 = vsel %vm4097_vm4, %v4712_v7, %v4726_v32 }
 0x50f   :  { %v4728_v3 = vsel %vm4080_vm1, %v4713_v28, %v4727_v26 }
 0x510   :  { %v4683_v40 = vpop.permute.xlu0 %4682 }
 0x511   :  { %v4717_v4 = vperm.slane %v4683_v40, %v4709_v43 }
 0x512   :  { %v4674_v21 = vpop.permute.xlu1 %4673 }
 0x513   :  { %v4714_v53 = vperm.slane %v4674_v21, %v4709_v43 }
 0x515   :  { %v4729_v34 = vsel %vm8884_vm6, %v4714_v53, %v4728_v3 }
 0x516   :  { %v4730_v11 = vsel %vm8885_vm10, %v4715_v15, %v4729_v34 }
 0x518   :  { %v4686_v8 = vpop.permute.xlu2 %4685 }
 0x519   :  { %v4718_v45 = vperm.slane %v4686_v8, %v4709_v43 }
 0x526   :  { %v4692_v49 = vpop.permute.xlu0 %4691 }
 0x527   :  { %v4720_v16 = vperm.slane %v4692_v49, %v4709_v43 }
 0x52b   :  { %v4680_v51 = vpop.permute.xlu1 %4679 }
 0x52c   :  { %v4716_v56 = vperm.slane %v4680_v51, %v4709_v43  ;;  %v4695_v31 = vpop.permute.xlu2 %4694 }
 0x52d   :  { %v4721_v30 = vperm.slane %v4695_v31, %v4709_v43 }
 0x52e   :  { %v4731_v63 = vsel %vm8886_vm12, %v4716_v56, %v4730_v11 }
 0x52f   :  { %v4733_v52 = vsel %vm4732_vm7, %v4717_v4, %v4731_v63 }
 0x530   :  { %4744 = vst.msk [vmem:[%s8395_s8] sm:$0xff] %vm4743_vm11, %v4733_v52 }
 0x536   :  { %v4701_v33 = vpop.permute.xlu0 %4700 }
 0x537   :  { %v4723_v29 = vperm.slane %v4701_v33, %v4709_v43 }
 0x538   :  { %v4704_v55 = vpop.permute.xlu2 %4703 }
 0x539   :  { %v4724_v35 = vperm.slane %v4704_v55, %v4709_v43 }
 0x53f   :  { %v4689_v10 = vpop.permute.xlu1 %4688 }
 0x540   :  { %v4719_v60 = vperm.slane %v4689_v10, %v4709_v43 }
 0x542   :  { %v4734_v18 = vsel %vm4086_vm5, %v4719_v60, %v4718_v45 }
 0x543   :  { %v4735_v14 = vsel %vm4097_vm4, %v4720_v16, %v4734_v18 }
 0x544   :  { %v4736_v20 = vsel %vm4080_vm1, %v4721_v30, %v4735_v14 }
 0x54b   :  { %v4698_v9 = vpop.permute.xlu1 %4697 }
 0x54c   :  { %v4722_v50 = vperm.slane %v4698_v9, %v4709_v43 }
 0x54e   :  { %v4737_v1 = vsel %vm8887_vm14, %v4722_v50, %v4736_v20 }
 0x54f   :  { %v4738_v27 = vsel %vm8888_vm15, %v4723_v29, %v4737_v1 }
 0x550   :  { %v4739_v42 = vsel %vm8889_vm0, %v4724_v35, %v4738_v27 }
 0x557   :  { %v4707_v57 = vpop.permute.xlu1 %4706 }
 0x558   :  { %v4725_v37 = vperm.slane %v4707_v57, %v4709_v43 }
 0x55a   :  { %v4740_v22 = vsel %vm4732_vm7, %v4725_v37, %v4739_v42 }
 0x55b   :  { %4745 = vst.msk [vmem:[%s8395_s8 + $0x8] sm:$0xff] %vm4743_vm11, %v4740_v22 }
 0x55c   :  { %4750 = vsyncpa [#allocation3], 1 }
 0x55d   :  { %4751 = vsyncpa [#allocation5], 1 }
 0x55e   :  { %4752 = vsyncpa [#allocation8], 1 }
 0x55f   :  { %4753 = vsyncpa [#allocation11], 1 }
 0x560   :  { %4754 = vsyncpa [#allocation14], 1 }

</bundles_post_ra>
